<compile_context>
chip_gen: v6e
topology: v6e:2x2x1
jax: 0.10.0
libtpu: 0.0.40
codegen_flags: <defaults>
</compile_context>

<pallas_src>
import functools

import jax
import jax.numpy as jnp
from jax.experimental import pallas as pl
from jax.experimental.pallas import tpu as pltpu

_LANE = 128
_SUBLANE = 8


def _cdiv(a, b):
    return -(-a // b)


def _round_up(x, m):
    return ((x + m - 1) // m) * m


def _gbf_kernel(data_ref, filt_ref, out_ref, *, inv_gamma):
    # data_ref: (TR, 1) f32; filt_ref: (1, STEPS) f32 pre-scaled by 1/gamma.
    d = data_ref[...] * inv_gamma            # O(TR) scaling, not per-element
    diff = d - filt_ref[...]                 # broadcast -> (TR, STEPS)
    # NOTE: exp2 + sqrt(log2 e) folding would shave one VALU mul per element,
    # but it only matters once stores are halved (bf16 out); keep f32 exp.
    out_ref[...] = jnp.exp(-(diff * diff)).astype(out_ref.dtype)


def _gbf_xla(data, filters, gamma, out_dtype):
    x = (data.astype(jnp.float32)[..., None]
         - filters.astype(jnp.float32)) / gamma
    return jnp.exp(-(x * x)).astype(out_dtype)


def gbf_expansion_pallas(data, filters, gamma, *, bond=True, tile_rows=8192,
                         out_dtype=jnp.float32,
                         min_pallas_out_bytes=512 * 1024):
    """Gaussian basis expansion; output shape = data.shape + (steps,).

    NOTE: `gamma` is folded into a compile-time constant (it is a module
    constant in CEGAN); do not pass a traced value for it.
    """
    axis = 2 if bond else 3
    if axis != data.ndim:
        # TODO(synk): mid-axis unsqueeze broadcast (trailing dim must equal
        # steps) has no clean tiled form; only the appended-axis case used by
        # CEGAN is kernelized.
        raise NotImplementedError("only appended-axis expansion supported")

    steps = int(filters.shape[0])
    out_shape = data.shape + (steps,)
    out_itemsize = jnp.dtype(out_dtype).itemsize

    n_rows = 1
    for s in data.shape:
        n_rows *= int(s)

    # Small-problem fallback: below ~0.5 MiB of output, launch + plumbing
    # dominate; a fused XLA elementwise op wins on every TPU generation.
    if n_rows * steps * out_itemsize < min_pallas_out_bytes:
        return _gbf_xla(data, filters, gamma, out_dtype).reshape(out_shape)

    inv_gamma = float(1.0 / float(gamma))

    # ---- Row tiling --------------------------------------------------------
    # Write-bound kernel: the tile should be as large as the scoped-VMEM
    # budget allows (amortizes ~0.35 us per grid step) while introducing as
    # little row padding as possible.
    steps_lanes = _round_up(steps, _LANE)       # lane footprint in VMEM only
    # Live, double-buffered VMEM per tile row: output tile + the (tr, 1) data
    # column, which occupies a full 128-lane * 4 B row in VMEM per sublane row.
    bytes_per_row = 2 * (steps_lanes * out_itemsize + _LANE * 4)
    vmem_live_budget = 24 * 1024 * 1024         # headroom under 40 MiB limit
    max_tr_vmem = max(
        _SUBLANE, (vmem_live_budget // bytes_per_row) // _SUBLANE * _SUBLANE)
    tr_cap = min(max(_SUBLANE, (int(tile_rows) // _SUBLANE) * _SUBLANE),
                 max_tr_vmem,
                 _round_up(n_rows, _SUBLANE))

    n_tiles = _cdiv(n_rows, tr_cap)
    # v7x megacore friendliness: prefer an even grid length once splitting
    # still leaves >= ~2048 rows per tile (negligible cost on v5e/v6e).
    if n_tiles % 2 == 1 and n_rows >= 2 * 2048:
        n_tiles += 1
    tr = _round_up(_cdiv(n_rows, n_tiles), _SUBLANE)
    grid_n = _cdiv(n_rows, tr)

    # Pad only the tiny flat data column so every *input* block is in bounds;
    # the *output* keeps exactly n_rows rows (the final block is partial and
    # its out-of-bounds rows are not written), so no post-kernel slice pass.
    n_rows_in = grid_n * tr
    flat = data.reshape(-1).astype(jnp.float32)
    if n_rows_in != n_rows:
        flat = jnp.pad(flat, (0, n_rows_in - n_rows))
    flat = flat.reshape(n_rows_in, 1)

    # Filters pre-scaled by 1/gamma; output last dim is `steps` exactly
    # (unmasked vst when steps % 128 == 0, masked vst otherwise — still far
    # cheaper than padding to 128 and re-slicing the whole output in HBM).
    filt2d = (filters.astype(jnp.float32) * inv_gamma).reshape(1, steps)

    cost = pl.CostEstimate(
        flops=3 * n_rows * steps,
        transcendentals=n_rows * steps,
        bytes_accessed=(n_rows * steps * out_itemsize
                        + 4 * n_rows_in + 4 * steps),
    )

    out = pl.pallas_call(
        functools.partial(_gbf_kernel, inv_gamma=inv_gamma),
        out_shape=jax.ShapeDtypeStruct((n_rows, steps), out_dtype),
        grid_spec=pltpu.PrefetchScalarGridSpec(
            num_scalar_prefetch=0,
            grid=(grid_n,),
            in_specs=[
                pl.BlockSpec((tr, 1), lambda i: (i, 0)),       # data column
                pl.BlockSpec((1, steps), lambda i: (0, 0)),    # filters (resident)
            ],
            out_specs=pl.BlockSpec((tr, steps), lambda i: (i, 0)),
        ),
        compiler_params=pltpu.CompilerParams(
            dimension_semantics=("parallel",),
            vmem_limit_bytes=40 * 1024 * 1024,
        ),
        cost_estimate=cost,
    )(flat, filt2d)

    return out.reshape(out_shape)


if __name__ == "__main__":
    key = jax.random.PRNGKey(0)
    k1, k2, k3, k4 = jax.random.split(key, 4)

    def reference(data, filters, gamma):
        return jnp.exp(-((data[..., None] - filters) ** 2) / (gamma ** 2))

    # Deterministic "module init": filters = linspace(dmin, dmax, steps)
    steps = 128
    dmin, dmax = 0.0, 8.0
    gamma = (dmax - dmin) / steps
    filters = jnp.linspace(dmin, dmax, steps, dtype=jnp.float32)

    # 1) Small bond path (num_graphs=2, num_edges=16) -> XLA fallback branch.
    bond_data = jax.random.uniform(k1, (2, 16), dtype=jnp.float32,
                                   minval=0.0, maxval=8.0)
    out1 = gbf_expansion_pallas(bond_data, filters, gamma, bond=True)
    jax.block_until_ready(out1)
    assert out1.shape == (2, 16, steps)
    assert jnp.allclose(out1, reference(bond_data, filters, gamma),
                        atol=1e-5, rtol=1e-5)

    # 2) Small angle path (2, 4, 8) -> XLA fallback branch.
    ang_data = jax.random.uniform(k2, (2, 4, 8), dtype=jnp.float32,
                                  minval=0.0, maxval=8.0)
    out2 = gbf_expansion_pallas(ang_data, filters, gamma, bond=False)
    jax.block_until_ready(out2)
    assert out2.shape == (2, 4, 8, steps)
    assert jnp.allclose(out2, reference(ang_data, filters, gamma),
                        atol=1e-5, rtol=1e-5)

    # 3) Pallas path: steps=100 (masked-lane stores), multi-tile grid,
    #    no row padding, no post-kernel slice.
    steps2 = 100
    dmax2 = 5.0
    gamma2 = (dmax2 - dmin) / steps2
    filters2 = jnp.linspace(dmin, dmax2, steps2, dtype=jnp.float32)
    big1 = jax.random.uniform(k3, (8, 520), dtype=jnp.float32,
                              minval=0.0, maxval=5.0)       # 4160 rows
    out3 = gbf_expansion_pallas(big1, filters2, gamma2, bond=True)
    jax.block_until_ready(out3)
    assert out3.shape == (8, 520, steps2)
    assert jnp.allclose(out3, reference(big1, filters2, gamma2),
                        atol=1e-5, rtol=1e-5)

    # 4) Pallas path: steps=128 (unmasked stores), rows not a multiple of the
    #    tile (exercises input-column padding + clipped final output block).
    big2 = jax.random.uniform(k4, (3, 1401), dtype=jnp.float32,
                              minval=0.0, maxval=8.0)       # 4203 rows
    out4 = gbf_expansion_pallas(big2, filters, gamma, bond=True)
    jax.block_until_ready(out4)
    assert out4.shape == (3, 1401, steps)
    assert jnp.allclose(out4, reference(big2, filters, gamma),
                        atol=1e-5, rtol=1e-5)

    print("KERNEL_OK")
</pallas_src>

<mosaic_0001>
module attributes {stable_mosaic.version = 11 : i64} {
  func.func @_gbf_kernel(%arg0: i32, %arg1: memref<2080x1xf32, #tpu.memory_space<vmem>>, %arg2: memref<1x100xf32, #tpu.memory_space<vmem>>, %arg3: memref<2080x100xf32, #tpu.memory_space<vmem>>) attributes {dimension_semantics = [#tpu.dimension_semantics<parallel>], iteration_bounds = array<i64: 2>, scalar_prefetch = 0 : i64, scratch_operands = 0 : i64, tpu.core_type = #tpu.core_type<tc>, window_params = [{transform_indices = @transform_0, window_bounds = array<i64: 2080, 1>}, {pipeline_mode = #tpu.pipeline_mode<synchronous>, transform_indices = @transform_1, window_bounds = array<i64: 1, 100>}, {transform_indices = @transform_2, window_bounds = array<i64: 2080, 100>}]} {
    %c0 = arith.constant 0 : index
    %c0_0 = arith.constant 0 : index
    %0 = vector.load %arg1[%c0, %c0_0] : memref<2080x1xf32, #tpu.memory_space<vmem>>, vector<2080x1xf32>
    %cst = arith.constant 2.000000e+01 : f32
    %1 = vector.broadcast %cst : f32 to vector<2080x1xf32>
    %2 = arith.mulf %0, %1 : vector<2080x1xf32>
    %c0_1 = arith.constant 0 : index
    %c0_2 = arith.constant 0 : index
    %3 = vector.load %arg2[%c0_1, %c0_2] : memref<1x100xf32, #tpu.memory_space<vmem>>, vector<1x100xf32>
    %4 = vector.broadcast %2 : vector<2080x1xf32> to vector<2080x100xf32>
    %5 = vector.broadcast %3 : vector<1x100xf32> to vector<2080x100xf32>
    %6 = arith.subf %4, %5 : vector<2080x100xf32>
    %7 = arith.mulf %6, %6 : vector<2080x100xf32>
    %cst_3 = arith.constant 0.000000e+00 : f32
    %8 = vector.broadcast %cst_3 : f32 to vector<2080x100xf32>
    %9 = arith.subf %8, %7 : vector<2080x100xf32>
    %10 = math.exp %9 : vector<2080x100xf32>
    %c0_4 = arith.constant 0 : index
    %c0_5 = arith.constant 0 : index
    %11 = vector.load %arg3[%c0_4, %c0_5] : memref<2080x100xf32, #tpu.memory_space<vmem>>, vector<2080x100xf32>
    tpu.vector_store %arg3[%c0_4, %c0_5], %10 {strides = array<i32>} : memref<2080x100xf32, #tpu.memory_space<vmem>>, vector<2080x100xf32>,
    return
  }
  func.func @transform_0(%arg0: i32) -> (i32, i32) {
    %c0_i32 = arith.constant 0 : i32
    %c0_i32_0 = arith.constant 0 : i32
    return %arg0, %c0_i32 : i32, i32
  }
  func.func @transform_1(%arg0: i32) -> (i32, i32) {
    %c0_i32 = arith.constant 0 : i32
    %c0_i32_0 = arith.constant 0 : i32
    %c0_i32_1 = arith.constant 0 : i32
    return %c0_i32, %c0_i32_0 : i32, i32
  }
  func.func @transform_2(%arg0: i32) -> (i32, i32) {
    %c0_i32 = arith.constant 0 : i32
    %c0_i32_0 = arith.constant 0 : i32
    return %arg0, %c0_i32 : i32, i32
  }
}

</mosaic_0001>

<bundles_post_ra>
// kernel: tpu_custom_call.1
= control target key start
LH: loop header
LB: loop body
LE: loop exit
PB: predicated region body
PF: predicated region fallthrough
CT: control target
= control target key end

     0   :  { %s4161_s9 = smov 0   ;;  %s5253_s0 = inlined_call_operand.vmem [shape: f32[4160,1], index: 0, kind: input, shape index: {}]   ;;  %s5254_s1 = inlined_call_operand.vmem [shape: f32[1,100], index: 1, kind: input, shape index: {}]   ;;  %s5255_s2 = inlined_call_operand.vmem [shape: f32[4160,100], index: 2, kind: output, shape index: {}]  }
   0x1 LB: > { %s3591_s10 = sadd.s32 4294967295, %s4143_s9   ;;  %p3595_p0 = scmp.ge.s32.totalorder %s4143_s9, 1  ;;  %s4143_s9 = sphi %s4161_s9, %s12_s9  }
   0x2   : > { %p113_p1 = scmp.lt.s32.totalorder %s4143_s9, 3 }
   0x4   : > { %p114_p2 = pnand %p3595_p0, %p113_p1 }
   0x5   : > { %s135_s11 = smul.u32 (!%p114_p2), 260, %s3591_s10 }
   0x6   : > { %117 = sbr.rel (%p114_p2) target bundleno = 681 (0x2a9), region = 28 }
   0x7   : > { %p136_p3 = scmp.lt.s32.totalorder (!%p114_p2), %s135_s11, 519 }
   0xb   : > { %v4145_v0 = vmov 0   ;;  %s5257_s11 = smov (!%p136_p3, %s135_s11), 519  ;;  %vm3274_vm0 = vcmask 818176  }
   0xc   : > { %3611 = vset.pattern.permute.xlu1 %v4145_v0  ;;  %3610 = vset.pattern.permute.xlu0 %v4145_v0  ;;  %s3596_s12 = sshll.u32 %s5257_s11, 3 }
   0xd   : > { %s4177_s15 = scalar_lea.vmem %s5253_s0, %s3596_s12  ;;  %s4275_s20 = scalar_lea.vmem %s5255_s2, %s3596_s12 }
   0xe   : > { %v149_v1 = vld [vmem:[%s4177_s15 + $0x10] sm:$0xff]  ;;  %v147_v2 = vld [vmem:[%s4177_s15] sm:$0xff]  ;;  %v150_v3 = vld [vmem:[%s4177_s15 + $0x18] sm:$0xff] }
   0xf   : > { %v409_v4 = vmul.f32 20.0, %v149_v1  ;;  %v407_v5 = vmul.f32 20.0, %v147_v2  ;;  %v148_v6 = vld [vmem:[%s4177_s15 + $0x8] sm:$0xff]  ;;  %v410_v7 = vmul.f32 20.0, %v150_v3  ;;  %v151_v10 = vld [vmem:[%s4177_s15 + $0x20] sm:$0xff]  ;;  %v154_v13 = vld [vmem:[%s4177_s15 + $0x38] sm:$0xff] }
  0x10   : > { %v408_v8 = vmul.f32 20.0, %v148_v6  ;;  %v152_v9 = vld [vmem:[%s4177_s15 + $0x28] sm:$0xff]  ;;  %v411_v12 = vmul.f32 20.0, %v151_v10  ;;  %v153_v14 = vld [vmem:[%s4177_s15 + $0x30] sm:$0xff]  ;;  %v414_v15 = vmul.f32 20.0, %v154_v13  ;;  %v155_v18 = vld [vmem:[%s4177_s15 + $0x40] sm:$0xff] }
  0x11   : > { %680 = vperm.xlu1 %3611, %v409_v4   ;;  %670 = vperm.xlu0 %3610, %v407_v5   ;;  %v412_v11 = vmul.f32 20.0, %v152_v9  ;;  %v413_v16 = vmul.f32 20.0, %v153_v14  ;;  %v156_v17 = vld [vmem:[%s4177_s15 + $0x48] sm:$0xff]  ;;  %v415_v20 = vmul.f32 20.0, %v155_v18  ;;  %v158_v21 = vld [vmem:[%s4177_s15 + $0x58] sm:$0xff]  ;;  %v157_v22 = vld [vmem:[%s4177_s15 + $0x50] sm:$0xff] }
  0x12   : > { %v416_v19 = vmul.f32 20.0, %v156_v17  ;;  %v418_v23 = vmul.f32 20.0, %v158_v21  ;;  %v417_v24 = vmul.f32 20.0, %v157_v22  ;;  %v160_v25 = vld [vmem:[%s4177_s15 + $0x68] sm:$0xff]  ;;  %v159_v26 = vld [vmem:[%s4177_s15 + $0x60] sm:$0xff]  ;;  %v162_v29 = vld [vmem:[%s4177_s15 + $0x78] sm:$0xff] }
  0x13   : > { %v420_v27 = vmul.f32 20.0, %v160_v25  ;;  %v419_v28 = vmul.f32 20.0, %v159_v26  ;;  %v161_v30 = vld [vmem:[%s4177_s15 + $0x70] sm:$0xff]  ;;  %v422_v31 = vmul.f32 20.0, %v162_v29  ;;  %v164_v33 = vld [vmem:[%s4177_s15 + $0x88] sm:$0xff]  ;;  %v163_v34 = vld [vmem:[%s4177_s15 + $0x80] sm:$0xff] }
  0x14   : > { %v421_v32 = vmul.f32 20.0, %v161_v30  ;;  %v424_v35 = vmul.f32 20.0, %v164_v33  ;;  %v423_v36 = vmul.f32 20.0, %v163_v34  ;;  %v166_v37 = vld [vmem:[%s4177_s15 + $0x98] sm:$0xff]  ;;  %v165_v38 = vld [vmem:[%s4177_s15 + $0x90] sm:$0xff]  ;;  %v168_v41 = vld [vmem:[%s4177_s15 + $0xa8] sm:$0xff] }
  0x15   : > { %685 = vperm.xlu1 %3611, %v410_v7   ;;  %675 = vperm.xlu0 %3610, %v408_v8   ;;  %v426_v39 = vmul.f32 20.0, %v166_v37  ;;  %v425_v40 = vmul.f32 20.0, %v165_v38  ;;  %v167_v42 = vld [vmem:[%s4177_s15 + $0xa0] sm:$0xff]  ;;  %v428_v43 = vmul.f32 20.0, %v168_v41  ;;  %v170_v45 = vld [vmem:[%s4177_s15 + $0xb8] sm:$0xff]  ;;  %v169_v46 = vld [vmem:[%s4177_s15 + $0xb0] sm:$0xff] }
  0x16   : > { %v427_v44 = vmul.f32 20.0, %v167_v42  ;;  %v430_v47 = vmul.f32 20.0, %v170_v45  ;;  %v429_v48 = vmul.f32 20.0, %v169_v46  ;;  %v172_v49 = vld [vmem:[%s4177_s15 + $0xc8] sm:$0xff]  ;;  %v171_v50 = vld [vmem:[%s4177_s15 + $0xc0] sm:$0xff]  ;;  %v174_v53 = vld [vmem:[%s4177_s15 + $0xd8] sm:$0xff] }
  0x17   : > { %v432_v51 = vmul.f32 20.0, %v172_v49  ;;  %v431_v52 = vmul.f32 20.0, %v171_v50  ;;  %v173_v54 = vld [vmem:[%s4177_s15 + $0xd0] sm:$0xff]  ;;  %v434_v55 = vmul.f32 20.0, %v174_v53  ;;  %v176_v57 = vld [vmem:[%s4177_s15 + $0xe8] sm:$0xff]  ;;  %v175_v58 = vld [vmem:[%s4177_s15 + $0xe0] sm:$0xff] }
  0x18   : > { %v433_v56 = vmul.f32 20.0, %v173_v54  ;;  %v436_v59 = vmul.f32 20.0, %v176_v57  ;;  %v435_v60 = vmul.f32 20.0, %v175_v58  ;;  %v178_v61 = vld [vmem:[%s4177_s15 + $0xf8] sm:$0xff]  ;;  %v177_v62 = vld [vmem:[%s4177_s15 + $0xf0] sm:$0xff]  ;;  %v180_v1 = vld [vmem:[%s4177_s15 + $0x108] sm:$0xff] }
  0x19   : > { %695 = vperm.xlu1 %3611, %v412_v11   ;;  %690 = vperm.xlu0 %3610, %v411_v12   ;;  %v438_v63 = vmul.f32 20.0, %v178_v61  ;;  %v437_v0 = vmul.f32 20.0, %v177_v62  ;;  %v179_v2 = vld [vmem:[%s4177_s15 + $0x100] sm:$0xff]  ;;  %v440_v3 = vmul.f32 20.0, %v180_v1  ;;  %v182_v5 = vld [vmem:[%s4177_s15 + $0x118] sm:$0xff]  ;;  %v181_v6 = vld [vmem:[%s4177_s15 + $0x110] sm:$0xff] }
  0x1a   : > { %v439_v4 = vmul.f32 20.0, %v179_v2  ;;  %v442_v7 = vmul.f32 20.0, %v182_v5  ;;  %v441_v8 = vmul.f32 20.0, %v181_v6  ;;  %v184_v9 = vld [vmem:[%s4177_s15 + $0x128] sm:$0xff]  ;;  %v183_v10 = vld [vmem:[%s4177_s15 + $0x120] sm:$0xff]  ;;  %v186_v13 = vld [vmem:[%s4177_s15 + $0x138] sm:$0xff] }
  0x1b   : > { %v444_v11 = vmul.f32 20.0, %v184_v9  ;;  %v443_v12 = vmul.f32 20.0, %v183_v10  ;;  %v185_v14 = vld [vmem:[%s4177_s15 + $0x130] sm:$0xff]  ;;  %v188_v17 = vld [vmem:[%s4177_s15 + $0x148] sm:$0xff]  ;;  %v187_v18 = vld [vmem:[%s4177_s15 + $0x140] sm:$0xff] }
  0x1c   : > { %v190_v21 = vld [vmem:[%s4177_s15 + $0x158] sm:$0xff]  ;;  %v189_v22 = vld [vmem:[%s4177_s15 + $0x150] sm:$0xff]  ;;  %v192_v25 = vld [vmem:[%s4177_s15 + $0x168] sm:$0xff] }
  0x1d   : > { %705 = vperm.xlu1 %3611, %v414_v15   ;;  %700 = vperm.xlu0 %3610, %v413_v16   ;;  %v446_v15 = vmul.f32 20.0, %v186_v13  ;;  %v445_v16 = vmul.f32 20.0, %v185_v14  ;;  %v191_v26 = vld [vmem:[%s4177_s15 + $0x160] sm:$0xff]  ;;  %v194_v29 = vld [vmem:[%s4177_s15 + $0x178] sm:$0xff]  ;;  %v193_v30 = vld [vmem:[%s4177_s15 + $0x170] sm:$0xff] }
  0x1e   : > { %v196_v33 = vld [vmem:[%s4177_s15 + $0x188] sm:$0xff]  ;;  %v195_v34 = vld [vmem:[%s4177_s15 + $0x180] sm:$0xff]  ;;  %v198_v37 = vld [vmem:[%s4177_s15 + $0x198] sm:$0xff] }
  0x1f   : > { %v197_v38 = vld [vmem:[%s4177_s15 + $0x190] sm:$0xff]  ;;  %v200_v41 = vld [vmem:[%s4177_s15 + $0x1a8] sm:$0xff]  ;;  %v199_v42 = vld [vmem:[%s4177_s15 + $0x1a0] sm:$0xff] }
  0x20   : > { %v202_v45 = vld [vmem:[%s4177_s15 + $0x1b8] sm:$0xff]  ;;  %v201_v46 = vld [vmem:[%s4177_s15 + $0x1b0] sm:$0xff]  ;;  %v204_v49 = vld [vmem:[%s4177_s15 + $0x1c8] sm:$0xff] }
  0x21   : > { %715 = vperm.xlu1 %3611, %v416_v19   ;;  %710 = vperm.xlu0 %3610, %v415_v20   ;;  %v448_v19 = vmul.f32 20.0, %v188_v17  ;;  %v447_v20 = vmul.f32 20.0, %v187_v18  ;;  %v203_v50 = vld [vmem:[%s4177_s15 + $0x1c0] sm:$0xff]  ;;  %v206_v53 = vld [vmem:[%s4177_s15 + $0x1d8] sm:$0xff]  ;;  %v205_v54 = vld [vmem:[%s4177_s15 + $0x1d0] sm:$0xff] }
  0x22   : > { %v208_v57 = vld [vmem:[%s4177_s15 + $0x1e8] sm:$0xff]  ;;  %v207_v58 = vld [vmem:[%s4177_s15 + $0x1e0] sm:$0xff]  ;;  %v210_v61 = vld [vmem:[%s4177_s15 + $0x1f8] sm:$0xff] }
  0x23   : > { %v209_v62 = vld [vmem:[%s4177_s15 + $0x1f0] sm:$0xff]  ;;  %v4246_v1 = vld [vmem:[%s5254_s1] ss:$0 sm:$0xff]  ;;  %v212_v2 = vld [vmem:[%s4177_s15 + $0x208] sm:$0xff] }
  0x24   : > { %v214_v10 = vld [vmem:[%s4177_s15 + $0x218] sm:$0xff] }
  0x25   : > { %725 = vperm.xlu1 %3611, %v418_v23   ;;  %720 = vperm.xlu0 %3610, %v417_v24   ;;  %v450_v23 = vmul.f32 20.0, %v190_v21  ;;  %v449_v24 = vmul.f32 20.0, %v189_v22  ;;  %v216_v22 = vld [vmem:[%s4177_s15 + $0x228] sm:$0xff] }
  0x29   : > { %735 = vperm.xlu1 %3611, %v420_v27   ;;  %730 = vperm.xlu0 %3610, %v419_v28   ;;  %v452_v27 = vmul.f32 20.0, %v192_v25  ;;  %v451_v28 = vmul.f32 20.0, %v191_v26 }
  0x2d   : > { %745 = vperm.xlu1 %3611, %v422_v31   ;;  %740 = vperm.xlu0 %3610, %v421_v32   ;;  %v454_v31 = vmul.f32 20.0, %v194_v29  ;;  %v453_v32 = vmul.f32 20.0, %v193_v30  ;;  %v476_v30 = vmul.f32 20.0, %v216_v22 }
  0x31   : > { %755 = vperm.xlu1 %3611, %v424_v35   ;;  %750 = vperm.xlu0 %3610, %v423_v36   ;;  %v456_v35 = vmul.f32 20.0, %v196_v33  ;;  %v455_v36 = vmul.f32 20.0, %v195_v34 }
  0x35   : > { %765 = vperm.xlu1 %3611, %v426_v39   ;;  %760 = vperm.xlu0 %3610, %v425_v40   ;;  %v458_v39 = vmul.f32 20.0, %v198_v37  ;;  %v457_v40 = vmul.f32 20.0, %v197_v38 }
  0x39   : > { %775 = vperm.xlu1 %3611, %v428_v43   ;;  %770 = vperm.xlu0 %3610, %v427_v44   ;;  %v460_v43 = vmul.f32 20.0, %v200_v41  ;;  %v459_v44 = vmul.f32 20.0, %v199_v42 }
  0x3d   : > { %785 = vperm.xlu1 %3611, %v430_v47   ;;  %780 = vperm.xlu0 %3610, %v429_v48   ;;  %v462_v47 = vmul.f32 20.0, %v202_v45  ;;  %v461_v48 = vmul.f32 20.0, %v201_v46 }
  0x41   : > { %795 = vperm.xlu1 %3611, %v432_v51   ;;  %790 = vperm.xlu0 %3610, %v431_v52   ;;  %v464_v51 = vmul.f32 20.0, %v204_v49  ;;  %v463_v52 = vmul.f32 20.0, %v203_v50  ;;  %v220_v49 = vld [vmem:[%s4177_s15 + $0x248] sm:$0xff]  ;;  %v219_v50 = vld [vmem:[%s4177_s15 + $0x240] sm:$0xff] }
  0x45   : > { %805 = vperm.xlu1 %3611, %v434_v55   ;;  %800 = vperm.xlu0 %3610, %v433_v56   ;;  %v466_v55 = vmul.f32 20.0, %v206_v53  ;;  %v465_v56 = vmul.f32 20.0, %v205_v54 }
  0x49   : > { %815 = vperm.xlu1 %3611, %v436_v59   ;;  %810 = vperm.xlu0 %3610, %v435_v60   ;;  %v468_v59 = vmul.f32 20.0, %v208_v57  ;;  %v467_v60 = vmul.f32 20.0, %v207_v58  ;;  %v480_v58 = vmul.f32 20.0, %v220_v49 }
  0x4d   : > { %825 = vperm.xlu1 %3611, %v438_v63   ;;  %820 = vperm.xlu0 %3610, %v437_v0   ;;  %v470_v63 = vmul.f32 20.0, %v210_v61  ;;  %v469_v0 = vmul.f32 20.0, %v209_v62 }
  0x51   : > { %835 = vperm.xlu1 %3611, %v440_v3   ;;  %830 = vperm.xlu0 %3610, %v439_v4   ;;  %v211_v3 = vld [vmem:[%s4177_s15 + $0x200] sm:$0xff] }
  0x52   : > { %v471_v9 = vmul.f32 20.0, %v211_v3 }
  0x55   : > { %845 = vperm.xlu1 %3611, %v442_v7   ;;  %840 = vperm.xlu0 %3610, %v441_v8   ;;  %v472_v8 = vmul.f32 20.0, %v212_v2 }
  0x59   : > { %855 = vperm.xlu1 %3611, %v444_v11   ;;  %850 = vperm.xlu0 %3610, %v443_v12   ;;  %v213_v11 = vld [vmem:[%s4177_s15 + $0x210] sm:$0xff] }
  0x5a   : > { %v473_v17 = vmul.f32 20.0, %v213_v11 }
  0x5d   : > { %865 = vperm.xlu1 %3611, %v446_v15   ;;  %860 = vperm.xlu0 %3610, %v445_v16   ;;  %v474_v16 = vmul.f32 20.0, %v214_v10 }
  0x61   : > { %875 = vperm.xlu1 %3611, %v448_v19   ;;  %870 = vperm.xlu0 %3610, %v447_v20  }
  0x65   : > { %885 = vperm.xlu1 %3611, %v450_v23   ;;  %880 = vperm.xlu0 %3610, %v449_v24   ;;  %v215_v23 = vld [vmem:[%s4177_s15 + $0x220] sm:$0xff] }
  0x69   : > { %895 = vperm.xlu1 %3611, %v452_v27   ;;  %890 = vperm.xlu0 %3610, %v451_v28  }
  0x6d   : > { %905 = vperm.xlu1 %3611, %v454_v31   ;;  %900 = vperm.xlu0 %3610, %v453_v32   ;;  %v475_v31 = vmul.f32 20.0, %v215_v23 }
  0x71   : > { %915 = vperm.xlu1 %3611, %v456_v35   ;;  %910 = vperm.xlu0 %3610, %v455_v36   ;;  %v218_v35 = vld [vmem:[%s4177_s15 + $0x238] sm:$0xff]  ;;  %v217_v36 = vld [vmem:[%s4177_s15 + $0x230] sm:$0xff] }
  0x72   : > { %v477_v45 = vmul.f32 20.0, %v217_v36 }
  0x75   : > { %925 = vperm.xlu1 %3611, %v458_v39   ;;  %920 = vperm.xlu0 %3610, %v457_v40  }
  0x79   : > { %935 = vperm.xlu1 %3611, %v460_v43   ;;  %930 = vperm.xlu0 %3610, %v459_v44   ;;  %v478_v44 = vmul.f32 20.0, %v218_v35 }
  0x7d   : > { %945 = vperm.xlu1 %3611, %v462_v47   ;;  %940 = vperm.xlu0 %3610, %v461_v48  }
  0x81   : > { %955 = vperm.xlu1 %3611, %v464_v51   ;;  %950 = vperm.xlu0 %3610, %v463_v52  }
  0x85   : > { %965 = vperm.xlu1 %3611, %v466_v55   ;;  %960 = vperm.xlu0 %3610, %v465_v56  }
  0x89   : > { %975 = vperm.xlu1 %3611, %v468_v59   ;;  %970 = vperm.xlu0 %3610, %v467_v60   ;;  %v479_v59 = vmul.f32 20.0, %v219_v50 }
  0x8c   : > { %v681_v4 = vpop.permute.xlu1 %680  ;;  %v671_v5 = vpop.permute.xlu0 %670 }
  0x8d   : > { %v1976_v6 = vsub.f32 %v681_v4, %v4246_v1  ;;  %v1974_v7 = vsub.f32 %v671_v5, %v4246_v1  ;;  %985 = vperm.xlu1 %3611, %v470_v63   ;;  %980 = vperm.xlu0 %3610, %v469_v0   ;;  %v222_v63 = vld [vmem:[%s4177_s15 + $0x258] sm:$0xff]  ;;  %v221_v0 = vld [vmem:[%s4177_s15 + $0x250] sm:$0xff] }
  0x8e   : > { %v481_v10 = vmul.f32 20.0, %v221_v0 }
  0x8f   : > { %v2236_v12 = vmul.f32 %v1976_v6, %v1976_v6  ;;  %v2234_v13 = vmul.f32 %v1974_v7, %v1974_v7 }
  0x90   : > { %v686_v14 = vpop.permute.xlu1 %685  ;;  %v676_v15 = vpop.permute.xlu0 %675 }
  0x91   : > { %v2496_v18 = vsub.f32 0.0, %v2236_v12  ;;  %v2494_v19 = vsub.f32 0.0, %v2234_v13  ;;  %v1977_v20 = vsub.f32 %v686_v14, %v4246_v1  ;;  %v1975_v21 = vsub.f32 %v676_v15, %v4246_v1  ;;  %995 = vperm.xlu1 %3611, %v472_v8   ;;  %990 = vperm.xlu0 %3610, %v471_v9   ;;  %v224_v14 = vld [vmem:[%s4177_s15 + $0x268] sm:$0xff]  ;;  %v223_v15 = vld [vmem:[%s4177_s15 + $0x260] sm:$0xff] }
  0x92   : > { %v482_v9 = vmul.f32 20.0, %v222_v63  ;;  %v229_v63 = vld [vmem:[%s4177_s15 + $0x290] sm:$0xff] }
  0x93   : > { %v2758_v24 = vmul.f32 1.442695, %v2496_v18  ;;  %v2754_v25 = vmul.f32 1.442695, %v2494_v19  ;;  %v2237_v26 = vmul.f32 %v1977_v20, %v1977_v20  ;;  %v2235_v27 = vmul.f32 %v1975_v21, %v1975_v21 }
  0x94   : > { %v696_v28 = vpop.permute.xlu1 %695  ;;  %v691_v29 = vpop.permute.xlu0 %690 }
  0x95   : > { %3612 = vpow2.f32 %v2758_v24  ;;  %v2497_v32 = vsub.f32 0.0, %v2237_v26  ;;  %v2495_v33 = vsub.f32 0.0, %v2235_v27  ;;  %v1979_v34 = vsub.f32 %v696_v28, %v4246_v1  ;;  %1005 = vperm.xlu1 %3611, %v474_v16   ;;  %1000 = vperm.xlu0 %3610, %v473_v17  }
  0x96   : > { %3614 = vpow2.f32 %v2754_v25  ;;  %v1978_v37 = vsub.f32 %v691_v29, %v4246_v1  ;;  %v484_v25 = vmul.f32 20.0, %v224_v14  ;;  %v483_v26 = vmul.f32 20.0, %v223_v15  ;;  %v232_v15 = vld [vmem:[%s4177_s15 + $0x2a8] sm:$0xff] }
  0x97   : > { %v2760_v38 = vmul.f32 1.442695, %v2497_v32  ;;  %v2756_v39 = vmul.f32 1.442695, %v2495_v33  ;;  %v2239_v40 = vmul.f32 %v1979_v34, %v1979_v34 }
  0x98   : > { %v2238_v41 = vmul.f32 %v1978_v37, %v1978_v37  ;;  %v706_v42 = vpop.permute.xlu1 %705  ;;  %v701_v43 = vpop.permute.xlu0 %700 }
  0x99   : > { %3616 = vpow2.f32 %v2760_v38  ;;  %v2499_v46 = vsub.f32 0.0, %v2239_v40  ;;  %v1981_v47 = vsub.f32 %v706_v42, %v4246_v1  ;;  %v1980_v48 = vsub.f32 %v701_v43, %v4246_v1  ;;  %1015 = vperm.xlu1 %3611, %v476_v30   ;;  %1010 = vperm.xlu0 %3610, %v475_v31   ;;  %v226_v30 = vld [vmem:[%s4177_s15 + $0x278] sm:$0xff]  ;;  %v225_v31 = vld [vmem:[%s4177_s15 + $0x270] sm:$0xff] }
  0x9a   : > { %3618 = vpow2.f32 %v2756_v39  ;;  %v2498_v51 = vsub.f32 0.0, %v2238_v41  ;;  %v486_v41 = vmul.f32 20.0, %v226_v30  ;;  %v485_v42 = vmul.f32 20.0, %v225_v31  ;;  %v234_v31 = vld [vmem:[%s4177_s15 + $0x2b8] sm:$0xff] }
  0x9b   : > { %v2764_v52 = vmul.f32 1.442695, %v2499_v46  ;;  %v2241_v53 = vmul.f32 %v1981_v47, %v1981_v47  ;;  %v2240_v54 = vmul.f32 %v1980_v48, %v1980_v48  ;;  %v228_v46 = vld [vmem:[%s4177_s15 + $0x288] sm:$0xff]  ;;  %v227_v47 = vld [vmem:[%s4177_s15 + $0x280] sm:$0xff] }
  0x9c   : > { %v2762_v55 = vmul.f32 1.442695, %v2498_v51  ;;  %v716_v56 = vpop.permute.xlu1 %715  ;;  %v711_v57 = vpop.permute.xlu0 %710 }
  0x9d   : > { %3620 = vpow2.f32 %v2764_v52  ;;  %v2501_v60 = vsub.f32 0.0, %v2241_v53  ;;  %v2500_v61 = vsub.f32 0.0, %v2240_v54  ;;  %v1983_v62 = vsub.f32 %v716_v56, %v4246_v1  ;;  %1025 = vperm.xlu1 %3611, %v478_v44   ;;  %1020 = vperm.xlu0 %3610, %v477_v45  }
  0x9e   : > { %3622 = vpow2.f32 %v2762_v55  ;;  %v1982_v2 = vsub.f32 %v711_v57, %v4246_v1  ;;  %v488_v57 = vmul.f32 20.0, %v228_v46 }
  0x9f   : > { %v2768_v3 = vmul.f32 1.442695, %v2501_v60  ;;  %v2766_v4 = vmul.f32 1.442695, %v2500_v61  ;;  %v2243_v5 = vmul.f32 %v1983_v62, %v1983_v62  ;;  %v230_v62 = vld [vmem:[%s4177_s15 + $0x298] sm:$0xff] }
  0xa0   : > { %v2242_v6 = vmul.f32 %v1982_v2, %v1982_v2  ;;  %v726_v7 = vpop.permute.xlu1 %725  ;;  %v721_v8 = vpop.permute.xlu0 %720 }
  0xa1   : > { %3624 = vpow2.f32 %v2768_v3  ;;  %v2503_v11 = vsub.f32 0.0, %v2243_v5  ;;  %v1985_v12 = vsub.f32 %v726_v7, %v4246_v1  ;;  %v1984_v13 = vsub.f32 %v721_v8, %v4246_v1  ;;  %1035 = vperm.xlu1 %3611, %v480_v58   ;;  %1030 = vperm.xlu0 %3610, %v479_v59  }
  0xa2   : > { %v3613_v16 = vpop.eup %3612  ;;  %3626 = vpow2.f32 %v2766_v4  ;;  %v2502_v17 = vsub.f32 0.0, %v2242_v6  ;;  %v487_v58 = vmul.f32 20.0, %v227_v47  ;;  %v236_v47 = vld [vmem:[%s4177_s15 + $0x2c8] sm:$0xff] }
  0xa3   : > { %v3615_v18 = vpop.eup %3614  ;;  %3277 = vst.msk [vmem:[%s4275_s20 + $0x10] sm:$0xff] %vm3274_vm0, %v3613_v16  ;;  %v2772_v19 = vmul.f32 1.442695, %v2503_v11  ;;  %v2245_v20 = vmul.f32 %v1985_v12, %v1985_v12  ;;  %v2244_v21 = vmul.f32 %v1984_v13, %v1984_v13  ;;  %v489_v11 = vmul.f32 20.0, %v229_v63  ;;  %v231_v16 = vld [vmem:[%s4177_s15 + $0x2a0] sm:$0xff]  ;;  %v238_v63 = vld [vmem:[%s4177_s15 + $0x2d8] sm:$0xff] }
  0xa4   : > { %3275 = vst.msk [vmem:[%s4275_s20] sm:$0xff] %vm3274_vm0, %v3615_v18  ;;  %v2770_v22 = vmul.f32 1.442695, %v2502_v17  ;;  %v736_v23 = vpop.permute.xlu1 %735  ;;  %v731_v24 = vpop.permute.xlu0 %730 }
  0xa5   : > { %3628 = vpow2.f32 %v2772_v19  ;;  %v2505_v27 = vsub.f32 0.0, %v2245_v20  ;;  %v2504_v28 = vsub.f32 0.0, %v2244_v21  ;;  %v1987_v29 = vsub.f32 %v736_v23, %v4246_v1  ;;  %1045 = vperm.xlu1 %3611, %v482_v9   ;;  %1040 = vperm.xlu0 %3610, %v481_v10  }
  0xa6   : > { %v3617_v32 = vpop.eup %3616  ;;  %3630 = vpow2.f32 %v2770_v22  ;;  %v1986_v33 = vsub.f32 %v731_v24, %v4246_v1  ;;  %v490_v10 = vmul.f32 20.0, %v230_v62 }
  0xa7   : > { %v3619_v34 = vpop.eup %3618  ;;  %3278 = vst.msk [vmem:[%s4275_s20 + $0x18] sm:$0xff] %vm3274_vm0, %v3617_v32  ;;  %v2776_v35 = vmul.f32 1.442695, %v2505_v27  ;;  %v2774_v36 = vmul.f32 1.442695, %v2504_v28  ;;  %v2247_v37 = vmul.f32 %v1987_v29, %v1987_v29  ;;  %v491_v27 = vmul.f32 20.0, %v231_v16 }
  0xa8   : > { %3276 = vst.msk [vmem:[%s4275_s20 + $0x8] sm:$0xff] %vm3274_vm0, %v3619_v34  ;;  %v2246_v38 = vmul.f32 %v1986_v33, %v1986_v33  ;;  %v746_v39 = vpop.permute.xlu1 %745  ;;  %v741_v40 = vpop.permute.xlu0 %740  ;;  %v233_v32 = vld [vmem:[%s4177_s15 + $0x2b0] sm:$0xff]  ;;  %v240_v16 = vld [vmem:[%s4177_s15 + $0x2e8] sm:$0xff] }
  0xa9   : > { %3632 = vpow2.f32 %v2776_v35  ;;  %v2507_v43 = vsub.f32 0.0, %v2247_v37  ;;  %v1989_v44 = vsub.f32 %v746_v39, %v4246_v1  ;;  %v1988_v45 = vsub.f32 %v741_v40, %v4246_v1  ;;  %1055 = vperm.xlu1 %3611, %v484_v25   ;;  %1050 = vperm.xlu0 %3610, %v483_v26  }
  0xaa   : > { %v3621_v48 = vpop.eup %3620  ;;  %3634 = vpow2.f32 %v2774_v36  ;;  %v2506_v49 = vsub.f32 0.0, %v2246_v38  ;;  %v492_v26 = vmul.f32 20.0, %v232_v15 }
  0xab   : > { %v3623_v50 = vpop.eup %3622  ;;  %3280 = vst.msk [vmem:[%s4275_s20 + $0x28] sm:$0xff] %vm3274_vm0, %v3621_v48  ;;  %v2780_v51 = vmul.f32 1.442695, %v2507_v43  ;;  %v2249_v52 = vmul.f32 %v1989_v44, %v1989_v44  ;;  %v2248_v53 = vmul.f32 %v1988_v45, %v1988_v45  ;;  %v493_v43 = vmul.f32 20.0, %v233_v32  ;;  %v235_v48 = vld [vmem:[%s4177_s15 + $0x2c0] sm:$0xff]  ;;  %v242_v32 = vld [vmem:[%s4177_s15 + $0x2f8] sm:$0xff] }
  0xac   : > { %3279 = vst.msk [vmem:[%s4275_s20 + $0x20] sm:$0xff] %vm3274_vm0, %v3623_v50  ;;  %v2778_v54 = vmul.f32 1.442695, %v2506_v49  ;;  %v756_v55 = vpop.permute.xlu1 %755  ;;  %v751_v56 = vpop.permute.xlu0 %750 }
  0xad   : > { %3636 = vpow2.f32 %v2780_v51  ;;  %v2509_v59 = vsub.f32 0.0, %v2249_v52  ;;  %v2508_v60 = vsub.f32 0.0, %v2248_v53  ;;  %v1991_v61 = vsub.f32 %v756_v55, %v4246_v1  ;;  %1065 = vperm.xlu1 %3611, %v486_v41   ;;  %1060 = vperm.xlu0 %3610, %v485_v42  }
  0xae   : > { %v3625_v0 = vpop.eup %3624  ;;  %3638 = vpow2.f32 %v2778_v54  ;;  %v1990_v2 = vsub.f32 %v751_v56, %v4246_v1  ;;  %v494_v42 = vmul.f32 20.0, %v234_v31 }
  0xaf   : > { %v3627_v3 = vpop.eup %3626  ;;  %3282 = vst.msk [vmem:[%s4275_s20 + $0x38] sm:$0xff] %vm3274_vm0, %v3625_v0  ;;  %v2784_v4 = vmul.f32 1.442695, %v2509_v59  ;;  %v2782_v5 = vmul.f32 1.442695, %v2508_v60  ;;  %v2251_v6 = vmul.f32 %v1991_v61, %v1991_v61  ;;  %v495_v59 = vmul.f32 20.0, %v235_v48 }
  0xb0   : > { %3281 = vst.msk [vmem:[%s4275_s20 + $0x30] sm:$0xff] %vm3274_vm0, %v3627_v3  ;;  %v2250_v7 = vmul.f32 %v1990_v2, %v1990_v2  ;;  %v766_v8 = vpop.permute.xlu1 %765  ;;  %v761_v9 = vpop.permute.xlu0 %760  ;;  %v237_v0 = vld [vmem:[%s4177_s15 + $0x2d0] sm:$0xff]  ;;  %v244_v48 = vld [vmem:[%s4177_s15 + $0x308] sm:$0xff] }
  0xb1   : > { %3640 = vpow2.f32 %v2784_v4  ;;  %v2511_v12 = vsub.f32 0.0, %v2251_v6  ;;  %v1993_v13 = vsub.f32 %v766_v8, %v4246_v1  ;;  %v1992_v14 = vsub.f32 %v761_v9, %v4246_v1  ;;  %1075 = vperm.xlu1 %3611, %v488_v57   ;;  %1070 = vperm.xlu0 %3610, %v487_v58  }
  0xb2   : > { %v3629_v17 = vpop.eup %3628  ;;  %3642 = vpow2.f32 %v2782_v5  ;;  %v2510_v18 = vsub.f32 0.0, %v2250_v7  ;;  %v496_v58 = vmul.f32 20.0, %v236_v47 }
  0xb3   : > { %v3631_v19 = vpop.eup %3630  ;;  %3284 = vst.msk [vmem:[%s4275_s20 + $0x48] sm:$0xff] %vm3274_vm0, %v3629_v17  ;;  %v2788_v20 = vmul.f32 1.442695, %v2511_v12  ;;  %v2253_v21 = vmul.f32 %v1993_v13, %v1993_v13  ;;  %v2252_v22 = vmul.f32 %v1992_v14, %v1992_v14  ;;  %v497_v12 = vmul.f32 20.0, %v237_v0  ;;  %v239_v17 = vld [vmem:[%s4177_s15 + $0x2e0] sm:$0xff]  ;;  %v246_v0 = vld [vmem:[%s4177_s15 + $0x318] sm:$0xff] }
  0xb4   : > { %3283 = vst.msk [vmem:[%s4275_s20 + $0x40] sm:$0xff] %vm3274_vm0, %v3631_v19  ;;  %v2786_v23 = vmul.f32 1.442695, %v2510_v18  ;;  %v776_v24 = vpop.permute.xlu1 %775  ;;  %v771_v25 = vpop.permute.xlu0 %770 }
  0xb5   : > { %3644 = vpow2.f32 %v2788_v20  ;;  %v2513_v28 = vsub.f32 0.0, %v2253_v21  ;;  %v2512_v29 = vsub.f32 0.0, %v2252_v22  ;;  %v1995_v30 = vsub.f32 %v776_v24, %v4246_v1  ;;  %1085 = vperm.xlu1 %3611, %v490_v10   ;;  %1080 = vperm.xlu0 %3610, %v489_v11  }
  0xb6   : > { %v3633_v33 = vpop.eup %3632  ;;  %3646 = vpow2.f32 %v2786_v23  ;;  %v1994_v34 = vsub.f32 %v771_v25, %v4246_v1  ;;  %v498_v11 = vmul.f32 20.0, %v238_v63 }
  0xb7   : > { %v3635_v35 = vpop.eup %3634  ;;  %3286 = vst.msk [vmem:[%s4275_s20 + $0x58] sm:$0xff] %vm3274_vm0, %v3633_v33  ;;  %v2792_v36 = vmul.f32 1.442695, %v2513_v28  ;;  %v2790_v37 = vmul.f32 1.442695, %v2512_v29  ;;  %v2255_v38 = vmul.f32 %v1995_v30, %v1995_v30  ;;  %v499_v28 = vmul.f32 20.0, %v239_v17 }
  0xb8   : > { %3285 = vst.msk [vmem:[%s4275_s20 + $0x50] sm:$0xff] %vm3274_vm0, %v3635_v35  ;;  %v2254_v39 = vmul.f32 %v1994_v34, %v1994_v34  ;;  %v786_v40 = vpop.permute.xlu1 %785  ;;  %v781_v41 = vpop.permute.xlu0 %780  ;;  %v241_v33 = vld [vmem:[%s4177_s15 + $0x2f0] sm:$0xff]  ;;  %v248_v17 = vld [vmem:[%s4177_s15 + $0x328] sm:$0xff] }
  0xb9   : > { %3648 = vpow2.f32 %v2792_v36  ;;  %v2515_v44 = vsub.f32 0.0, %v2255_v38  ;;  %v1997_v45 = vsub.f32 %v786_v40, %v4246_v1  ;;  %v1996_v46 = vsub.f32 %v781_v41, %v4246_v1  ;;  %1095 = vperm.xlu1 %3611, %v492_v26   ;;  %1090 = vperm.xlu0 %3610, %v491_v27  }
  0xba   : > { %v3637_v49 = vpop.eup %3636  ;;  %3650 = vpow2.f32 %v2790_v37  ;;  %v2514_v50 = vsub.f32 0.0, %v2254_v39  ;;  %v500_v27 = vmul.f32 20.0, %v240_v16 }
  0xbb   : > { %v3639_v51 = vpop.eup %3638  ;;  %3288 = vst.msk [vmem:[%s4275_s20 + $0x68] sm:$0xff] %vm3274_vm0, %v3637_v49  ;;  %v2796_v52 = vmul.f32 1.442695, %v2515_v44  ;;  %v2257_v53 = vmul.f32 %v1997_v45, %v1997_v45  ;;  %v2256_v54 = vmul.f32 %v1996_v46, %v1996_v46  ;;  %v501_v44 = vmul.f32 20.0, %v241_v33  ;;  %v243_v49 = vld [vmem:[%s4177_s15 + $0x300] sm:$0xff]  ;;  %v250_v33 = vld [vmem:[%s4177_s15 + $0x338] sm:$0xff] }
  0xbc   : > { %3287 = vst.msk [vmem:[%s4275_s20 + $0x60] sm:$0xff] %vm3274_vm0, %v3639_v51  ;;  %v2794_v55 = vmul.f32 1.442695, %v2514_v50  ;;  %v796_v56 = vpop.permute.xlu1 %795  ;;  %v791_v57 = vpop.permute.xlu0 %790 }
  0xbd   : > { %3652 = vpow2.f32 %v2796_v52  ;;  %v2517_v60 = vsub.f32 0.0, %v2257_v53  ;;  %v2516_v61 = vsub.f32 0.0, %v2256_v54  ;;  %v1999_v62 = vsub.f32 %v796_v56, %v4246_v1  ;;  %1105 = vperm.xlu1 %3611, %v494_v42   ;;  %1100 = vperm.xlu0 %3610, %v493_v43  }
  0xbe   : > { %v3641_v2 = vpop.eup %3640  ;;  %3654 = vpow2.f32 %v2794_v55  ;;  %v1998_v3 = vsub.f32 %v791_v57, %v4246_v1  ;;  %v502_v43 = vmul.f32 20.0, %v242_v32 }
  0xbf   : > { %v3643_v4 = vpop.eup %3642  ;;  %3290 = vst.msk [vmem:[%s4275_s20 + $0x78] sm:$0xff] %vm3274_vm0, %v3641_v2  ;;  %v2800_v5 = vmul.f32 1.442695, %v2517_v60  ;;  %v2798_v6 = vmul.f32 1.442695, %v2516_v61  ;;  %v2259_v7 = vmul.f32 %v1999_v62, %v1999_v62  ;;  %v503_v60 = vmul.f32 20.0, %v243_v49 }
  0xc0   : > { %3289 = vst.msk [vmem:[%s4275_s20 + $0x70] sm:$0xff] %vm3274_vm0, %v3643_v4  ;;  %v2258_v8 = vmul.f32 %v1998_v3, %v1998_v3  ;;  %v806_v9 = vpop.permute.xlu1 %805  ;;  %v801_v10 = vpop.permute.xlu0 %800  ;;  %v245_v2 = vld [vmem:[%s4177_s15 + $0x310] sm:$0xff]  ;;  %v252_v49 = vld [vmem:[%s4177_s15 + $0x348] sm:$0xff] }
  0xc1   : > { %3656 = vpow2.f32 %v2800_v5  ;;  %v2519_v13 = vsub.f32 0.0, %v2259_v7  ;;  %v2001_v14 = vsub.f32 %v806_v9, %v4246_v1  ;;  %v2000_v15 = vsub.f32 %v801_v10, %v4246_v1  ;;  %1115 = vperm.xlu1 %3611, %v496_v58   ;;  %1110 = vperm.xlu0 %3610, %v495_v59  }
  0xc2   : > { %v3645_v18 = vpop.eup %3644  ;;  %3658 = vpow2.f32 %v2798_v6  ;;  %v2518_v19 = vsub.f32 0.0, %v2258_v8  ;;  %v504_v59 = vmul.f32 20.0, %v244_v48 }
  0xc3   : > { %v3647_v20 = vpop.eup %3646  ;;  %3292 = vst.msk [vmem:[%s4275_s20 + $0x88] sm:$0xff] %vm3274_vm0, %v3645_v18  ;;  %v2804_v21 = vmul.f32 1.442695, %v2519_v13  ;;  %v2261_v22 = vmul.f32 %v2001_v14, %v2001_v14  ;;  %v2260_v23 = vmul.f32 %v2000_v15, %v2000_v15  ;;  %v505_v13 = vmul.f32 20.0, %v245_v2  ;;  %v247_v18 = vld [vmem:[%s4177_s15 + $0x320] sm:$0xff]  ;;  %v254_v2 = vld [vmem:[%s4177_s15 + $0x358] sm:$0xff] }
  0xc4   : > { %3291 = vst.msk [vmem:[%s4275_s20 + $0x80] sm:$0xff] %vm3274_vm0, %v3647_v20  ;;  %v2802_v24 = vmul.f32 1.442695, %v2518_v19  ;;  %v816_v25 = vpop.permute.xlu1 %815  ;;  %v811_v26 = vpop.permute.xlu0 %810 }
  0xc5   : > { %3660 = vpow2.f32 %v2804_v21  ;;  %v2521_v29 = vsub.f32 0.0, %v2261_v22  ;;  %v2520_v30 = vsub.f32 0.0, %v2260_v23  ;;  %v2003_v31 = vsub.f32 %v816_v25, %v4246_v1  ;;  %1125 = vperm.xlu1 %3611, %v498_v11   ;;  %1120 = vperm.xlu0 %3610, %v497_v12  }
  0xc6   : > { %v3649_v34 = vpop.eup %3648  ;;  %3662 = vpow2.f32 %v2802_v24  ;;  %v2002_v35 = vsub.f32 %v811_v26, %v4246_v1  ;;  %v506_v12 = vmul.f32 20.0, %v246_v0 }
  0xc7   : > { %v3651_v36 = vpop.eup %3650  ;;  %3294 = vst.msk [vmem:[%s4275_s20 + $0x98] sm:$0xff] %vm3274_vm0, %v3649_v34  ;;  %v2808_v37 = vmul.f32 1.442695, %v2521_v29  ;;  %v2806_v38 = vmul.f32 1.442695, %v2520_v30  ;;  %v2263_v39 = vmul.f32 %v2003_v31, %v2003_v31  ;;  %v507_v29 = vmul.f32 20.0, %v247_v18 }
  0xc8   : > { %3293 = vst.msk [vmem:[%s4275_s20 + $0x90] sm:$0xff] %vm3274_vm0, %v3651_v36  ;;  %v2262_v40 = vmul.f32 %v2002_v35, %v2002_v35  ;;  %v826_v41 = vpop.permute.xlu1 %825  ;;  %v821_v42 = vpop.permute.xlu0 %820  ;;  %v249_v34 = vld [vmem:[%s4177_s15 + $0x330] sm:$0xff]  ;;  %v256_v18 = vld [vmem:[%s4177_s15 + $0x368] sm:$0xff] }
  0xc9   : > { %3664 = vpow2.f32 %v2808_v37  ;;  %v2523_v45 = vsub.f32 0.0, %v2263_v39  ;;  %v2005_v46 = vsub.f32 %v826_v41, %v4246_v1  ;;  %v2004_v47 = vsub.f32 %v821_v42, %v4246_v1  ;;  %1135 = vperm.xlu1 %3611, %v500_v27   ;;  %1130 = vperm.xlu0 %3610, %v499_v28  }
  0xca   : > { %v3653_v50 = vpop.eup %3652  ;;  %3666 = vpow2.f32 %v2806_v38  ;;  %v2522_v51 = vsub.f32 0.0, %v2262_v40  ;;  %v508_v28 = vmul.f32 20.0, %v248_v17 }
  0xcb   : > { %v3655_v52 = vpop.eup %3654  ;;  %3296 = vst.msk [vmem:[%s4275_s20 + $0xa8] sm:$0xff] %vm3274_vm0, %v3653_v50  ;;  %v2812_v53 = vmul.f32 1.442695, %v2523_v45  ;;  %v2265_v54 = vmul.f32 %v2005_v46, %v2005_v46  ;;  %v2264_v55 = vmul.f32 %v2004_v47, %v2004_v47  ;;  %v509_v45 = vmul.f32 20.0, %v249_v34  ;;  %v251_v50 = vld [vmem:[%s4177_s15 + $0x340] sm:$0xff]  ;;  %v258_v34 = vld [vmem:[%s4177_s15 + $0x378] sm:$0xff] }
  0xcc   : > { %3295 = vst.msk [vmem:[%s4275_s20 + $0xa0] sm:$0xff] %vm3274_vm0, %v3655_v52  ;;  %v2810_v56 = vmul.f32 1.442695, %v2522_v51  ;;  %v836_v57 = vpop.permute.xlu1 %835  ;;  %v831_v58 = vpop.permute.xlu0 %830 }
  0xcd   : > { %3668 = vpow2.f32 %v2812_v53  ;;  %v2525_v61 = vsub.f32 0.0, %v2265_v54  ;;  %v2524_v62 = vsub.f32 0.0, %v2264_v55  ;;  %v2007_v63 = vsub.f32 %v836_v57, %v4246_v1  ;;  %1145 = vperm.xlu1 %3611, %v502_v43   ;;  %1140 = vperm.xlu0 %3610, %v501_v44  }
  0xce   : > { %v3657_v3 = vpop.eup %3656  ;;  %3670 = vpow2.f32 %v2810_v56  ;;  %v2006_v4 = vsub.f32 %v831_v58, %v4246_v1  ;;  %v510_v44 = vmul.f32 20.0, %v250_v33 }
  0xcf   : > { %v3659_v5 = vpop.eup %3658  ;;  %3298 = vst.msk [vmem:[%s4275_s20 + $0xb8] sm:$0xff] %vm3274_vm0, %v3657_v3  ;;  %v2816_v6 = vmul.f32 1.442695, %v2525_v61  ;;  %v2814_v7 = vmul.f32 1.442695, %v2524_v62  ;;  %v2267_v8 = vmul.f32 %v2007_v63, %v2007_v63  ;;  %v511_v61 = vmul.f32 20.0, %v251_v50 }
  0xd0   : > { %3297 = vst.msk [vmem:[%s4275_s20 + $0xb0] sm:$0xff] %vm3274_vm0, %v3659_v5  ;;  %v2266_v9 = vmul.f32 %v2006_v4, %v2006_v4  ;;  %v846_v10 = vpop.permute.xlu1 %845  ;;  %v841_v11 = vpop.permute.xlu0 %840  ;;  %v253_v3 = vld [vmem:[%s4177_s15 + $0x350] sm:$0xff]  ;;  %v260_v50 = vld [vmem:[%s4177_s15 + $0x388] sm:$0xff] }
  0xd1   : > { %3672 = vpow2.f32 %v2816_v6  ;;  %v2527_v14 = vsub.f32 0.0, %v2267_v8  ;;  %v2009_v15 = vsub.f32 %v846_v10, %v4246_v1  ;;  %v2008_v16 = vsub.f32 %v841_v11, %v4246_v1  ;;  %1155 = vperm.xlu1 %3611, %v504_v59   ;;  %1150 = vperm.xlu0 %3610, %v503_v60  }
  0xd2   : > { %v3661_v19 = vpop.eup %3660  ;;  %3674 = vpow2.f32 %v2814_v7  ;;  %v2526_v20 = vsub.f32 0.0, %v2266_v9  ;;  %v512_v60 = vmul.f32 20.0, %v252_v49 }
  0xd3   : > { %v3663_v21 = vpop.eup %3662  ;;  %3300 = vst.msk [vmem:[%s4275_s20 + $0xc8] sm:$0xff] %vm3274_vm0, %v3661_v19  ;;  %v2820_v22 = vmul.f32 1.442695, %v2527_v14  ;;  %v2269_v23 = vmul.f32 %v2009_v15, %v2009_v15  ;;  %v2268_v24 = vmul.f32 %v2008_v16, %v2008_v16  ;;  %v513_v14 = vmul.f32 20.0, %v253_v3  ;;  %v255_v19 = vld [vmem:[%s4177_s15 + $0x360] sm:$0xff]  ;;  %v262_v3 = vld [vmem:[%s4177_s15 + $0x398] sm:$0xff] }
  0xd4   : > { %3299 = vst.msk [vmem:[%s4275_s20 + $0xc0] sm:$0xff] %vm3274_vm0, %v3663_v21  ;;  %v2818_v25 = vmul.f32 1.442695, %v2526_v20  ;;  %v856_v26 = vpop.permute.xlu1 %855  ;;  %v851_v27 = vpop.permute.xlu0 %850 }
  0xd5   : > { %3676 = vpow2.f32 %v2820_v22  ;;  %v2529_v30 = vsub.f32 0.0, %v2269_v23  ;;  %v2528_v31 = vsub.f32 0.0, %v2268_v24  ;;  %v2011_v32 = vsub.f32 %v856_v26, %v4246_v1  ;;  %1165 = vperm.xlu1 %3611, %v506_v12   ;;  %1160 = vperm.xlu0 %3610, %v505_v13  }
  0xd6   : > { %v3665_v35 = vpop.eup %3664  ;;  %3678 = vpow2.f32 %v2818_v25  ;;  %v2010_v36 = vsub.f32 %v851_v27, %v4246_v1  ;;  %v514_v13 = vmul.f32 20.0, %v254_v2 }
  0xd7   : > { %v3667_v37 = vpop.eup %3666  ;;  %3302 = vst.msk [vmem:[%s4275_s20 + $0xd8] sm:$0xff] %vm3274_vm0, %v3665_v35  ;;  %v2824_v38 = vmul.f32 1.442695, %v2529_v30  ;;  %v2822_v39 = vmul.f32 1.442695, %v2528_v31  ;;  %v2271_v40 = vmul.f32 %v2011_v32, %v2011_v32  ;;  %v515_v30 = vmul.f32 20.0, %v255_v19 }
  0xd8   : > { %3301 = vst.msk [vmem:[%s4275_s20 + $0xd0] sm:$0xff] %vm3274_vm0, %v3667_v37  ;;  %v2270_v41 = vmul.f32 %v2010_v36, %v2010_v36  ;;  %v866_v42 = vpop.permute.xlu1 %865  ;;  %v861_v43 = vpop.permute.xlu0 %860  ;;  %v257_v35 = vld [vmem:[%s4177_s15 + $0x370] sm:$0xff]  ;;  %v264_v19 = vld [vmem:[%s4177_s15 + $0x3a8] sm:$0xff] }
  0xd9   : > { %3680 = vpow2.f32 %v2824_v38  ;;  %v2531_v46 = vsub.f32 0.0, %v2271_v40  ;;  %v2013_v47 = vsub.f32 %v866_v42, %v4246_v1  ;;  %v2012_v48 = vsub.f32 %v861_v43, %v4246_v1  ;;  %1175 = vperm.xlu1 %3611, %v508_v28   ;;  %1170 = vperm.xlu0 %3610, %v507_v29  }
  0xda   : > { %v3669_v51 = vpop.eup %3668  ;;  %3682 = vpow2.f32 %v2822_v39  ;;  %v2530_v52 = vsub.f32 0.0, %v2270_v41  ;;  %v516_v29 = vmul.f32 20.0, %v256_v18 }
  0xdb   : > { %v3671_v53 = vpop.eup %3670  ;;  %3304 = vst.msk [vmem:[%s4275_s20 + $0xe8] sm:$0xff] %vm3274_vm0, %v3669_v51  ;;  %v2828_v54 = vmul.f32 1.442695, %v2531_v46  ;;  %v2273_v55 = vmul.f32 %v2013_v47, %v2013_v47  ;;  %v2272_v56 = vmul.f32 %v2012_v48, %v2012_v48  ;;  %v517_v46 = vmul.f32 20.0, %v257_v35  ;;  %v259_v51 = vld [vmem:[%s4177_s15 + $0x380] sm:$0xff]  ;;  %v266_v35 = vld [vmem:[%s4177_s15 + $0x3b8] sm:$0xff] }
  0xdc   : > { %3303 = vst.msk [vmem:[%s4275_s20 + $0xe0] sm:$0xff] %vm3274_vm0, %v3671_v53  ;;  %v2826_v57 = vmul.f32 1.442695, %v2530_v52  ;;  %v876_v58 = vpop.permute.xlu1 %875  ;;  %v871_v59 = vpop.permute.xlu0 %870 }
  0xdd   : > { %3684 = vpow2.f32 %v2828_v54  ;;  %v2533_v62 = vsub.f32 0.0, %v2273_v55  ;;  %v2532_v63 = vsub.f32 0.0, %v2272_v56  ;;  %v2015_v0 = vsub.f32 %v876_v58, %v4246_v1  ;;  %1185 = vperm.xlu1 %3611, %v510_v44   ;;  %1180 = vperm.xlu0 %3610, %v509_v45  }
  0xde   : > { %v3673_v4 = vpop.eup %3672  ;;  %3686 = vpow2.f32 %v2826_v57  ;;  %v2014_v5 = vsub.f32 %v871_v59, %v4246_v1  ;;  %v518_v45 = vmul.f32 20.0, %v258_v34 }
  0xdf   : > { %v3675_v6 = vpop.eup %3674  ;;  %3306 = vst.msk [vmem:[%s4275_s20 + $0xf8] sm:$0xff] %vm3274_vm0, %v3673_v4  ;;  %v2832_v7 = vmul.f32 1.442695, %v2533_v62  ;;  %v2830_v8 = vmul.f32 1.442695, %v2532_v63  ;;  %v2275_v9 = vmul.f32 %v2015_v0, %v2015_v0  ;;  %v261_v4 = vld [vmem:[%s4177_s15 + $0x390] sm:$0xff] }
  0xe0   : > { %3305 = vst.msk [vmem:[%s4275_s20 + $0xf0] sm:$0xff] %vm3274_vm0, %v3675_v6  ;;  %v2274_v10 = vmul.f32 %v2014_v5, %v2014_v5  ;;  %v886_v11 = vpop.permute.xlu1 %885  ;;  %v881_v12 = vpop.permute.xlu0 %880  ;;  %v4432_v0 = vld [vmem:[%s5254_s1] ss:$0 sm:$0xff] }
  0xe1   : > { %3688 = vpow2.f32 %v2832_v7  ;;  %v2535_v15 = vsub.f32 0.0, %v2275_v9  ;;  %v2017_v16 = vsub.f32 %v886_v11, %v4246_v1  ;;  %v2016_v17 = vsub.f32 %v881_v12, %v4246_v1  ;;  %1195 = vperm.xlu1 %3611, %v512_v60   ;;  %1190 = vperm.xlu0 %3610, %v511_v61  }
  0xe2   : > { %v3677_v20 = vpop.eup %3676  ;;  %3690 = vpow2.f32 %v2830_v8  ;;  %v2534_v21 = vsub.f32 0.0, %v2274_v10  ;;  %v520_v60 = vmul.f32 20.0, %v260_v50  ;;  %v519_v61 = vmul.f32 20.0, %v259_v51  ;;  %v268_v51 = vld [vmem:[%s4177_s15 + $0x3c8] sm:$0xff] }
  0xe3   : > { %v3679_v22 = vpop.eup %3678  ;;  %3308 = vst.msk [vmem:[%s4275_s20 + $0x108] sm:$0xff] %vm3274_vm0, %v3677_v20  ;;  %v2836_v23 = vmul.f32 1.442695, %v2535_v15  ;;  %v2277_v24 = vmul.f32 %v2017_v16, %v2017_v16  ;;  %v2276_v25 = vmul.f32 %v2016_v17, %v2016_v17  ;;  %v521_v15 = vmul.f32 20.0, %v261_v4  ;;  %v263_v20 = vld [vmem:[%s4177_s15 + $0x3a0] sm:$0xff]  ;;  %v270_v4 = vld [vmem:[%s4177_s15 + $0x3d8] sm:$0xff] }
  0xe4   : > { %3307 = vst.msk [vmem:[%s4275_s20 + $0x100] sm:$0xff] %vm3274_vm0, %v3679_v22  ;;  %v2834_v26 = vmul.f32 1.442695, %v2534_v21  ;;  %v896_v27 = vpop.permute.xlu1 %895  ;;  %v891_v28 = vpop.permute.xlu0 %890 }
  0xe5   : > { %3692 = vpow2.f32 %v2836_v23  ;;  %v2537_v31 = vsub.f32 0.0, %v2277_v24  ;;  %v2536_v32 = vsub.f32 0.0, %v2276_v25  ;;  %v2019_v33 = vsub.f32 %v896_v27, %v4246_v1  ;;  %1205 = vperm.xlu1 %3611, %v514_v13   ;;  %1200 = vperm.xlu0 %3610, %v513_v14  }
  0xe6   : > { %v3681_v36 = vpop.eup %3680  ;;  %3694 = vpow2.f32 %v2834_v26  ;;  %v2018_v37 = vsub.f32 %v891_v28, %v4246_v1  ;;  %v522_v14 = vmul.f32 20.0, %v262_v3 }
  0xe7   : > { %v3683_v38 = vpop.eup %3682  ;;  %3310 = vst.msk [vmem:[%s4275_s20 + $0x118] sm:$0xff] %vm3274_vm0, %v3681_v36  ;;  %v2840_v39 = vmul.f32 1.442695, %v2537_v31  ;;  %v2838_v40 = vmul.f32 1.442695, %v2536_v32  ;;  %v2279_v41 = vmul.f32 %v2019_v33, %v2019_v33  ;;  %v523_v31 = vmul.f32 20.0, %v263_v20 }
  0xe8   : > { %3309 = vst.msk [vmem:[%s4275_s20 + $0x110] sm:$0xff] %vm3274_vm0, %v3683_v38  ;;  %v2278_v42 = vmul.f32 %v2018_v37, %v2018_v37  ;;  %v906_v43 = vpop.permute.xlu1 %905  ;;  %v901_v44 = vpop.permute.xlu0 %900  ;;  %v265_v36 = vld [vmem:[%s4177_s15 + $0x3b0] sm:$0xff]  ;;  %v272_v20 = vld [vmem:[%s4177_s15 + $0x3e8] sm:$0xff] }
  0xe9   : > { %3696 = vpow2.f32 %v2840_v39  ;;  %v2539_v47 = vsub.f32 0.0, %v2279_v41  ;;  %v2021_v48 = vsub.f32 %v906_v43, %v4246_v1  ;;  %v2020_v49 = vsub.f32 %v901_v44, %v4246_v1  ;;  %1215 = vperm.xlu1 %3611, %v516_v29   ;;  %1210 = vperm.xlu0 %3610, %v515_v30  }
  0xea   : > { %v3685_v52 = vpop.eup %3684  ;;  %3698 = vpow2.f32 %v2838_v40  ;;  %v2538_v53 = vsub.f32 0.0, %v2278_v42  ;;  %v524_v30 = vmul.f32 20.0, %v264_v19 }
  0xeb   : > { %v3687_v54 = vpop.eup %3686  ;;  %3312 = vst.msk [vmem:[%s4275_s20 + $0x128] sm:$0xff] %vm3274_vm0, %v3685_v52  ;;  %v2844_v55 = vmul.f32 1.442695, %v2539_v47  ;;  %v2281_v56 = vmul.f32 %v2021_v48, %v2021_v48  ;;  %v2280_v57 = vmul.f32 %v2020_v49, %v2020_v49  ;;  %v525_v47 = vmul.f32 20.0, %v265_v36  ;;  %v267_v52 = vld [vmem:[%s4177_s15 + $0x3c0] sm:$0xff]  ;;  %v274_v36 = vld [vmem:[%s4177_s15 + $0x3f8] sm:$0xff] }
  0xec   : > { %3311 = vst.msk [vmem:[%s4275_s20 + $0x120] sm:$0xff] %vm3274_vm0, %v3687_v54  ;;  %v2842_v58 = vmul.f32 1.442695, %v2538_v53  ;;  %v916_v59 = vpop.permute.xlu1 %915  ;;  %v911_v1 = vpop.permute.xlu0 %910 }
  0xed   : > { %3700 = vpow2.f32 %v2844_v55  ;;  %v2541_v62 = vsub.f32 0.0, %v2281_v56  ;;  %v2540_v63 = vsub.f32 0.0, %v2280_v57  ;;  %v2023_v2 = vsub.f32 %v916_v59, %v4432_v0  ;;  %1225 = vperm.xlu1 %3611, %v518_v45   ;;  %1220 = vperm.xlu0 %3610, %v517_v46  }
  0xee   : > { %v3689_v5 = vpop.eup %3688  ;;  %3702 = vpow2.f32 %v2842_v58  ;;  %v2022_v6 = vsub.f32 %v911_v1, %v4432_v0  ;;  %v526_v46 = vmul.f32 20.0, %v266_v35 }
  0xef   : > { %v3691_v7 = vpop.eup %3690  ;;  %3314 = vst.msk [vmem:[%s4275_s20 + $0x138] sm:$0xff] %vm3274_vm0, %v3689_v5  ;;  %v2848_v8 = vmul.f32 1.442695, %v2541_v62  ;;  %v2846_v9 = vmul.f32 1.442695, %v2540_v63  ;;  %v2283_v10 = vmul.f32 %v2023_v2, %v2023_v2  ;;  %v527_v62 = vmul.f32 20.0, %v267_v52 }
  0xf0   : > { %3313 = vst.msk [vmem:[%s4275_s20 + $0x130] sm:$0xff] %vm3274_vm0, %v3691_v7  ;;  %v2282_v11 = vmul.f32 %v2022_v6, %v2022_v6  ;;  %v926_v12 = vpop.permute.xlu1 %925  ;;  %v921_v13 = vpop.permute.xlu0 %920  ;;  %v269_v5 = vld [vmem:[%s4177_s15 + $0x3d0] sm:$0xff]  ;;  %v276_v52 = vld [vmem:[%s4177_s15 + $0x408] sm:$0xff] }
  0xf1   : > { %3704 = vpow2.f32 %v2848_v8  ;;  %v2543_v16 = vsub.f32 0.0, %v2283_v10  ;;  %v2025_v17 = vsub.f32 %v926_v12, %v4432_v0  ;;  %v2024_v18 = vsub.f32 %v921_v13, %v4432_v0  ;;  %1235 = vperm.xlu1 %3611, %v520_v60   ;;  %1230 = vperm.xlu0 %3610, %v519_v61  }
  0xf2   : > { %v3693_v21 = vpop.eup %3692  ;;  %3706 = vpow2.f32 %v2846_v9  ;;  %v2542_v22 = vsub.f32 0.0, %v2282_v11  ;;  %v528_v61 = vmul.f32 20.0, %v268_v51 }
  0xf3   : > { %v3695_v23 = vpop.eup %3694  ;;  %3316 = vst.msk [vmem:[%s4275_s20 + $0x148] sm:$0xff] %vm3274_vm0, %v3693_v21  ;;  %v2852_v24 = vmul.f32 1.442695, %v2543_v16  ;;  %v2285_v25 = vmul.f32 %v2025_v17, %v2025_v17  ;;  %v2284_v26 = vmul.f32 %v2024_v18, %v2024_v18  ;;  %v529_v16 = vmul.f32 20.0, %v269_v5  ;;  %v271_v21 = vld [vmem:[%s4177_s15 + $0x3e0] sm:$0xff]  ;;  %v278_v5 = vld [vmem:[%s4177_s15 + $0x418] sm:$0xff] }
  0xf4   : > { %3315 = vst.msk [vmem:[%s4275_s20 + $0x140] sm:$0xff] %vm3274_vm0, %v3695_v23  ;;  %v2850_v27 = vmul.f32 1.442695, %v2542_v22  ;;  %v936_v28 = vpop.permute.xlu1 %935  ;;  %v931_v29 = vpop.permute.xlu0 %930 }
  0xf5   : > { %3708 = vpow2.f32 %v2852_v24  ;;  %v2545_v32 = vsub.f32 0.0, %v2285_v25  ;;  %v2544_v33 = vsub.f32 0.0, %v2284_v26  ;;  %v2027_v34 = vsub.f32 %v936_v28, %v4432_v0  ;;  %1245 = vperm.xlu1 %3611, %v522_v14   ;;  %1240 = vperm.xlu0 %3610, %v521_v15  }
  0xf6   : > { %v3697_v37 = vpop.eup %3696  ;;  %3710 = vpow2.f32 %v2850_v27  ;;  %v2026_v38 = vsub.f32 %v931_v29, %v4432_v0  ;;  %v530_v15 = vmul.f32 20.0, %v270_v4 }
  0xf7   : > { %v3699_v39 = vpop.eup %3698  ;;  %3318 = vst.msk [vmem:[%s4275_s20 + $0x158] sm:$0xff] %vm3274_vm0, %v3697_v37  ;;  %v2856_v40 = vmul.f32 1.442695, %v2545_v32  ;;  %v2854_v41 = vmul.f32 1.442695, %v2544_v33  ;;  %v2287_v42 = vmul.f32 %v2027_v34, %v2027_v34  ;;  %v531_v32 = vmul.f32 20.0, %v271_v21 }
  0xf8   : > { %3317 = vst.msk [vmem:[%s4275_s20 + $0x150] sm:$0xff] %vm3274_vm0, %v3699_v39  ;;  %v2286_v43 = vmul.f32 %v2026_v38, %v2026_v38  ;;  %v946_v44 = vpop.permute.xlu1 %945  ;;  %v941_v45 = vpop.permute.xlu0 %940  ;;  %v273_v37 = vld [vmem:[%s4177_s15 + $0x3f0] sm:$0xff]  ;;  %v280_v21 = vld [vmem:[%s4177_s15 + $0x428] sm:$0xff] }
  0xf9   : > { %3712 = vpow2.f32 %v2856_v40  ;;  %v2547_v48 = vsub.f32 0.0, %v2287_v42  ;;  %v2029_v49 = vsub.f32 %v946_v44, %v4432_v0  ;;  %v2028_v50 = vsub.f32 %v941_v45, %v4432_v0  ;;  %1255 = vperm.xlu1 %3611, %v524_v30   ;;  %1250 = vperm.xlu0 %3610, %v523_v31  }
  0xfa   : > { %v3701_v53 = vpop.eup %3700  ;;  %3714 = vpow2.f32 %v2854_v41  ;;  %v2546_v54 = vsub.f32 0.0, %v2286_v43  ;;  %v532_v31 = vmul.f32 20.0, %v272_v20 }
  0xfb   : > { %v3703_v55 = vpop.eup %3702  ;;  %3320 = vst.msk [vmem:[%s4275_s20 + $0x168] sm:$0xff] %vm3274_vm0, %v3701_v53  ;;  %v2860_v56 = vmul.f32 1.442695, %v2547_v48  ;;  %v2289_v57 = vmul.f32 %v2029_v49, %v2029_v49  ;;  %v2288_v58 = vmul.f32 %v2028_v50, %v2028_v50  ;;  %v533_v48 = vmul.f32 20.0, %v273_v37  ;;  %v275_v53 = vld [vmem:[%s4177_s15 + $0x400] sm:$0xff]  ;;  %v282_v37 = vld [vmem:[%s4177_s15 + $0x438] sm:$0xff] }
  0xfc   : > { %3319 = vst.msk [vmem:[%s4275_s20 + $0x160] sm:$0xff] %vm3274_vm0, %v3703_v55  ;;  %v2858_v59 = vmul.f32 1.442695, %v2546_v54  ;;  %v956_v1 = vpop.permute.xlu1 %955  ;;  %v951_v60 = vpop.permute.xlu0 %950 }
  0xfd   : > { %3716 = vpow2.f32 %v2860_v56  ;;  %v2549_v63 = vsub.f32 0.0, %v2289_v57  ;;  %v2548_v2 = vsub.f32 0.0, %v2288_v58  ;;  %v2031_v3 = vsub.f32 %v956_v1, %v4432_v0  ;;  %1265 = vperm.xlu1 %3611, %v526_v46   ;;  %1260 = vperm.xlu0 %3610, %v525_v47  }
  0xfe   : > { %v3705_v6 = vpop.eup %3704  ;;  %3718 = vpow2.f32 %v2858_v59  ;;  %v2030_v7 = vsub.f32 %v951_v60, %v4432_v0  ;;  %v534_v47 = vmul.f32 20.0, %v274_v36 }
  0xff   : > { %v3707_v8 = vpop.eup %3706  ;;  %3322 = vst.msk [vmem:[%s4275_s20 + $0x178] sm:$0xff] %vm3274_vm0, %v3705_v6  ;;  %v2864_v9 = vmul.f32 1.442695, %v2549_v63  ;;  %v2862_v10 = vmul.f32 1.442695, %v2548_v2  ;;  %v2291_v11 = vmul.f32 %v2031_v3, %v2031_v3  ;;  %v535_v63 = vmul.f32 20.0, %v275_v53 }
 0x100   : > { %3321 = vst.msk [vmem:[%s4275_s20 + $0x170] sm:$0xff] %vm3274_vm0, %v3707_v8  ;;  %v2290_v12 = vmul.f32 %v2030_v7, %v2030_v7  ;;  %v966_v13 = vpop.permute.xlu1 %965  ;;  %v961_v14 = vpop.permute.xlu0 %960  ;;  %v277_v6 = vld [vmem:[%s4177_s15 + $0x410] sm:$0xff]  ;;  %v284_v53 = vld [vmem:[%s4177_s15 + $0x448] sm:$0xff] }
 0x101   : > { %3720 = vpow2.f32 %v2864_v9  ;;  %v2551_v17 = vsub.f32 0.0, %v2291_v11  ;;  %v2033_v18 = vsub.f32 %v966_v13, %v4432_v0  ;;  %v2032_v19 = vsub.f32 %v961_v14, %v4432_v0  ;;  %1275 = vperm.xlu1 %3611, %v528_v61   ;;  %1270 = vperm.xlu0 %3610, %v527_v62  }
 0x102   : > { %v3709_v22 = vpop.eup %3708  ;;  %3722 = vpow2.f32 %v2862_v10  ;;  %v2550_v23 = vsub.f32 0.0, %v2290_v12  ;;  %v536_v62 = vmul.f32 20.0, %v276_v52 }
 0x103   : > { %v3711_v24 = vpop.eup %3710  ;;  %3324 = vst.msk [vmem:[%s4275_s20 + $0x188] sm:$0xff] %vm3274_vm0, %v3709_v22  ;;  %v2868_v25 = vmul.f32 1.442695, %v2551_v17  ;;  %v2293_v26 = vmul.f32 %v2033_v18, %v2033_v18  ;;  %v2292_v27 = vmul.f32 %v2032_v19, %v2032_v19  ;;  %v537_v17 = vmul.f32 20.0, %v277_v6  ;;  %v279_v22 = vld [vmem:[%s4177_s15 + $0x420] sm:$0xff]  ;;  %v286_v6 = vld [vmem:[%s4177_s15 + $0x458] sm:$0xff] }
 0x104   : > { %3323 = vst.msk [vmem:[%s4275_s20 + $0x180] sm:$0xff] %vm3274_vm0, %v3711_v24  ;;  %v2866_v28 = vmul.f32 1.442695, %v2550_v23  ;;  %v976_v29 = vpop.permute.xlu1 %975  ;;  %v971_v30 = vpop.permute.xlu0 %970 }
 0x105   : > { %3724 = vpow2.f32 %v2868_v25  ;;  %v2553_v33 = vsub.f32 0.0, %v2293_v26  ;;  %v2552_v34 = vsub.f32 0.0, %v2292_v27  ;;  %v2035_v35 = vsub.f32 %v976_v29, %v4432_v0  ;;  %1285 = vperm.xlu1 %3611, %v530_v15   ;;  %1280 = vperm.xlu0 %3610, %v529_v16  }
 0x106   : > { %v3713_v38 = vpop.eup %3712  ;;  %3726 = vpow2.f32 %v2866_v28  ;;  %v2034_v39 = vsub.f32 %v971_v30, %v4432_v0  ;;  %v538_v16 = vmul.f32 20.0, %v278_v5 }
 0x107   : > { %v3715_v40 = vpop.eup %3714  ;;  %3326 = vst.msk [vmem:[%s4275_s20 + $0x198] sm:$0xff] %vm3274_vm0, %v3713_v38  ;;  %v2872_v41 = vmul.f32 1.442695, %v2553_v33  ;;  %v2870_v42 = vmul.f32 1.442695, %v2552_v34  ;;  %v2295_v43 = vmul.f32 %v2035_v35, %v2035_v35  ;;  %v539_v33 = vmul.f32 20.0, %v279_v22 }
 0x108   : > { %3325 = vst.msk [vmem:[%s4275_s20 + $0x190] sm:$0xff] %vm3274_vm0, %v3715_v40  ;;  %v2294_v44 = vmul.f32 %v2034_v39, %v2034_v39  ;;  %v986_v45 = vpop.permute.xlu1 %985  ;;  %v981_v46 = vpop.permute.xlu0 %980  ;;  %v281_v38 = vld [vmem:[%s4177_s15 + $0x430] sm:$0xff]  ;;  %v288_v22 = vld [vmem:[%s4177_s15 + $0x468] sm:$0xff] }
 0x109   : > { %3728 = vpow2.f32 %v2872_v41  ;;  %v2555_v49 = vsub.f32 0.0, %v2295_v43  ;;  %v2037_v50 = vsub.f32 %v986_v45, %v4432_v0  ;;  %v2036_v51 = vsub.f32 %v981_v46, %v4432_v0  ;;  %1295 = vperm.xlu1 %3611, %v532_v31   ;;  %1290 = vperm.xlu0 %3610, %v531_v32  }
 0x10a   : > { %v3717_v54 = vpop.eup %3716  ;;  %3730 = vpow2.f32 %v2870_v42  ;;  %v2554_v55 = vsub.f32 0.0, %v2294_v44  ;;  %v540_v32 = vmul.f32 20.0, %v280_v21 }
 0x10b   : > { %v3719_v56 = vpop.eup %3718  ;;  %3328 = vst.msk [vmem:[%s4275_s20 + $0x1a8] sm:$0xff] %vm3274_vm0, %v3717_v54  ;;  %v2876_v57 = vmul.f32 1.442695, %v2555_v49  ;;  %v2297_v58 = vmul.f32 %v2037_v50, %v2037_v50  ;;  %v2296_v59 = vmul.f32 %v2036_v51, %v2036_v51  ;;  %v541_v49 = vmul.f32 20.0, %v281_v38  ;;  %v283_v54 = vld [vmem:[%s4177_s15 + $0x440] sm:$0xff]  ;;  %v290_v38 = vld [vmem:[%s4177_s15 + $0x478] sm:$0xff] }
 0x10c   : > { %3327 = vst.msk [vmem:[%s4275_s20 + $0x1a0] sm:$0xff] %vm3274_vm0, %v3719_v56  ;;  %v2874_v1 = vmul.f32 1.442695, %v2554_v55  ;;  %v996_v60 = vpop.permute.xlu1 %995  ;;  %v991_v61 = vpop.permute.xlu0 %990 }
 0x10d   : > { %3732 = vpow2.f32 %v2876_v57  ;;  %v2557_v2 = vsub.f32 0.0, %v2297_v58  ;;  %v2556_v3 = vsub.f32 0.0, %v2296_v59  ;;  %v2039_v4 = vsub.f32 %v996_v60, %v4432_v0  ;;  %1305 = vperm.xlu1 %3611, %v534_v47   ;;  %1300 = vperm.xlu0 %3610, %v533_v48  }
 0x10e   : > { %v3721_v7 = vpop.eup %3720  ;;  %3734 = vpow2.f32 %v2874_v1  ;;  %v2038_v8 = vsub.f32 %v991_v61, %v4432_v0  ;;  %v542_v48 = vmul.f32 20.0, %v282_v37 }
 0x10f   : > { %v3723_v9 = vpop.eup %3722  ;;  %3330 = vst.msk [vmem:[%s4275_s20 + $0x1b8] sm:$0xff] %vm3274_vm0, %v3721_v7  ;;  %v2880_v10 = vmul.f32 1.442695, %v2557_v2  ;;  %v2878_v11 = vmul.f32 1.442695, %v2556_v3  ;;  %v2299_v12 = vmul.f32 %v2039_v4, %v2039_v4  ;;  %v543_v2 = vmul.f32 20.0, %v283_v54 }
 0x110   : > { %3329 = vst.msk [vmem:[%s4275_s20 + $0x1b0] sm:$0xff] %vm3274_vm0, %v3723_v9  ;;  %v2298_v13 = vmul.f32 %v2038_v8, %v2038_v8  ;;  %v1006_v14 = vpop.permute.xlu1 %1005  ;;  %v1001_v15 = vpop.permute.xlu0 %1000  ;;  %v285_v7 = vld [vmem:[%s4177_s15 + $0x450] sm:$0xff]  ;;  %v292_v54 = vld [vmem:[%s4177_s15 + $0x488] sm:$0xff] }
 0x111   : > { %3736 = vpow2.f32 %v2880_v10  ;;  %v2559_v18 = vsub.f32 0.0, %v2299_v12  ;;  %v2041_v19 = vsub.f32 %v1006_v14, %v4432_v0  ;;  %v2040_v20 = vsub.f32 %v1001_v15, %v4432_v0  ;;  %1315 = vperm.xlu1 %3611, %v536_v62   ;;  %1310 = vperm.xlu0 %3610, %v535_v63  }
 0x112   : > { %v3725_v23 = vpop.eup %3724  ;;  %3738 = vpow2.f32 %v2878_v11  ;;  %v2558_v24 = vsub.f32 0.0, %v2298_v13  ;;  %v544_v63 = vmul.f32 20.0, %v284_v53 }
 0x113   : > { %v3727_v25 = vpop.eup %3726  ;;  %3332 = vst.msk [vmem:[%s4275_s20 + $0x1c8] sm:$0xff] %vm3274_vm0, %v3725_v23  ;;  %v2884_v26 = vmul.f32 1.442695, %v2559_v18  ;;  %v2301_v27 = vmul.f32 %v2041_v19, %v2041_v19  ;;  %v2300_v28 = vmul.f32 %v2040_v20, %v2040_v20  ;;  %v545_v18 = vmul.f32 20.0, %v285_v7  ;;  %v287_v23 = vld [vmem:[%s4177_s15 + $0x460] sm:$0xff]  ;;  %v294_v7 = vld [vmem:[%s4177_s15 + $0x498] sm:$0xff] }
 0x114   : > { %3331 = vst.msk [vmem:[%s4275_s20 + $0x1c0] sm:$0xff] %vm3274_vm0, %v3727_v25  ;;  %v2882_v29 = vmul.f32 1.442695, %v2558_v24  ;;  %v1016_v30 = vpop.permute.xlu1 %1015  ;;  %v1011_v31 = vpop.permute.xlu0 %1010 }
 0x115   : > { %3740 = vpow2.f32 %v2884_v26  ;;  %v2561_v34 = vsub.f32 0.0, %v2301_v27  ;;  %v2560_v35 = vsub.f32 0.0, %v2300_v28  ;;  %v2043_v36 = vsub.f32 %v1016_v30, %v4432_v0  ;;  %1325 = vperm.xlu1 %3611, %v538_v16   ;;  %1320 = vperm.xlu0 %3610, %v537_v17  }
 0x116   : > { %v3729_v39 = vpop.eup %3728  ;;  %3742 = vpow2.f32 %v2882_v29  ;;  %v2042_v40 = vsub.f32 %v1011_v31, %v4432_v0  ;;  %v546_v17 = vmul.f32 20.0, %v286_v6 }
 0x117   : > { %v3731_v41 = vpop.eup %3730  ;;  %3334 = vst.msk [vmem:[%s4275_s20 + $0x1d8] sm:$0xff] %vm3274_vm0, %v3729_v39  ;;  %v2888_v42 = vmul.f32 1.442695, %v2561_v34  ;;  %v2886_v43 = vmul.f32 1.442695, %v2560_v35  ;;  %v2303_v44 = vmul.f32 %v2043_v36, %v2043_v36  ;;  %v547_v34 = vmul.f32 20.0, %v287_v23 }
 0x118   : > { %3333 = vst.msk [vmem:[%s4275_s20 + $0x1d0] sm:$0xff] %vm3274_vm0, %v3731_v41  ;;  %v2302_v45 = vmul.f32 %v2042_v40, %v2042_v40  ;;  %v1026_v46 = vpop.permute.xlu1 %1025  ;;  %v1021_v47 = vpop.permute.xlu0 %1020  ;;  %v289_v39 = vld [vmem:[%s4177_s15 + $0x470] sm:$0xff]  ;;  %v296_v23 = vld [vmem:[%s4177_s15 + $0x4a8] sm:$0xff] }
 0x119   : > { %3744 = vpow2.f32 %v2888_v42  ;;  %v2563_v50 = vsub.f32 0.0, %v2303_v44  ;;  %v2045_v51 = vsub.f32 %v1026_v46, %v4432_v0  ;;  %v2044_v52 = vsub.f32 %v1021_v47, %v4432_v0  ;;  %1335 = vperm.xlu1 %3611, %v540_v32   ;;  %1330 = vperm.xlu0 %3610, %v539_v33  }
 0x11a   : > { %v3733_v55 = vpop.eup %3732  ;;  %3746 = vpow2.f32 %v2886_v43  ;;  %v2562_v56 = vsub.f32 0.0, %v2302_v45  ;;  %v548_v33 = vmul.f32 20.0, %v288_v22 }
 0x11b   : > { %v3735_v57 = vpop.eup %3734  ;;  %3336 = vst.msk [vmem:[%s4275_s20 + $0x1e8] sm:$0xff] %vm3274_vm0, %v3733_v55  ;;  %v2892_v58 = vmul.f32 1.442695, %v2563_v50  ;;  %v2305_v59 = vmul.f32 %v2045_v51, %v2045_v51  ;;  %v2304_v1 = vmul.f32 %v2044_v52, %v2044_v52  ;;  %v549_v50 = vmul.f32 20.0, %v289_v39  ;;  %v291_v55 = vld [vmem:[%s4177_s15 + $0x480] sm:$0xff]  ;;  %v298_v39 = vld [vmem:[%s4177_s15 + $0x4b8] sm:$0xff] }
 0x11c   : > { %3335 = vst.msk [vmem:[%s4275_s20 + $0x1e0] sm:$0xff] %vm3274_vm0, %v3735_v57  ;;  %v2890_v60 = vmul.f32 1.442695, %v2562_v56  ;;  %v1036_v61 = vpop.permute.xlu1 %1035  ;;  %v1031_v62 = vpop.permute.xlu0 %1030 }
 0x11d   : > { %3748 = vpow2.f32 %v2892_v58  ;;  %v2565_v3 = vsub.f32 0.0, %v2305_v59  ;;  %v2564_v4 = vsub.f32 0.0, %v2304_v1  ;;  %v2047_v5 = vsub.f32 %v1036_v61, %v4432_v0  ;;  %1345 = vperm.xlu1 %3611, %v542_v48   ;;  %1340 = vperm.xlu0 %3610, %v541_v49  }
 0x11e   : > { %v3737_v8 = vpop.eup %3736  ;;  %3750 = vpow2.f32 %v2890_v60  ;;  %v2046_v9 = vsub.f32 %v1031_v62, %v4432_v0  ;;  %v550_v49 = vmul.f32 20.0, %v290_v38 }
 0x11f   : > { %v3739_v10 = vpop.eup %3738  ;;  %3338 = vst.msk [vmem:[%s4275_s20 + $0x1f8] sm:$0xff] %vm3274_vm0, %v3737_v8  ;;  %v2896_v11 = vmul.f32 1.442695, %v2565_v3  ;;  %v2894_v12 = vmul.f32 1.442695, %v2564_v4  ;;  %v2307_v13 = vmul.f32 %v2047_v5, %v2047_v5  ;;  %v551_v3 = vmul.f32 20.0, %v291_v55 }
 0x120   : > { %3337 = vst.msk [vmem:[%s4275_s20 + $0x1f0] sm:$0xff] %vm3274_vm0, %v3739_v10  ;;  %v2306_v14 = vmul.f32 %v2046_v9, %v2046_v9  ;;  %v1046_v15 = vpop.permute.xlu1 %1045  ;;  %v1041_v16 = vpop.permute.xlu0 %1040  ;;  %v293_v8 = vld [vmem:[%s4177_s15 + $0x490] sm:$0xff]  ;;  %v300_v55 = vld [vmem:[%s4177_s15 + $0x4c8] sm:$0xff] }
 0x121   : > { %3752 = vpow2.f32 %v2896_v11  ;;  %v2567_v19 = vsub.f32 0.0, %v2307_v13  ;;  %v2049_v20 = vsub.f32 %v1046_v15, %v4432_v0  ;;  %v2048_v21 = vsub.f32 %v1041_v16, %v4432_v0  ;;  %1355 = vperm.xlu1 %3611, %v544_v63   ;;  %1350 = vperm.xlu0 %3610, %v543_v2  }
 0x122   : > { %v3741_v24 = vpop.eup %3740  ;;  %3754 = vpow2.f32 %v2894_v12  ;;  %v2566_v25 = vsub.f32 0.0, %v2306_v14  ;;  %v552_v2 = vmul.f32 20.0, %v292_v54 }
 0x123   : > { %v3743_v26 = vpop.eup %3742  ;;  %3340 = vst.msk [vmem:[%s4275_s20 + $0x208] sm:$0xff] %vm3274_vm0, %v3741_v24  ;;  %v2900_v27 = vmul.f32 1.442695, %v2567_v19  ;;  %v2309_v28 = vmul.f32 %v2049_v20, %v2049_v20  ;;  %v2308_v29 = vmul.f32 %v2048_v21, %v2048_v21  ;;  %v553_v19 = vmul.f32 20.0, %v293_v8  ;;  %v295_v24 = vld [vmem:[%s4177_s15 + $0x4a0] sm:$0xff]  ;;  %v302_v8 = vld [vmem:[%s4177_s15 + $0x4d8] sm:$0xff] }
 0x124   : > { %3339 = vst.msk [vmem:[%s4275_s20 + $0x200] sm:$0xff] %vm3274_vm0, %v3743_v26  ;;  %v2898_v30 = vmul.f32 1.442695, %v2566_v25  ;;  %v1056_v31 = vpop.permute.xlu1 %1055  ;;  %v1051_v32 = vpop.permute.xlu0 %1050 }
 0x125   : > { %3756 = vpow2.f32 %v2900_v27  ;;  %v2569_v35 = vsub.f32 0.0, %v2309_v28  ;;  %v2568_v36 = vsub.f32 0.0, %v2308_v29  ;;  %v2051_v37 = vsub.f32 %v1056_v31, %v4432_v0  ;;  %1365 = vperm.xlu1 %3611, %v546_v17   ;;  %1360 = vperm.xlu0 %3610, %v545_v18  }
 0x126   : > { %v3745_v40 = vpop.eup %3744  ;;  %3758 = vpow2.f32 %v2898_v30  ;;  %v2050_v41 = vsub.f32 %v1051_v32, %v4432_v0  ;;  %v554_v18 = vmul.f32 20.0, %v294_v7 }
 0x127   : > { %v3747_v42 = vpop.eup %3746  ;;  %3342 = vst.msk [vmem:[%s4275_s20 + $0x218] sm:$0xff] %vm3274_vm0, %v3745_v40  ;;  %v2904_v43 = vmul.f32 1.442695, %v2569_v35  ;;  %v2902_v44 = vmul.f32 1.442695, %v2568_v36  ;;  %v2311_v45 = vmul.f32 %v2051_v37, %v2051_v37  ;;  %v555_v35 = vmul.f32 20.0, %v295_v24 }
 0x128   : > { %3341 = vst.msk [vmem:[%s4275_s20 + $0x210] sm:$0xff] %vm3274_vm0, %v3747_v42  ;;  %v2310_v46 = vmul.f32 %v2050_v41, %v2050_v41  ;;  %v1066_v47 = vpop.permute.xlu1 %1065  ;;  %v1061_v48 = vpop.permute.xlu0 %1060  ;;  %v297_v40 = vld [vmem:[%s4177_s15 + $0x4b0] sm:$0xff]  ;;  %v304_v24 = vld [vmem:[%s4177_s15 + $0x4e8] sm:$0xff] }
 0x129   : > { %3760 = vpow2.f32 %v2904_v43  ;;  %v2571_v51 = vsub.f32 0.0, %v2311_v45  ;;  %v2053_v52 = vsub.f32 %v1066_v47, %v4432_v0  ;;  %v2052_v53 = vsub.f32 %v1061_v48, %v4432_v0  ;;  %1375 = vperm.xlu1 %3611, %v548_v33   ;;  %1370 = vperm.xlu0 %3610, %v547_v34  }
 0x12a   : > { %v3749_v56 = vpop.eup %3748  ;;  %3762 = vpow2.f32 %v2902_v44  ;;  %v2570_v57 = vsub.f32 0.0, %v2310_v46  ;;  %v556_v34 = vmul.f32 20.0, %v296_v23 }
 0x12b   : > { %v3751_v58 = vpop.eup %3750  ;;  %3344 = vst.msk [vmem:[%s4275_s20 + $0x228] sm:$0xff] %vm3274_vm0, %v3749_v56  ;;  %v2908_v59 = vmul.f32 1.442695, %v2571_v51  ;;  %v2313_v1 = vmul.f32 %v2053_v52, %v2053_v52  ;;  %v2312_v60 = vmul.f32 %v2052_v53, %v2052_v53  ;;  %v557_v51 = vmul.f32 20.0, %v297_v40  ;;  %v299_v56 = vld [vmem:[%s4177_s15 + $0x4c0] sm:$0xff]  ;;  %v306_v40 = vld [vmem:[%s4177_s15 + $0x4f8] sm:$0xff] }
 0x12c   : > { %3343 = vst.msk [vmem:[%s4275_s20 + $0x220] sm:$0xff] %vm3274_vm0, %v3751_v58  ;;  %v2906_v61 = vmul.f32 1.442695, %v2570_v57  ;;  %v1076_v62 = vpop.permute.xlu1 %1075  ;;  %v1071_v63 = vpop.permute.xlu0 %1070 }
 0x12d   : > { %3764 = vpow2.f32 %v2908_v59  ;;  %v2573_v4 = vsub.f32 0.0, %v2313_v1  ;;  %v2572_v5 = vsub.f32 0.0, %v2312_v60  ;;  %v2055_v6 = vsub.f32 %v1076_v62, %v4432_v0  ;;  %1385 = vperm.xlu1 %3611, %v550_v49   ;;  %1380 = vperm.xlu0 %3610, %v549_v50  }
 0x12e   : > { %v3753_v9 = vpop.eup %3752  ;;  %3766 = vpow2.f32 %v2906_v61  ;;  %v2054_v10 = vsub.f32 %v1071_v63, %v4432_v0  ;;  %v558_v50 = vmul.f32 20.0, %v298_v39 }
 0x12f   : > { %v3755_v11 = vpop.eup %3754  ;;  %3346 = vst.msk [vmem:[%s4275_s20 + $0x238] sm:$0xff] %vm3274_vm0, %v3753_v9  ;;  %v2912_v12 = vmul.f32 1.442695, %v2573_v4  ;;  %v2910_v13 = vmul.f32 1.442695, %v2572_v5  ;;  %v2315_v14 = vmul.f32 %v2055_v6, %v2055_v6  ;;  %v559_v4 = vmul.f32 20.0, %v299_v56 }
 0x130   : > { %3345 = vst.msk [vmem:[%s4275_s20 + $0x230] sm:$0xff] %vm3274_vm0, %v3755_v11  ;;  %v2314_v15 = vmul.f32 %v2054_v10, %v2054_v10  ;;  %v1086_v16 = vpop.permute.xlu1 %1085  ;;  %v1081_v17 = vpop.permute.xlu0 %1080  ;;  %v301_v9 = vld [vmem:[%s4177_s15 + $0x4d0] sm:$0xff]  ;;  %v308_v56 = vld [vmem:[%s4177_s15 + $0x508] sm:$0xff] }
 0x131   : > { %3768 = vpow2.f32 %v2912_v12  ;;  %v2575_v20 = vsub.f32 0.0, %v2315_v14  ;;  %v2057_v21 = vsub.f32 %v1086_v16, %v4432_v0  ;;  %v2056_v22 = vsub.f32 %v1081_v17, %v4432_v0  ;;  %1395 = vperm.xlu1 %3611, %v552_v2   ;;  %1390 = vperm.xlu0 %3610, %v551_v3  }
 0x132   : > { %v3757_v25 = vpop.eup %3756  ;;  %3770 = vpow2.f32 %v2910_v13  ;;  %v2574_v26 = vsub.f32 0.0, %v2314_v15  ;;  %v560_v3 = vmul.f32 20.0, %v300_v55 }
 0x133   : > { %v3759_v27 = vpop.eup %3758  ;;  %3348 = vst.msk [vmem:[%s4275_s20 + $0x248] sm:$0xff] %vm3274_vm0, %v3757_v25  ;;  %v2916_v28 = vmul.f32 1.442695, %v2575_v20  ;;  %v2317_v29 = vmul.f32 %v2057_v21, %v2057_v21  ;;  %v2316_v30 = vmul.f32 %v2056_v22, %v2056_v22  ;;  %v561_v20 = vmul.f32 20.0, %v301_v9  ;;  %v303_v25 = vld [vmem:[%s4177_s15 + $0x4e0] sm:$0xff]  ;;  %v310_v9 = vld [vmem:[%s4177_s15 + $0x518] sm:$0xff] }
 0x134   : > { %3347 = vst.msk [vmem:[%s4275_s20 + $0x240] sm:$0xff] %vm3274_vm0, %v3759_v27  ;;  %v2914_v31 = vmul.f32 1.442695, %v2574_v26  ;;  %v1096_v32 = vpop.permute.xlu1 %1095  ;;  %v1091_v33 = vpop.permute.xlu0 %1090 }
 0x135   : > { %3772 = vpow2.f32 %v2916_v28  ;;  %v2577_v36 = vsub.f32 0.0, %v2317_v29  ;;  %v2576_v37 = vsub.f32 0.0, %v2316_v30  ;;  %v2059_v38 = vsub.f32 %v1096_v32, %v4432_v0  ;;  %1405 = vperm.xlu1 %3611, %v554_v18   ;;  %1400 = vperm.xlu0 %3610, %v553_v19  }
 0x136   : > { %v3761_v41 = vpop.eup %3760  ;;  %3774 = vpow2.f32 %v2914_v31  ;;  %v2058_v42 = vsub.f32 %v1091_v33, %v4432_v0  ;;  %v562_v19 = vmul.f32 20.0, %v302_v8 }
 0x137   : > { %v3763_v43 = vpop.eup %3762  ;;  %3350 = vst.msk [vmem:[%s4275_s20 + $0x258] sm:$0xff] %vm3274_vm0, %v3761_v41  ;;  %v2920_v44 = vmul.f32 1.442695, %v2577_v36  ;;  %v2918_v45 = vmul.f32 1.442695, %v2576_v37  ;;  %v2319_v46 = vmul.f32 %v2059_v38, %v2059_v38  ;;  %v563_v36 = vmul.f32 20.0, %v303_v25 }
 0x138   : > { %3349 = vst.msk [vmem:[%s4275_s20 + $0x250] sm:$0xff] %vm3274_vm0, %v3763_v43  ;;  %v2318_v47 = vmul.f32 %v2058_v42, %v2058_v42  ;;  %v1106_v48 = vpop.permute.xlu1 %1105  ;;  %v1101_v49 = vpop.permute.xlu0 %1100  ;;  %v305_v41 = vld [vmem:[%s4177_s15 + $0x4f0] sm:$0xff]  ;;  %v312_v25 = vld [vmem:[%s4177_s15 + $0x528] sm:$0xff] }
 0x139   : > { %3776 = vpow2.f32 %v2920_v44  ;;  %v2579_v52 = vsub.f32 0.0, %v2319_v46  ;;  %v2061_v53 = vsub.f32 %v1106_v48, %v4432_v0  ;;  %v2060_v54 = vsub.f32 %v1101_v49, %v4432_v0  ;;  %1415 = vperm.xlu1 %3611, %v556_v34   ;;  %1410 = vperm.xlu0 %3610, %v555_v35  }
 0x13a   : > { %v3765_v57 = vpop.eup %3764  ;;  %3778 = vpow2.f32 %v2918_v45  ;;  %v2578_v58 = vsub.f32 0.0, %v2318_v47  ;;  %v564_v35 = vmul.f32 20.0, %v304_v24 }
 0x13b   : > { %v3767_v59 = vpop.eup %3766  ;;  %3352 = vst.msk [vmem:[%s4275_s20 + $0x268] sm:$0xff] %vm3274_vm0, %v3765_v57  ;;  %v2924_v1 = vmul.f32 1.442695, %v2579_v52  ;;  %v2321_v60 = vmul.f32 %v2061_v53, %v2061_v53  ;;  %v2320_v61 = vmul.f32 %v2060_v54, %v2060_v54  ;;  %v565_v52 = vmul.f32 20.0, %v305_v41  ;;  %v307_v57 = vld [vmem:[%s4177_s15 + $0x500] sm:$0xff]  ;;  %v314_v41 = vld [vmem:[%s4177_s15 + $0x538] sm:$0xff] }
 0x13c   : > { %3351 = vst.msk [vmem:[%s4275_s20 + $0x260] sm:$0xff] %vm3274_vm0, %v3767_v59  ;;  %v2922_v62 = vmul.f32 1.442695, %v2578_v58  ;;  %v1116_v63 = vpop.permute.xlu1 %1115  ;;  %v1111_v2 = vpop.permute.xlu0 %1110 }
 0x13d   : > { %3780 = vpow2.f32 %v2924_v1  ;;  %v2581_v5 = vsub.f32 0.0, %v2321_v60  ;;  %v2580_v6 = vsub.f32 0.0, %v2320_v61  ;;  %v2063_v7 = vsub.f32 %v1116_v63, %v4432_v0  ;;  %1425 = vperm.xlu1 %3611, %v558_v50   ;;  %1420 = vperm.xlu0 %3610, %v557_v51  }
 0x13e   : > { %v3769_v10 = vpop.eup %3768  ;;  %3782 = vpow2.f32 %v2922_v62  ;;  %v2062_v11 = vsub.f32 %v1111_v2, %v4432_v0  ;;  %v566_v51 = vmul.f32 20.0, %v306_v40 }
 0x13f   : > { %v3771_v12 = vpop.eup %3770  ;;  %3354 = vst.msk [vmem:[%s4275_s20 + $0x278] sm:$0xff] %vm3274_vm0, %v3769_v10  ;;  %v2928_v13 = vmul.f32 1.442695, %v2581_v5  ;;  %v2926_v14 = vmul.f32 1.442695, %v2580_v6  ;;  %v2323_v15 = vmul.f32 %v2063_v7, %v2063_v7  ;;  %v309_v10 = vld [vmem:[%s4177_s15 + $0x510] sm:$0xff] }
 0x140   : > { %3353 = vst.msk [vmem:[%s4275_s20 + $0x270] sm:$0xff] %vm3274_vm0, %v3771_v12  ;;  %v2322_v16 = vmul.f32 %v2062_v11, %v2062_v11  ;;  %v1126_v17 = vpop.permute.xlu1 %1125  ;;  %v1121_v18 = vpop.permute.xlu0 %1120  ;;  %v4629_v7 = vld [vmem:[%s5254_s1] ss:$0 sm:$0xff] }
 0x141   : > { %3784 = vpow2.f32 %v2928_v13  ;;  %v2583_v21 = vsub.f32 0.0, %v2323_v15  ;;  %v2065_v22 = vsub.f32 %v1126_v17, %v4432_v0  ;;  %v2064_v23 = vsub.f32 %v1121_v18, %v4432_v0  ;;  %1435 = vperm.xlu1 %3611, %v560_v3   ;;  %1430 = vperm.xlu0 %3610, %v559_v4  }
 0x142   : > { %v3773_v26 = vpop.eup %3772  ;;  %3786 = vpow2.f32 %v2926_v14  ;;  %v2582_v27 = vsub.f32 0.0, %v2322_v16  ;;  %v568_v3 = vmul.f32 20.0, %v308_v56  ;;  %v567_v4 = vmul.f32 20.0, %v307_v57  ;;  %v316_v57 = vld [vmem:[%s4177_s15 + $0x548] sm:$0xff] }
 0x143   : > { %v3775_v28 = vpop.eup %3774  ;;  %3356 = vst.msk [vmem:[%s4275_s20 + $0x288] sm:$0xff] %vm3274_vm0, %v3773_v26  ;;  %v2932_v29 = vmul.f32 1.442695, %v2583_v21  ;;  %v2325_v30 = vmul.f32 %v2065_v22, %v2065_v22  ;;  %v2324_v31 = vmul.f32 %v2064_v23, %v2064_v23  ;;  %v569_v21 = vmul.f32 20.0, %v309_v10  ;;  %v311_v26 = vld [vmem:[%s4177_s15 + $0x520] sm:$0xff]  ;;  %v318_v10 = vld [vmem:[%s4177_s15 + $0x558] sm:$0xff] }
 0x144   : > { %3355 = vst.msk [vmem:[%s4275_s20 + $0x280] sm:$0xff] %vm3274_vm0, %v3775_v28  ;;  %v2930_v32 = vmul.f32 1.442695, %v2582_v27  ;;  %v1136_v33 = vpop.permute.xlu1 %1135  ;;  %v1131_v34 = vpop.permute.xlu0 %1130 }
 0x145   : > { %3788 = vpow2.f32 %v2932_v29  ;;  %v2585_v37 = vsub.f32 0.0, %v2325_v30  ;;  %v2584_v38 = vsub.f32 0.0, %v2324_v31  ;;  %v2067_v39 = vsub.f32 %v1136_v33, %v4432_v0  ;;  %1445 = vperm.xlu1 %3611, %v562_v19   ;;  %1440 = vperm.xlu0 %3610, %v561_v20  }
 0x146   : > { %v3777_v42 = vpop.eup %3776  ;;  %3790 = vpow2.f32 %v2930_v32  ;;  %v2066_v43 = vsub.f32 %v1131_v34, %v4432_v0  ;;  %v570_v20 = vmul.f32 20.0, %v310_v9 }
 0x147   : > { %v3779_v44 = vpop.eup %3778  ;;  %3358 = vst.msk [vmem:[%s4275_s20 + $0x298] sm:$0xff] %vm3274_vm0, %v3777_v42  ;;  %v2936_v45 = vmul.f32 1.442695, %v2585_v37  ;;  %v2934_v46 = vmul.f32 1.442695, %v2584_v38  ;;  %v2327_v47 = vmul.f32 %v2067_v39, %v2067_v39  ;;  %v571_v37 = vmul.f32 20.0, %v311_v26 }
 0x148   : > { %3357 = vst.msk [vmem:[%s4275_s20 + $0x290] sm:$0xff] %vm3274_vm0, %v3779_v44  ;;  %v2326_v48 = vmul.f32 %v2066_v43, %v2066_v43  ;;  %v1146_v49 = vpop.permute.xlu1 %1145  ;;  %v1141_v50 = vpop.permute.xlu0 %1140  ;;  %v313_v42 = vld [vmem:[%s4177_s15 + $0x530] sm:$0xff]  ;;  %v320_v26 = vld [vmem:[%s4177_s15 + $0x568] sm:$0xff] }
 0x149   : > { %3792 = vpow2.f32 %v2936_v45  ;;  %v2587_v53 = vsub.f32 0.0, %v2327_v47  ;;  %v2069_v54 = vsub.f32 %v1146_v49, %v4432_v0  ;;  %v2068_v55 = vsub.f32 %v1141_v50, %v4432_v0  ;;  %1455 = vperm.xlu1 %3611, %v564_v35   ;;  %1450 = vperm.xlu0 %3610, %v563_v36  }
 0x14a   : > { %v3781_v58 = vpop.eup %3780  ;;  %3794 = vpow2.f32 %v2934_v46  ;;  %v2586_v59 = vsub.f32 0.0, %v2326_v48  ;;  %v572_v36 = vmul.f32 20.0, %v312_v25 }
 0x14b   : > { %v3783_v1 = vpop.eup %3782  ;;  %3360 = vst.msk [vmem:[%s4275_s20 + $0x2a8] sm:$0xff] %vm3274_vm0, %v3781_v58  ;;  %v2940_v60 = vmul.f32 1.442695, %v2587_v53  ;;  %v2329_v61 = vmul.f32 %v2069_v54, %v2069_v54  ;;  %v2328_v62 = vmul.f32 %v2068_v55, %v2068_v55  ;;  %v573_v53 = vmul.f32 20.0, %v313_v42  ;;  %v315_v58 = vld [vmem:[%s4177_s15 + $0x540] sm:$0xff]  ;;  %v322_v42 = vld [vmem:[%s4177_s15 + $0x578] sm:$0xff] }
 0x14c   : > { %3359 = vst.msk [vmem:[%s4275_s20 + $0x2a0] sm:$0xff] %vm3274_vm0, %v3783_v1  ;;  %v2938_v63 = vmul.f32 1.442695, %v2586_v59  ;;  %v1156_v2 = vpop.permute.xlu1 %1155  ;;  %v1151_v0 = vpop.permute.xlu0 %1150 }
 0x14d   : > { %3796 = vpow2.f32 %v2940_v60  ;;  %v2589_v5 = vsub.f32 0.0, %v2329_v61  ;;  %v2588_v6 = vsub.f32 0.0, %v2328_v62  ;;  %v2071_v8 = vsub.f32 %v1156_v2, %v4629_v7  ;;  %1465 = vperm.xlu1 %3611, %v566_v51   ;;  %1460 = vperm.xlu0 %3610, %v565_v52  }
 0x14e   : > { %v3785_v11 = vpop.eup %3784  ;;  %3798 = vpow2.f32 %v2938_v63  ;;  %v2070_v12 = vsub.f32 %v1151_v0, %v4629_v7  ;;  %v574_v52 = vmul.f32 20.0, %v314_v41 }
 0x14f   : > { %v3787_v13 = vpop.eup %3786  ;;  %3362 = vst.msk [vmem:[%s4275_s20 + $0x2b8] sm:$0xff] %vm3274_vm0, %v3785_v11  ;;  %v2944_v14 = vmul.f32 1.442695, %v2589_v5  ;;  %v2942_v15 = vmul.f32 1.442695, %v2588_v6  ;;  %v2331_v16 = vmul.f32 %v2071_v8, %v2071_v8  ;;  %v575_v5 = vmul.f32 20.0, %v315_v58 }
 0x150   : > { %3361 = vst.msk [vmem:[%s4275_s20 + $0x2b0] sm:$0xff] %vm3274_vm0, %v3787_v13  ;;  %v2330_v17 = vmul.f32 %v2070_v12, %v2070_v12  ;;  %v1166_v18 = vpop.permute.xlu1 %1165  ;;  %v1161_v19 = vpop.permute.xlu0 %1160  ;;  %v317_v11 = vld [vmem:[%s4177_s15 + $0x550] sm:$0xff]  ;;  %v324_v58 = vld [vmem:[%s4177_s15 + $0x588] sm:$0xff] }
 0x151   : > { %3800 = vpow2.f32 %v2944_v14  ;;  %v2591_v22 = vsub.f32 0.0, %v2331_v16  ;;  %v2073_v23 = vsub.f32 %v1166_v18, %v4629_v7  ;;  %v2072_v24 = vsub.f32 %v1161_v19, %v4629_v7  ;;  %1475 = vperm.xlu1 %3611, %v568_v3   ;;  %1470 = vperm.xlu0 %3610, %v567_v4  }
 0x152   : > { %v3789_v27 = vpop.eup %3788  ;;  %3802 = vpow2.f32 %v2942_v15  ;;  %v2590_v28 = vsub.f32 0.0, %v2330_v17  ;;  %v576_v4 = vmul.f32 20.0, %v316_v57 }
 0x153   : > { %v3791_v29 = vpop.eup %3790  ;;  %3364 = vst.msk [vmem:[%s4275_s20 + $0x2c8] sm:$0xff] %vm3274_vm0, %v3789_v27  ;;  %v2948_v30 = vmul.f32 1.442695, %v2591_v22  ;;  %v2333_v31 = vmul.f32 %v2073_v23, %v2073_v23  ;;  %v2332_v32 = vmul.f32 %v2072_v24, %v2072_v24  ;;  %v577_v22 = vmul.f32 20.0, %v317_v11  ;;  %v319_v27 = vld [vmem:[%s4177_s15 + $0x560] sm:$0xff]  ;;  %v326_v11 = vld [vmem:[%s4177_s15 + $0x598] sm:$0xff] }
 0x154   : > { %3363 = vst.msk [vmem:[%s4275_s20 + $0x2c0] sm:$0xff] %vm3274_vm0, %v3791_v29  ;;  %v2946_v33 = vmul.f32 1.442695, %v2590_v28  ;;  %v1176_v34 = vpop.permute.xlu1 %1175  ;;  %v1171_v35 = vpop.permute.xlu0 %1170 }
 0x155   : > { %3804 = vpow2.f32 %v2948_v30  ;;  %v2593_v38 = vsub.f32 0.0, %v2333_v31  ;;  %v2592_v39 = vsub.f32 0.0, %v2332_v32  ;;  %v2075_v40 = vsub.f32 %v1176_v34, %v4629_v7  ;;  %1485 = vperm.xlu1 %3611, %v570_v20   ;;  %1480 = vperm.xlu0 %3610, %v569_v21  }
 0x156   : > { %v3793_v43 = vpop.eup %3792  ;;  %3806 = vpow2.f32 %v2946_v33  ;;  %v2074_v44 = vsub.f32 %v1171_v35, %v4629_v7  ;;  %v578_v21 = vmul.f32 20.0, %v318_v10 }
 0x157   : > { %v3795_v45 = vpop.eup %3794  ;;  %3366 = vst.msk [vmem:[%s4275_s20 + $0x2d8] sm:$0xff] %vm3274_vm0, %v3793_v43  ;;  %v2952_v46 = vmul.f32 1.442695, %v2593_v38  ;;  %v2950_v47 = vmul.f32 1.442695, %v2592_v39  ;;  %v2335_v48 = vmul.f32 %v2075_v40, %v2075_v40  ;;  %v579_v38 = vmul.f32 20.0, %v319_v27 }
 0x158   : > { %3365 = vst.msk [vmem:[%s4275_s20 + $0x2d0] sm:$0xff] %vm3274_vm0, %v3795_v45  ;;  %v2334_v49 = vmul.f32 %v2074_v44, %v2074_v44  ;;  %v1186_v50 = vpop.permute.xlu1 %1185  ;;  %v1181_v51 = vpop.permute.xlu0 %1180  ;;  %v321_v43 = vld [vmem:[%s4177_s15 + $0x570] sm:$0xff]  ;;  %v328_v27 = vld [vmem:[%s4177_s15 + $0x5a8] sm:$0xff] }
 0x159   : > { %3808 = vpow2.f32 %v2952_v46  ;;  %v2595_v54 = vsub.f32 0.0, %v2335_v48  ;;  %v2077_v55 = vsub.f32 %v1186_v50, %v4629_v7  ;;  %v2076_v56 = vsub.f32 %v1181_v51, %v4629_v7  ;;  %1495 = vperm.xlu1 %3611, %v572_v36   ;;  %1490 = vperm.xlu0 %3610, %v571_v37  }
 0x15a   : > { %v3797_v59 = vpop.eup %3796  ;;  %3810 = vpow2.f32 %v2950_v47  ;;  %v2594_v1 = vsub.f32 0.0, %v2334_v49  ;;  %v580_v37 = vmul.f32 20.0, %v320_v26 }
 0x15b   : > { %v3799_v60 = vpop.eup %3798  ;;  %3368 = vst.msk [vmem:[%s4275_s20 + $0x2e8] sm:$0xff] %vm3274_vm0, %v3797_v59  ;;  %v2956_v61 = vmul.f32 1.442695, %v2595_v54  ;;  %v2337_v62 = vmul.f32 %v2077_v55, %v2077_v55  ;;  %v2336_v63 = vmul.f32 %v2076_v56, %v2076_v56  ;;  %v581_v54 = vmul.f32 20.0, %v321_v43  ;;  %v323_v59 = vld [vmem:[%s4177_s15 + $0x580] sm:$0xff]  ;;  %v330_v43 = vld [vmem:[%s4177_s15 + $0x5b8] sm:$0xff] }
 0x15c   : > { %3367 = vst.msk [vmem:[%s4275_s20 + $0x2e0] sm:$0xff] %vm3274_vm0, %v3799_v60  ;;  %v2954_v2 = vmul.f32 1.442695, %v2594_v1  ;;  %v1196_v0 = vpop.permute.xlu1 %1195  ;;  %v1191_v3 = vpop.permute.xlu0 %1190 }
 0x15d   : > { %3812 = vpow2.f32 %v2956_v61  ;;  %v2597_v6 = vsub.f32 0.0, %v2337_v62  ;;  %v2596_v8 = vsub.f32 0.0, %v2336_v63  ;;  %v2079_v9 = vsub.f32 %v1196_v0, %v4629_v7  ;;  %1505 = vperm.xlu1 %3611, %v574_v52   ;;  %1500 = vperm.xlu0 %3610, %v573_v53  }
 0x15e   : > { %v3801_v12 = vpop.eup %3800  ;;  %3814 = vpow2.f32 %v2954_v2  ;;  %v2078_v13 = vsub.f32 %v1191_v3, %v4629_v7  ;;  %v582_v53 = vmul.f32 20.0, %v322_v42 }
 0x15f   : > { %v3803_v14 = vpop.eup %3802  ;;  %3370 = vst.msk [vmem:[%s4275_s20 + $0x2f8] sm:$0xff] %vm3274_vm0, %v3801_v12  ;;  %v2960_v15 = vmul.f32 1.442695, %v2597_v6  ;;  %v2958_v16 = vmul.f32 1.442695, %v2596_v8  ;;  %v2339_v17 = vmul.f32 %v2079_v9, %v2079_v9  ;;  %v583_v6 = vmul.f32 20.0, %v323_v59 }
 0x160   : > { %3369 = vst.msk [vmem:[%s4275_s20 + $0x2f0] sm:$0xff] %vm3274_vm0, %v3803_v14  ;;  %v2338_v18 = vmul.f32 %v2078_v13, %v2078_v13  ;;  %v1206_v19 = vpop.permute.xlu1 %1205  ;;  %v1201_v20 = vpop.permute.xlu0 %1200  ;;  %v325_v12 = vld [vmem:[%s4177_s15 + $0x590] sm:$0xff]  ;;  %v332_v59 = vld [vmem:[%s4177_s15 + $0x5c8] sm:$0xff] }
 0x161   : > { %3816 = vpow2.f32 %v2960_v15  ;;  %v2599_v23 = vsub.f32 0.0, %v2339_v17  ;;  %v2081_v24 = vsub.f32 %v1206_v19, %v4629_v7  ;;  %v2080_v25 = vsub.f32 %v1201_v20, %v4629_v7  ;;  %1515 = vperm.xlu1 %3611, %v576_v4   ;;  %1510 = vperm.xlu0 %3610, %v575_v5  }
 0x162   : > { %v3805_v28 = vpop.eup %3804  ;;  %3818 = vpow2.f32 %v2958_v16  ;;  %v2598_v29 = vsub.f32 0.0, %v2338_v18  ;;  %v584_v5 = vmul.f32 20.0, %v324_v58 }
 0x163   : > { %v3807_v30 = vpop.eup %3806  ;;  %3372 = vst.msk [vmem:[%s4275_s20 + $0x308] sm:$0xff] %vm3274_vm0, %v3805_v28  ;;  %v2964_v31 = vmul.f32 1.442695, %v2599_v23  ;;  %v2341_v32 = vmul.f32 %v2081_v24, %v2081_v24  ;;  %v2340_v33 = vmul.f32 %v2080_v25, %v2080_v25  ;;  %v585_v23 = vmul.f32 20.0, %v325_v12  ;;  %v327_v28 = vld [vmem:[%s4177_s15 + $0x5a0] sm:$0xff]  ;;  %v334_v12 = vld [vmem:[%s4177_s15 + $0x5d8] sm:$0xff] }
 0x164   : > { %3371 = vst.msk [vmem:[%s4275_s20 + $0x300] sm:$0xff] %vm3274_vm0, %v3807_v30  ;;  %v2962_v34 = vmul.f32 1.442695, %v2598_v29  ;;  %v1216_v35 = vpop.permute.xlu1 %1215  ;;  %v1211_v36 = vpop.permute.xlu0 %1210 }
 0x165   : > { %3820 = vpow2.f32 %v2964_v31  ;;  %v2601_v39 = vsub.f32 0.0, %v2341_v32  ;;  %v2600_v40 = vsub.f32 0.0, %v2340_v33  ;;  %v2083_v41 = vsub.f32 %v1216_v35, %v4629_v7  ;;  %1525 = vperm.xlu1 %3611, %v578_v21   ;;  %1520 = vperm.xlu0 %3610, %v577_v22  }
 0x166   : > { %v3809_v44 = vpop.eup %3808  ;;  %3822 = vpow2.f32 %v2962_v34  ;;  %v2082_v45 = vsub.f32 %v1211_v36, %v4629_v7  ;;  %v586_v22 = vmul.f32 20.0, %v326_v11 }
 0x167   : > { %v3811_v46 = vpop.eup %3810  ;;  %3374 = vst.msk [vmem:[%s4275_s20 + $0x318] sm:$0xff] %vm3274_vm0, %v3809_v44  ;;  %v2968_v47 = vmul.f32 1.442695, %v2601_v39  ;;  %v2966_v48 = vmul.f32 1.442695, %v2600_v40  ;;  %v2343_v49 = vmul.f32 %v2083_v41, %v2083_v41  ;;  %v587_v39 = vmul.f32 20.0, %v327_v28 }
 0x168   : > { %3373 = vst.msk [vmem:[%s4275_s20 + $0x310] sm:$0xff] %vm3274_vm0, %v3811_v46  ;;  %v2342_v50 = vmul.f32 %v2082_v45, %v2082_v45  ;;  %v1226_v51 = vpop.permute.xlu1 %1225  ;;  %v1221_v52 = vpop.permute.xlu0 %1220  ;;  %v329_v44 = vld [vmem:[%s4177_s15 + $0x5b0] sm:$0xff]  ;;  %v336_v28 = vld [vmem:[%s4177_s15 + $0x5e8] sm:$0xff] }
 0x169   : > { %3824 = vpow2.f32 %v2968_v47  ;;  %v2603_v55 = vsub.f32 0.0, %v2343_v49  ;;  %v2085_v56 = vsub.f32 %v1226_v51, %v4629_v7  ;;  %v2084_v57 = vsub.f32 %v1221_v52, %v4629_v7  ;;  %1535 = vperm.xlu1 %3611, %v580_v37   ;;  %1530 = vperm.xlu0 %3610, %v579_v38  }
 0x16a   : > { %v3813_v1 = vpop.eup %3812  ;;  %3826 = vpow2.f32 %v2966_v48  ;;  %v2602_v60 = vsub.f32 0.0, %v2342_v50  ;;  %v588_v38 = vmul.f32 20.0, %v328_v27 }
 0x16b   : > { %v3815_v61 = vpop.eup %3814  ;;  %3376 = vst.msk [vmem:[%s4275_s20 + $0x328] sm:$0xff] %vm3274_vm0, %v3813_v1  ;;  %v2972_v62 = vmul.f32 1.442695, %v2603_v55  ;;  %v2345_v63 = vmul.f32 %v2085_v56, %v2085_v56  ;;  %v2344_v2 = vmul.f32 %v2084_v57, %v2084_v57  ;;  %v589_v55 = vmul.f32 20.0, %v329_v44  ;;  %v331_v1 = vld [vmem:[%s4177_s15 + $0x5c0] sm:$0xff]  ;;  %v338_v44 = vld [vmem:[%s4177_s15 + $0x5f8] sm:$0xff] }
 0x16c   : > { %3375 = vst.msk [vmem:[%s4275_s20 + $0x320] sm:$0xff] %vm3274_vm0, %v3815_v61  ;;  %v2970_v0 = vmul.f32 1.442695, %v2602_v60  ;;  %v1236_v3 = vpop.permute.xlu1 %1235  ;;  %v1231_v4 = vpop.permute.xlu0 %1230 }
 0x16d   : > { %3828 = vpow2.f32 %v2972_v62  ;;  %v2605_v8 = vsub.f32 0.0, %v2345_v63  ;;  %v2604_v9 = vsub.f32 0.0, %v2344_v2  ;;  %v2087_v10 = vsub.f32 %v1236_v3, %v4629_v7  ;;  %1545 = vperm.xlu1 %3611, %v582_v53   ;;  %1540 = vperm.xlu0 %3610, %v581_v54  }
 0x16e   : > { %v3817_v13 = vpop.eup %3816  ;;  %3830 = vpow2.f32 %v2970_v0  ;;  %v2086_v14 = vsub.f32 %v1231_v4, %v4629_v7  ;;  %v590_v54 = vmul.f32 20.0, %v330_v43 }
 0x16f   : > { %v3819_v15 = vpop.eup %3818  ;;  %3378 = vst.msk [vmem:[%s4275_s20 + $0x338] sm:$0xff] %vm3274_vm0, %v3817_v13  ;;  %v2976_v16 = vmul.f32 1.442695, %v2605_v8  ;;  %v2974_v17 = vmul.f32 1.442695, %v2604_v9  ;;  %v2347_v18 = vmul.f32 %v2087_v10, %v2087_v10  ;;  %v591_v8 = vmul.f32 20.0, %v331_v1 }
 0x170   : > { %3377 = vst.msk [vmem:[%s4275_s20 + $0x330] sm:$0xff] %vm3274_vm0, %v3819_v15  ;;  %v2346_v19 = vmul.f32 %v2086_v14, %v2086_v14  ;;  %v1246_v20 = vpop.permute.xlu1 %1245  ;;  %v1241_v21 = vpop.permute.xlu0 %1240  ;;  %v333_v13 = vld [vmem:[%s4177_s15 + $0x5d0] sm:$0xff]  ;;  %v340_v1 = vld [vmem:[%s4177_s15 + $0x608] sm:$0xff] }
 0x171   : > { %3832 = vpow2.f32 %v2976_v16  ;;  %v2607_v24 = vsub.f32 0.0, %v2347_v18  ;;  %v2089_v25 = vsub.f32 %v1246_v20, %v4629_v7  ;;  %v2088_v26 = vsub.f32 %v1241_v21, %v4629_v7  ;;  %1555 = vperm.xlu1 %3611, %v584_v5   ;;  %1550 = vperm.xlu0 %3610, %v583_v6  }
 0x172   : > { %v3821_v29 = vpop.eup %3820  ;;  %3834 = vpow2.f32 %v2974_v17  ;;  %v2606_v30 = vsub.f32 0.0, %v2346_v19  ;;  %v592_v6 = vmul.f32 20.0, %v332_v59 }
 0x173   : > { %v3823_v31 = vpop.eup %3822  ;;  %3380 = vst.msk [vmem:[%s4275_s20 + $0x348] sm:$0xff] %vm3274_vm0, %v3821_v29  ;;  %v2980_v32 = vmul.f32 1.442695, %v2607_v24  ;;  %v2349_v33 = vmul.f32 %v2089_v25, %v2089_v25  ;;  %v2348_v34 = vmul.f32 %v2088_v26, %v2088_v26  ;;  %v593_v24 = vmul.f32 20.0, %v333_v13  ;;  %v335_v29 = vld [vmem:[%s4177_s15 + $0x5e0] sm:$0xff]  ;;  %v342_v13 = vld [vmem:[%s4177_s15 + $0x618] sm:$0xff] }
 0x174   : > { %3379 = vst.msk [vmem:[%s4275_s20 + $0x340] sm:$0xff] %vm3274_vm0, %v3823_v31  ;;  %v2978_v35 = vmul.f32 1.442695, %v2606_v30  ;;  %v1256_v36 = vpop.permute.xlu1 %1255  ;;  %v1251_v37 = vpop.permute.xlu0 %1250 }
 0x175   : > { %3836 = vpow2.f32 %v2980_v32  ;;  %v2609_v40 = vsub.f32 0.0, %v2349_v33  ;;  %v2608_v41 = vsub.f32 0.0, %v2348_v34  ;;  %v2091_v42 = vsub.f32 %v1256_v36, %v4629_v7  ;;  %1565 = vperm.xlu1 %3611, %v586_v22   ;;  %1560 = vperm.xlu0 %3610, %v585_v23  }
 0x176   : > { %v3825_v45 = vpop.eup %3824  ;;  %3838 = vpow2.f32 %v2978_v35  ;;  %v2090_v46 = vsub.f32 %v1251_v37, %v4629_v7  ;;  %v594_v23 = vmul.f32 20.0, %v334_v12 }
 0x177   : > { %v3827_v47 = vpop.eup %3826  ;;  %3382 = vst.msk [vmem:[%s4275_s20 + $0x358] sm:$0xff] %vm3274_vm0, %v3825_v45  ;;  %v2984_v48 = vmul.f32 1.442695, %v2609_v40  ;;  %v2982_v49 = vmul.f32 1.442695, %v2608_v41  ;;  %v2351_v50 = vmul.f32 %v2091_v42, %v2091_v42  ;;  %v595_v40 = vmul.f32 20.0, %v335_v29 }
 0x178   : > { %3381 = vst.msk [vmem:[%s4275_s20 + $0x350] sm:$0xff] %vm3274_vm0, %v3827_v47  ;;  %v2350_v51 = vmul.f32 %v2090_v46, %v2090_v46  ;;  %v1266_v52 = vpop.permute.xlu1 %1265  ;;  %v1261_v53 = vpop.permute.xlu0 %1260  ;;  %v337_v45 = vld [vmem:[%s4177_s15 + $0x5f0] sm:$0xff]  ;;  %v344_v29 = vld [vmem:[%s4177_s15 + $0x628] sm:$0xff] }
 0x179   : > { %3840 = vpow2.f32 %v2984_v48  ;;  %v2611_v56 = vsub.f32 0.0, %v2351_v50  ;;  %v2093_v57 = vsub.f32 %v1266_v52, %v4629_v7  ;;  %v2092_v58 = vsub.f32 %v1261_v53, %v4629_v7  ;;  %1575 = vperm.xlu1 %3611, %v588_v38   ;;  %1570 = vperm.xlu0 %3610, %v587_v39  }
 0x17a   : > { %v3829_v60 = vpop.eup %3828  ;;  %3842 = vpow2.f32 %v2982_v49  ;;  %v2610_v61 = vsub.f32 0.0, %v2350_v51  ;;  %v596_v39 = vmul.f32 20.0, %v336_v28 }
 0x17b   : > { %v3831_v62 = vpop.eup %3830  ;;  %3384 = vst.msk [vmem:[%s4275_s20 + $0x368] sm:$0xff] %vm3274_vm0, %v3829_v60  ;;  %v2988_v63 = vmul.f32 1.442695, %v2611_v56  ;;  %v2353_v2 = vmul.f32 %v2093_v57, %v2093_v57  ;;  %v2352_v0 = vmul.f32 %v2092_v58, %v2092_v58  ;;  %v597_v56 = vmul.f32 20.0, %v337_v45  ;;  %v339_v60 = vld [vmem:[%s4177_s15 + $0x600] sm:$0xff]  ;;  %v346_v45 = vld [vmem:[%s4177_s15 + $0x638] sm:$0xff] }
 0x17c   : > { %3383 = vst.msk [vmem:[%s4275_s20 + $0x360] sm:$0xff] %vm3274_vm0, %v3831_v62  ;;  %v2986_v3 = vmul.f32 1.442695, %v2610_v61  ;;  %v1276_v4 = vpop.permute.xlu1 %1275  ;;  %v1271_v5 = vpop.permute.xlu0 %1270 }
 0x17d   : > { %3844 = vpow2.f32 %v2988_v63  ;;  %v2613_v9 = vsub.f32 0.0, %v2353_v2  ;;  %v2612_v10 = vsub.f32 0.0, %v2352_v0  ;;  %v2095_v11 = vsub.f32 %v1276_v4, %v4629_v7  ;;  %1585 = vperm.xlu1 %3611, %v590_v54   ;;  %1580 = vperm.xlu0 %3610, %v589_v55  }
 0x17e   : > { %v3833_v14 = vpop.eup %3832  ;;  %3846 = vpow2.f32 %v2986_v3  ;;  %v2094_v15 = vsub.f32 %v1271_v5, %v4629_v7  ;;  %v598_v55 = vmul.f32 20.0, %v338_v44 }
 0x17f   : > { %v3835_v16 = vpop.eup %3834  ;;  %3386 = vst.msk [vmem:[%s4275_s20 + $0x378] sm:$0xff] %vm3274_vm0, %v3833_v14  ;;  %v2992_v17 = vmul.f32 1.442695, %v2613_v9  ;;  %v2990_v18 = vmul.f32 1.442695, %v2612_v10  ;;  %v2355_v19 = vmul.f32 %v2095_v11, %v2095_v11  ;;  %v599_v9 = vmul.f32 20.0, %v339_v60 }
 0x180   : > { %3385 = vst.msk [vmem:[%s4275_s20 + $0x370] sm:$0xff] %vm3274_vm0, %v3835_v16  ;;  %v2354_v20 = vmul.f32 %v2094_v15, %v2094_v15  ;;  %v1286_v21 = vpop.permute.xlu1 %1285  ;;  %v1281_v22 = vpop.permute.xlu0 %1280  ;;  %v341_v14 = vld [vmem:[%s4177_s15 + $0x610] sm:$0xff]  ;;  %v348_v60 = vld [vmem:[%s4177_s15 + $0x648] sm:$0xff] }
 0x181   : > { %3848 = vpow2.f32 %v2992_v17  ;;  %v2615_v25 = vsub.f32 0.0, %v2355_v19  ;;  %v2097_v26 = vsub.f32 %v1286_v21, %v4629_v7  ;;  %v2096_v27 = vsub.f32 %v1281_v22, %v4629_v7  ;;  %1595 = vperm.xlu1 %3611, %v592_v6   ;;  %1590 = vperm.xlu0 %3610, %v591_v8  }
 0x182   : > { %v3837_v30 = vpop.eup %3836  ;;  %3850 = vpow2.f32 %v2990_v18  ;;  %v2614_v31 = vsub.f32 0.0, %v2354_v20  ;;  %v600_v8 = vmul.f32 20.0, %v340_v1 }
 0x183   : > { %v3839_v32 = vpop.eup %3838  ;;  %3388 = vst.msk [vmem:[%s4275_s20 + $0x388] sm:$0xff] %vm3274_vm0, %v3837_v30  ;;  %v2996_v33 = vmul.f32 1.442695, %v2615_v25  ;;  %v2357_v34 = vmul.f32 %v2097_v26, %v2097_v26  ;;  %v2356_v35 = vmul.f32 %v2096_v27, %v2096_v27  ;;  %v601_v25 = vmul.f32 20.0, %v341_v14  ;;  %v343_v30 = vld [vmem:[%s4177_s15 + $0x620] sm:$0xff]  ;;  %v350_v14 = vld [vmem:[%s4177_s15 + $0x658] sm:$0xff] }
 0x184   : > { %3387 = vst.msk [vmem:[%s4275_s20 + $0x380] sm:$0xff] %vm3274_vm0, %v3839_v32  ;;  %v2994_v36 = vmul.f32 1.442695, %v2614_v31  ;;  %v1296_v37 = vpop.permute.xlu1 %1295  ;;  %v1291_v38 = vpop.permute.xlu0 %1290 }
 0x185   : > { %3852 = vpow2.f32 %v2996_v33  ;;  %v2617_v41 = vsub.f32 0.0, %v2357_v34  ;;  %v2616_v42 = vsub.f32 0.0, %v2356_v35  ;;  %v2099_v43 = vsub.f32 %v1296_v37, %v4629_v7  ;;  %1605 = vperm.xlu1 %3611, %v594_v23   ;;  %1600 = vperm.xlu0 %3610, %v593_v24  }
 0x186   : > { %v3841_v46 = vpop.eup %3840  ;;  %3854 = vpow2.f32 %v2994_v36  ;;  %v2098_v47 = vsub.f32 %v1291_v38, %v4629_v7  ;;  %v602_v24 = vmul.f32 20.0, %v342_v13 }
 0x187   : > { %v3843_v48 = vpop.eup %3842  ;;  %3390 = vst.msk [vmem:[%s4275_s20 + $0x398] sm:$0xff] %vm3274_vm0, %v3841_v46  ;;  %v3000_v49 = vmul.f32 1.442695, %v2617_v41  ;;  %v2998_v50 = vmul.f32 1.442695, %v2616_v42  ;;  %v2359_v51 = vmul.f32 %v2099_v43, %v2099_v43  ;;  %v603_v41 = vmul.f32 20.0, %v343_v30 }
 0x188   : > { %3389 = vst.msk [vmem:[%s4275_s20 + $0x390] sm:$0xff] %vm3274_vm0, %v3843_v48  ;;  %v2358_v52 = vmul.f32 %v2098_v47, %v2098_v47  ;;  %v1306_v53 = vpop.permute.xlu1 %1305  ;;  %v1301_v54 = vpop.permute.xlu0 %1300  ;;  %v345_v46 = vld [vmem:[%s4177_s15 + $0x630] sm:$0xff]  ;;  %v352_v30 = vld [vmem:[%s4177_s15 + $0x668] sm:$0xff] }
 0x189   : > { %3856 = vpow2.f32 %v3000_v49  ;;  %v2619_v57 = vsub.f32 0.0, %v2359_v51  ;;  %v2101_v58 = vsub.f32 %v1306_v53, %v4629_v7  ;;  %v2100_v59 = vsub.f32 %v1301_v54, %v4629_v7  ;;  %1615 = vperm.xlu1 %3611, %v596_v39   ;;  %1610 = vperm.xlu0 %3610, %v595_v40  }
 0x18a   : > { %v3845_v61 = vpop.eup %3844  ;;  %3858 = vpow2.f32 %v2998_v50  ;;  %v2618_v62 = vsub.f32 0.0, %v2358_v52  ;;  %v604_v40 = vmul.f32 20.0, %v344_v29 }
 0x18b   : > { %v3847_v63 = vpop.eup %3846  ;;  %3392 = vst.msk [vmem:[%s4275_s20 + $0x3a8] sm:$0xff] %vm3274_vm0, %v3845_v61  ;;  %v3004_v2 = vmul.f32 1.442695, %v2619_v57  ;;  %v2361_v0 = vmul.f32 %v2101_v58, %v2101_v58  ;;  %v2360_v3 = vmul.f32 %v2100_v59, %v2100_v59  ;;  %v605_v57 = vmul.f32 20.0, %v345_v46  ;;  %v347_v61 = vld [vmem:[%s4177_s15 + $0x640] sm:$0xff]  ;;  %v354_v46 = vld [vmem:[%s4177_s15 + $0x678] sm:$0xff] }
 0x18c   : > { %3391 = vst.msk [vmem:[%s4275_s20 + $0x3a0] sm:$0xff] %vm3274_vm0, %v3847_v63  ;;  %v3002_v4 = vmul.f32 1.442695, %v2618_v62  ;;  %v1316_v5 = vpop.permute.xlu1 %1315  ;;  %v1311_v6 = vpop.permute.xlu0 %1310 }
 0x18d   : > { %3860 = vpow2.f32 %v3004_v2  ;;  %v2621_v10 = vsub.f32 0.0, %v2361_v0  ;;  %v2620_v11 = vsub.f32 0.0, %v2360_v3  ;;  %v2103_v12 = vsub.f32 %v1316_v5, %v4629_v7  ;;  %1625 = vperm.xlu1 %3611, %v598_v55   ;;  %1620 = vperm.xlu0 %3610, %v597_v56  }
 0x18e   : > { %v3849_v15 = vpop.eup %3848  ;;  %3862 = vpow2.f32 %v3002_v4  ;;  %v2102_v16 = vsub.f32 %v1311_v6, %v4629_v7  ;;  %v606_v56 = vmul.f32 20.0, %v346_v45 }
 0x18f   : > { %v3851_v17 = vpop.eup %3850  ;;  %3394 = vst.msk [vmem:[%s4275_s20 + $0x3b8] sm:$0xff] %vm3274_vm0, %v3849_v15  ;;  %v3008_v18 = vmul.f32 1.442695, %v2621_v10  ;;  %v3006_v19 = vmul.f32 1.442695, %v2620_v11  ;;  %v2363_v20 = vmul.f32 %v2103_v12, %v2103_v12  ;;  %v607_v10 = vmul.f32 20.0, %v347_v61 }
 0x190   : > { %3393 = vst.msk [vmem:[%s4275_s20 + $0x3b0] sm:$0xff] %vm3274_vm0, %v3851_v17  ;;  %v2362_v21 = vmul.f32 %v2102_v16, %v2102_v16  ;;  %v1326_v22 = vpop.permute.xlu1 %1325  ;;  %v1321_v23 = vpop.permute.xlu0 %1320  ;;  %v349_v15 = vld [vmem:[%s4177_s15 + $0x650] sm:$0xff]  ;;  %v356_v61 = vld [vmem:[%s4177_s15 + $0x688] sm:$0xff] }
 0x191   : > { %3864 = vpow2.f32 %v3008_v18  ;;  %v2623_v26 = vsub.f32 0.0, %v2363_v20  ;;  %v2105_v27 = vsub.f32 %v1326_v22, %v4629_v7  ;;  %v2104_v28 = vsub.f32 %v1321_v23, %v4629_v7  ;;  %1635 = vperm.xlu1 %3611, %v600_v8   ;;  %1630 = vperm.xlu0 %3610, %v599_v9  }
 0x192   : > { %v3853_v31 = vpop.eup %3852  ;;  %3866 = vpow2.f32 %v3006_v19  ;;  %v2622_v32 = vsub.f32 0.0, %v2362_v21  ;;  %v608_v9 = vmul.f32 20.0, %v348_v60 }
 0x193   : > { %v3855_v33 = vpop.eup %3854  ;;  %3396 = vst.msk [vmem:[%s4275_s20 + $0x3c8] sm:$0xff] %vm3274_vm0, %v3853_v31  ;;  %v3012_v34 = vmul.f32 1.442695, %v2623_v26  ;;  %v2365_v35 = vmul.f32 %v2105_v27, %v2105_v27  ;;  %v2364_v36 = vmul.f32 %v2104_v28, %v2104_v28  ;;  %v609_v26 = vmul.f32 20.0, %v349_v15  ;;  %v351_v31 = vld [vmem:[%s4177_s15 + $0x660] sm:$0xff]  ;;  %v358_v15 = vld [vmem:[%s4177_s15 + $0x698] sm:$0xff] }
 0x194   : > { %3395 = vst.msk [vmem:[%s4275_s20 + $0x3c0] sm:$0xff] %vm3274_vm0, %v3855_v33  ;;  %v3010_v37 = vmul.f32 1.442695, %v2622_v32  ;;  %v1336_v38 = vpop.permute.xlu1 %1335  ;;  %v1331_v39 = vpop.permute.xlu0 %1330 }
 0x195   : > { %3868 = vpow2.f32 %v3012_v34  ;;  %v2625_v42 = vsub.f32 0.0, %v2365_v35  ;;  %v2624_v43 = vsub.f32 0.0, %v2364_v36  ;;  %v2107_v44 = vsub.f32 %v1336_v38, %v4629_v7  ;;  %1645 = vperm.xlu1 %3611, %v602_v24   ;;  %1640 = vperm.xlu0 %3610, %v601_v25  }
 0x196   : > { %v3857_v47 = vpop.eup %3856  ;;  %3870 = vpow2.f32 %v3010_v37  ;;  %v2106_v48 = vsub.f32 %v1331_v39, %v4629_v7  ;;  %v610_v25 = vmul.f32 20.0, %v350_v14 }
 0x197   : > { %v3859_v49 = vpop.eup %3858  ;;  %3398 = vst.msk [vmem:[%s4275_s20 + $0x3d8] sm:$0xff] %vm3274_vm0, %v3857_v47  ;;  %v3016_v50 = vmul.f32 1.442695, %v2625_v42  ;;  %v3014_v51 = vmul.f32 1.442695, %v2624_v43  ;;  %v2367_v52 = vmul.f32 %v2107_v44, %v2107_v44  ;;  %v611_v42 = vmul.f32 20.0, %v351_v31 }
 0x198   : > { %3397 = vst.msk [vmem:[%s4275_s20 + $0x3d0] sm:$0xff] %vm3274_vm0, %v3859_v49  ;;  %v2366_v53 = vmul.f32 %v2106_v48, %v2106_v48  ;;  %v1346_v54 = vpop.permute.xlu1 %1345  ;;  %v1341_v55 = vpop.permute.xlu0 %1340  ;;  %v353_v47 = vld [vmem:[%s4177_s15 + $0x670] sm:$0xff]  ;;  %v360_v31 = vld [vmem:[%s4177_s15 + $0x6a8] sm:$0xff] }
 0x199   : > { %3872 = vpow2.f32 %v3016_v50  ;;  %v2627_v58 = vsub.f32 0.0, %v2367_v52  ;;  %v2109_v59 = vsub.f32 %v1346_v54, %v4629_v7  ;;  %v2108_v1 = vsub.f32 %v1341_v55, %v4629_v7  ;;  %1655 = vperm.xlu1 %3611, %v604_v40   ;;  %1650 = vperm.xlu0 %3610, %v603_v41  }
 0x19a   : > { %v3861_v62 = vpop.eup %3860  ;;  %3874 = vpow2.f32 %v3014_v51  ;;  %v2626_v63 = vsub.f32 0.0, %v2366_v53  ;;  %v612_v41 = vmul.f32 20.0, %v352_v30 }
 0x19b   : > { %v3863_v2 = vpop.eup %3862  ;;  %3400 = vst.msk [vmem:[%s4275_s20 + $0x3e8] sm:$0xff] %vm3274_vm0, %v3861_v62  ;;  %v3020_v0 = vmul.f32 1.442695, %v2627_v58  ;;  %v2369_v3 = vmul.f32 %v2109_v59, %v2109_v59  ;;  %v2368_v4 = vmul.f32 %v2108_v1, %v2108_v1  ;;  %v613_v58 = vmul.f32 20.0, %v353_v47  ;;  %v355_v62 = vld [vmem:[%s4177_s15 + $0x680] sm:$0xff]  ;;  %v362_v47 = vld [vmem:[%s4177_s15 + $0x6b8] sm:$0xff] }
 0x19c   : > { %3399 = vst.msk [vmem:[%s4275_s20 + $0x3e0] sm:$0xff] %vm3274_vm0, %v3863_v2  ;;  %v3018_v5 = vmul.f32 1.442695, %v2626_v63  ;;  %v1356_v6 = vpop.permute.xlu1 %1355  ;;  %v1351_v8 = vpop.permute.xlu0 %1350 }
 0x19d   : > { %3876 = vpow2.f32 %v3020_v0  ;;  %v2629_v11 = vsub.f32 0.0, %v2369_v3  ;;  %v2628_v12 = vsub.f32 0.0, %v2368_v4  ;;  %v2111_v13 = vsub.f32 %v1356_v6, %v4629_v7  ;;  %1665 = vperm.xlu1 %3611, %v606_v56   ;;  %1660 = vperm.xlu0 %3610, %v605_v57  }
 0x19e   : > { %v3865_v16 = vpop.eup %3864  ;;  %3878 = vpow2.f32 %v3018_v5  ;;  %v2110_v17 = vsub.f32 %v1351_v8, %v4629_v7  ;;  %v614_v57 = vmul.f32 20.0, %v354_v46 }
 0x19f   : > { %v3867_v18 = vpop.eup %3866  ;;  %3402 = vst.msk [vmem:[%s4275_s20 + $0x3f8] sm:$0xff] %vm3274_vm0, %v3865_v16  ;;  %v3024_v19 = vmul.f32 1.442695, %v2629_v11  ;;  %v3022_v20 = vmul.f32 1.442695, %v2628_v12  ;;  %v2371_v21 = vmul.f32 %v2111_v13, %v2111_v13  ;;  %v357_v16 = vld [vmem:[%s4177_s15 + $0x690] sm:$0xff] }
 0x1a0   : > { %3401 = vst.msk [vmem:[%s4275_s20 + $0x3f0] sm:$0xff] %vm3274_vm0, %v3867_v18  ;;  %v2370_v22 = vmul.f32 %v2110_v17, %v2110_v17  ;;  %v1366_v23 = vpop.permute.xlu1 %1365  ;;  %v1361_v24 = vpop.permute.xlu0 %1360  ;;  %v4826_v13 = vld [vmem:[%s5254_s1] ss:$0 sm:$0xff] }
 0x1a1   : > { %3880 = vpow2.f32 %v3024_v19  ;;  %v2631_v27 = vsub.f32 0.0, %v2371_v21  ;;  %v2113_v28 = vsub.f32 %v1366_v23, %v4629_v7  ;;  %v2112_v29 = vsub.f32 %v1361_v24, %v4629_v7  ;;  %1675 = vperm.xlu1 %3611, %v608_v9   ;;  %1670 = vperm.xlu0 %3610, %v607_v10  }
 0x1a2   : > { %v3869_v32 = vpop.eup %3868  ;;  %3882 = vpow2.f32 %v3022_v20  ;;  %v2630_v33 = vsub.f32 0.0, %v2370_v22  ;;  %v616_v9 = vmul.f32 20.0, %v356_v61  ;;  %v615_v10 = vmul.f32 20.0, %v355_v62  ;;  %v364_v62 = vld [vmem:[%s4177_s15 + $0x6c8] sm:$0xff] }
 0x1a3   : > { %v3871_v34 = vpop.eup %3870  ;;  %3404 = vst.msk [vmem:[%s4275_s20 + $0x408] sm:$0xff] %vm3274_vm0, %v3869_v32  ;;  %v3028_v35 = vmul.f32 1.442695, %v2631_v27  ;;  %v2373_v36 = vmul.f32 %v2113_v28, %v2113_v28  ;;  %v2372_v37 = vmul.f32 %v2112_v29, %v2112_v29  ;;  %v617_v27 = vmul.f32 20.0, %v357_v16  ;;  %v359_v32 = vld [vmem:[%s4177_s15 + $0x6a0] sm:$0xff]  ;;  %v366_v16 = vld [vmem:[%s4177_s15 + $0x6d8] sm:$0xff] }
 0x1a4   : > { %3403 = vst.msk [vmem:[%s4275_s20 + $0x400] sm:$0xff] %vm3274_vm0, %v3871_v34  ;;  %v3026_v38 = vmul.f32 1.442695, %v2630_v33  ;;  %v1376_v39 = vpop.permute.xlu1 %1375  ;;  %v1371_v40 = vpop.permute.xlu0 %1370 }
 0x1a5   : > { %3884 = vpow2.f32 %v3028_v35  ;;  %v2633_v43 = vsub.f32 0.0, %v2373_v36  ;;  %v2632_v44 = vsub.f32 0.0, %v2372_v37  ;;  %v2115_v45 = vsub.f32 %v1376_v39, %v4629_v7  ;;  %1685 = vperm.xlu1 %3611, %v610_v25   ;;  %1680 = vperm.xlu0 %3610, %v609_v26  }
 0x1a6   : > { %v3873_v48 = vpop.eup %3872  ;;  %3886 = vpow2.f32 %v3026_v38  ;;  %v2114_v49 = vsub.f32 %v1371_v40, %v4629_v7  ;;  %v618_v26 = vmul.f32 20.0, %v358_v15 }
 0x1a7   : > { %v3875_v50 = vpop.eup %3874  ;;  %3406 = vst.msk [vmem:[%s4275_s20 + $0x418] sm:$0xff] %vm3274_vm0, %v3873_v48  ;;  %v3032_v51 = vmul.f32 1.442695, %v2633_v43  ;;  %v3030_v52 = vmul.f32 1.442695, %v2632_v44  ;;  %v2375_v53 = vmul.f32 %v2115_v45, %v2115_v45  ;;  %v619_v43 = vmul.f32 20.0, %v359_v32 }
 0x1a8   : > { %3405 = vst.msk [vmem:[%s4275_s20 + $0x410] sm:$0xff] %vm3274_vm0, %v3875_v50  ;;  %v2374_v54 = vmul.f32 %v2114_v49, %v2114_v49  ;;  %v1386_v55 = vpop.permute.xlu1 %1385  ;;  %v1381_v56 = vpop.permute.xlu0 %1380  ;;  %v361_v48 = vld [vmem:[%s4177_s15 + $0x6b0] sm:$0xff]  ;;  %v368_v32 = vld [vmem:[%s4177_s15 + $0x6e8] sm:$0xff] }
 0x1a9   : > { %3888 = vpow2.f32 %v3032_v51  ;;  %v2635_v59 = vsub.f32 0.0, %v2375_v53  ;;  %v2117_v1 = vsub.f32 %v1386_v55, %v4629_v7  ;;  %v2116_v60 = vsub.f32 %v1381_v56, %v4629_v7  ;;  %1695 = vperm.xlu1 %3611, %v612_v41   ;;  %1690 = vperm.xlu0 %3610, %v611_v42  }
 0x1aa   : > { %v3877_v63 = vpop.eup %3876  ;;  %3890 = vpow2.f32 %v3030_v52  ;;  %v2634_v2 = vsub.f32 0.0, %v2374_v54  ;;  %v620_v42 = vmul.f32 20.0, %v360_v31 }
 0x1ab   : > { %v3879_v0 = vpop.eup %3878  ;;  %3408 = vst.msk [vmem:[%s4275_s20 + $0x428] sm:$0xff] %vm3274_vm0, %v3877_v63  ;;  %v3036_v3 = vmul.f32 1.442695, %v2635_v59  ;;  %v2377_v4 = vmul.f32 %v2117_v1, %v2117_v1  ;;  %v2376_v5 = vmul.f32 %v2116_v60, %v2116_v60  ;;  %v621_v59 = vmul.f32 20.0, %v361_v48  ;;  %v363_v63 = vld [vmem:[%s4177_s15 + $0x6c0] sm:$0xff]  ;;  %v370_v48 = vld [vmem:[%s4177_s15 + $0x6f8] sm:$0xff] }
 0x1ac   : > { %3407 = vst.msk [vmem:[%s4275_s20 + $0x420] sm:$0xff] %vm3274_vm0, %v3879_v0  ;;  %v3034_v6 = vmul.f32 1.442695, %v2634_v2  ;;  %v1396_v8 = vpop.permute.xlu1 %1395  ;;  %v1391_v7 = vpop.permute.xlu0 %1390 }
 0x1ad   : > { %3892 = vpow2.f32 %v3036_v3  ;;  %v2637_v11 = vsub.f32 0.0, %v2377_v4  ;;  %v2636_v12 = vsub.f32 0.0, %v2376_v5  ;;  %v2119_v14 = vsub.f32 %v1396_v8, %v4826_v13  ;;  %1705 = vperm.xlu1 %3611, %v614_v57   ;;  %1700 = vperm.xlu0 %3610, %v613_v58  }
 0x1ae   : > { %v3881_v17 = vpop.eup %3880  ;;  %3894 = vpow2.f32 %v3034_v6  ;;  %v2118_v18 = vsub.f32 %v1391_v7, %v4826_v13  ;;  %v622_v58 = vmul.f32 20.0, %v362_v47 }
 0x1af   : > { %v3883_v19 = vpop.eup %3882  ;;  %3410 = vst.msk [vmem:[%s4275_s20 + $0x438] sm:$0xff] %vm3274_vm0, %v3881_v17  ;;  %v3040_v20 = vmul.f32 1.442695, %v2637_v11  ;;  %v3038_v21 = vmul.f32 1.442695, %v2636_v12  ;;  %v2379_v22 = vmul.f32 %v2119_v14, %v2119_v14  ;;  %v623_v11 = vmul.f32 20.0, %v363_v63 }
 0x1b0   : > { %3409 = vst.msk [vmem:[%s4275_s20 + $0x430] sm:$0xff] %vm3274_vm0, %v3883_v19  ;;  %v2378_v23 = vmul.f32 %v2118_v18, %v2118_v18  ;;  %v1406_v24 = vpop.permute.xlu1 %1405  ;;  %v1401_v25 = vpop.permute.xlu0 %1400  ;;  %v365_v17 = vld [vmem:[%s4177_s15 + $0x6d0] sm:$0xff]  ;;  %v372_v63 = vld [vmem:[%s4177_s15 + $0x708] sm:$0xff] }
 0x1b1   : > { %3896 = vpow2.f32 %v3040_v20  ;;  %v2639_v28 = vsub.f32 0.0, %v2379_v22  ;;  %v2121_v29 = vsub.f32 %v1406_v24, %v4826_v13  ;;  %v2120_v30 = vsub.f32 %v1401_v25, %v4826_v13  ;;  %1715 = vperm.xlu1 %3611, %v616_v9   ;;  %1710 = vperm.xlu0 %3610, %v615_v10  }
 0x1b2   : > { %v3885_v33 = vpop.eup %3884  ;;  %3898 = vpow2.f32 %v3038_v21  ;;  %v2638_v34 = vsub.f32 0.0, %v2378_v23  ;;  %v624_v10 = vmul.f32 20.0, %v364_v62 }
 0x1b3   : > { %v3887_v35 = vpop.eup %3886  ;;  %3412 = vst.msk [vmem:[%s4275_s20 + $0x448] sm:$0xff] %vm3274_vm0, %v3885_v33  ;;  %v3044_v36 = vmul.f32 1.442695, %v2639_v28  ;;  %v2381_v37 = vmul.f32 %v2121_v29, %v2121_v29  ;;  %v2380_v38 = vmul.f32 %v2120_v30, %v2120_v30  ;;  %v625_v28 = vmul.f32 20.0, %v365_v17  ;;  %v367_v33 = vld [vmem:[%s4177_s15 + $0x6e0] sm:$0xff]  ;;  %v374_v17 = vld [vmem:[%s4177_s15 + $0x718] sm:$0xff] }
 0x1b4   : > { %3411 = vst.msk [vmem:[%s4275_s20 + $0x440] sm:$0xff] %vm3274_vm0, %v3887_v35  ;;  %v3042_v39 = vmul.f32 1.442695, %v2638_v34  ;;  %v1416_v40 = vpop.permute.xlu1 %1415  ;;  %v1411_v41 = vpop.permute.xlu0 %1410 }
 0x1b5   : > { %3900 = vpow2.f32 %v3044_v36  ;;  %v2641_v44 = vsub.f32 0.0, %v2381_v37  ;;  %v2640_v45 = vsub.f32 0.0, %v2380_v38  ;;  %v2123_v46 = vsub.f32 %v1416_v40, %v4826_v13  ;;  %1725 = vperm.xlu1 %3611, %v618_v26   ;;  %1720 = vperm.xlu0 %3610, %v617_v27  }
 0x1b6   : > { %v3889_v49 = vpop.eup %3888  ;;  %3902 = vpow2.f32 %v3042_v39  ;;  %v2122_v50 = vsub.f32 %v1411_v41, %v4826_v13  ;;  %v626_v27 = vmul.f32 20.0, %v366_v16 }
 0x1b7   : > { %v3891_v51 = vpop.eup %3890  ;;  %3414 = vst.msk [vmem:[%s4275_s20 + $0x458] sm:$0xff] %vm3274_vm0, %v3889_v49  ;;  %v3048_v52 = vmul.f32 1.442695, %v2641_v44  ;;  %v3046_v53 = vmul.f32 1.442695, %v2640_v45  ;;  %v2383_v54 = vmul.f32 %v2123_v46, %v2123_v46  ;;  %v627_v44 = vmul.f32 20.0, %v367_v33 }
 0x1b8   : > { %3413 = vst.msk [vmem:[%s4275_s20 + $0x450] sm:$0xff] %vm3274_vm0, %v3891_v51  ;;  %v2382_v55 = vmul.f32 %v2122_v50, %v2122_v50  ;;  %v1426_v56 = vpop.permute.xlu1 %1425  ;;  %v1421_v57 = vpop.permute.xlu0 %1420  ;;  %v369_v49 = vld [vmem:[%s4177_s15 + $0x6f0] sm:$0xff]  ;;  %v376_v33 = vld [vmem:[%s4177_s15 + $0x728] sm:$0xff] }
 0x1b9   : > { %3904 = vpow2.f32 %v3048_v52  ;;  %v2643_v1 = vsub.f32 0.0, %v2383_v54  ;;  %v2125_v60 = vsub.f32 %v1426_v56, %v4826_v13  ;;  %v2124_v61 = vsub.f32 %v1421_v57, %v4826_v13  ;;  %1735 = vperm.xlu1 %3611, %v620_v42   ;;  %1730 = vperm.xlu0 %3610, %v619_v43  }
 0x1ba   : > { %v3893_v2 = vpop.eup %3892  ;;  %3906 = vpow2.f32 %v3046_v53  ;;  %v2642_v0 = vsub.f32 0.0, %v2382_v55  ;;  %v628_v43 = vmul.f32 20.0, %v368_v32 }
 0x1bb   : > { %v3895_v3 = vpop.eup %3894  ;;  %3416 = vst.msk [vmem:[%s4275_s20 + $0x468] sm:$0xff] %vm3274_vm0, %v3893_v2  ;;  %v3052_v4 = vmul.f32 1.442695, %v2643_v1  ;;  %v2385_v5 = vmul.f32 %v2125_v60, %v2125_v60  ;;  %v2384_v6 = vmul.f32 %v2124_v61, %v2124_v61  ;;  %v629_v1 = vmul.f32 20.0, %v369_v49  ;;  %v371_v2 = vld [vmem:[%s4177_s15 + $0x700] sm:$0xff]  ;;  %v378_v49 = vld [vmem:[%s4177_s15 + $0x738] sm:$0xff] }
 0x1bc   : > { %3415 = vst.msk [vmem:[%s4275_s20 + $0x460] sm:$0xff] %vm3274_vm0, %v3895_v3  ;;  %v3050_v8 = vmul.f32 1.442695, %v2642_v0  ;;  %v1436_v7 = vpop.permute.xlu1 %1435  ;;  %v1431_v9 = vpop.permute.xlu0 %1430 }
 0x1bd   : > { %3908 = vpow2.f32 %v3052_v4  ;;  %v2645_v12 = vsub.f32 0.0, %v2385_v5  ;;  %v2644_v14 = vsub.f32 0.0, %v2384_v6  ;;  %v2127_v15 = vsub.f32 %v1436_v7, %v4826_v13  ;;  %1745 = vperm.xlu1 %3611, %v622_v58   ;;  %1740 = vperm.xlu0 %3610, %v621_v59  }
 0x1be   : > { %v3897_v18 = vpop.eup %3896  ;;  %3910 = vpow2.f32 %v3050_v8  ;;  %v2126_v19 = vsub.f32 %v1431_v9, %v4826_v13  ;;  %v630_v59 = vmul.f32 20.0, %v370_v48 }
 0x1bf   : > { %v3899_v20 = vpop.eup %3898  ;;  %3418 = vst.msk [vmem:[%s4275_s20 + $0x478] sm:$0xff] %vm3274_vm0, %v3897_v18  ;;  %v3056_v21 = vmul.f32 1.442695, %v2645_v12  ;;  %v3054_v22 = vmul.f32 1.442695, %v2644_v14  ;;  %v2387_v23 = vmul.f32 %v2127_v15, %v2127_v15  ;;  %v631_v12 = vmul.f32 20.0, %v371_v2 }
 0x1c0   : > { %3417 = vst.msk [vmem:[%s4275_s20 + $0x470] sm:$0xff] %vm3274_vm0, %v3899_v20  ;;  %v2386_v24 = vmul.f32 %v2126_v19, %v2126_v19  ;;  %v1446_v25 = vpop.permute.xlu1 %1445  ;;  %v1441_v26 = vpop.permute.xlu0 %1440  ;;  %v373_v18 = vld [vmem:[%s4177_s15 + $0x710] sm:$0xff]  ;;  %v380_v2 = vld [vmem:[%s4177_s15 + $0x748] sm:$0xff] }
 0x1c1   : > { %3912 = vpow2.f32 %v3056_v21  ;;  %v2647_v29 = vsub.f32 0.0, %v2387_v23  ;;  %v2129_v30 = vsub.f32 %v1446_v25, %v4826_v13  ;;  %v2128_v31 = vsub.f32 %v1441_v26, %v4826_v13  ;;  %1755 = vperm.xlu1 %3611, %v624_v10   ;;  %1750 = vperm.xlu0 %3610, %v623_v11  }
 0x1c2   : > { %v3901_v34 = vpop.eup %3900  ;;  %3914 = vpow2.f32 %v3054_v22  ;;  %v2646_v35 = vsub.f32 0.0, %v2386_v24  ;;  %v632_v11 = vmul.f32 20.0, %v372_v63 }
 0x1c3   : > { %v3903_v36 = vpop.eup %3902  ;;  %3420 = vst.msk [vmem:[%s4275_s20 + $0x488] sm:$0xff] %vm3274_vm0, %v3901_v34  ;;  %v3060_v37 = vmul.f32 1.442695, %v2647_v29  ;;  %v2389_v38 = vmul.f32 %v2129_v30, %v2129_v30  ;;  %v2388_v39 = vmul.f32 %v2128_v31, %v2128_v31  ;;  %v633_v29 = vmul.f32 20.0, %v373_v18  ;;  %v375_v34 = vld [vmem:[%s4177_s15 + $0x720] sm:$0xff]  ;;  %v382_v18 = vld [vmem:[%s4177_s15 + $0x758] sm:$0xff] }
 0x1c4   : > { %3419 = vst.msk [vmem:[%s4275_s20 + $0x480] sm:$0xff] %vm3274_vm0, %v3903_v36  ;;  %v3058_v40 = vmul.f32 1.442695, %v2646_v35  ;;  %v1456_v41 = vpop.permute.xlu1 %1455  ;;  %v1451_v42 = vpop.permute.xlu0 %1450 }
 0x1c5   : > { %3916 = vpow2.f32 %v3060_v37  ;;  %v2649_v45 = vsub.f32 0.0, %v2389_v38  ;;  %v2648_v46 = vsub.f32 0.0, %v2388_v39  ;;  %v2131_v47 = vsub.f32 %v1456_v41, %v4826_v13  ;;  %1765 = vperm.xlu1 %3611, %v626_v27   ;;  %1760 = vperm.xlu0 %3610, %v625_v28  }
 0x1c6   : > { %v3905_v50 = vpop.eup %3904  ;;  %3918 = vpow2.f32 %v3058_v40  ;;  %v2130_v51 = vsub.f32 %v1451_v42, %v4826_v13  ;;  %v634_v28 = vmul.f32 20.0, %v374_v17 }
 0x1c7   : > { %v3907_v52 = vpop.eup %3906  ;;  %3422 = vst.msk [vmem:[%s4275_s20 + $0x498] sm:$0xff] %vm3274_vm0, %v3905_v50  ;;  %v3064_v53 = vmul.f32 1.442695, %v2649_v45  ;;  %v3062_v54 = vmul.f32 1.442695, %v2648_v46  ;;  %v2391_v55 = vmul.f32 %v2131_v47, %v2131_v47  ;;  %v635_v45 = vmul.f32 20.0, %v375_v34 }
 0x1c8   : > { %3421 = vst.msk [vmem:[%s4275_s20 + $0x490] sm:$0xff] %vm3274_vm0, %v3907_v52  ;;  %v2390_v56 = vmul.f32 %v2130_v51, %v2130_v51  ;;  %v1466_v57 = vpop.permute.xlu1 %1465  ;;  %v1461_v58 = vpop.permute.xlu0 %1460  ;;  %v377_v50 = vld [vmem:[%s4177_s15 + $0x730] sm:$0xff]  ;;  %v384_v34 = vld [vmem:[%s4177_s15 + $0x768] sm:$0xff] }
 0x1c9   : > { %3920 = vpow2.f32 %v3064_v53  ;;  %v2651_v60 = vsub.f32 0.0, %v2391_v55  ;;  %v2133_v61 = vsub.f32 %v1466_v57, %v4826_v13  ;;  %v2132_v62 = vsub.f32 %v1461_v58, %v4826_v13  ;;  %1775 = vperm.xlu1 %3611, %v628_v43   ;;  %1770 = vperm.xlu0 %3610, %v627_v44  }
 0x1ca   : > { %v3909_v0 = vpop.eup %3908  ;;  %3922 = vpow2.f32 %v3062_v54  ;;  %v2650_v3 = vsub.f32 0.0, %v2390_v56  ;;  %v636_v44 = vmul.f32 20.0, %v376_v33 }
 0x1cb   : > { %v3911_v4 = vpop.eup %3910  ;;  %3424 = vst.msk [vmem:[%s4275_s20 + $0x4a8] sm:$0xff] %vm3274_vm0, %v3909_v0  ;;  %v3068_v5 = vmul.f32 1.442695, %v2651_v60  ;;  %v2393_v6 = vmul.f32 %v2133_v61, %v2133_v61  ;;  %v2392_v8 = vmul.f32 %v2132_v62, %v2132_v62  ;;  %v637_v60 = vmul.f32 20.0, %v377_v50  ;;  %v379_v0 = vld [vmem:[%s4177_s15 + $0x740] sm:$0xff]  ;;  %v386_v50 = vld [vmem:[%s4177_s15 + $0x778] sm:$0xff] }
 0x1cc   : > { %3423 = vst.msk [vmem:[%s4275_s20 + $0x4a0] sm:$0xff] %vm3274_vm0, %v3911_v4  ;;  %v3066_v7 = vmul.f32 1.442695, %v2650_v3  ;;  %v1476_v9 = vpop.permute.xlu1 %1475  ;;  %v1471_v10 = vpop.permute.xlu0 %1470 }
 0x1cd   : > { %3924 = vpow2.f32 %v3068_v5  ;;  %v2653_v14 = vsub.f32 0.0, %v2393_v6  ;;  %v2652_v15 = vsub.f32 0.0, %v2392_v8  ;;  %v2135_v16 = vsub.f32 %v1476_v9, %v4826_v13  ;;  %1785 = vperm.xlu1 %3611, %v630_v59   ;;  %1780 = vperm.xlu0 %3610, %v629_v1  }
 0x1ce   : > { %v3913_v19 = vpop.eup %3912  ;;  %3926 = vpow2.f32 %v3066_v7  ;;  %v2134_v20 = vsub.f32 %v1471_v10, %v4826_v13  ;;  %v638_v1 = vmul.f32 20.0, %v378_v49 }
 0x1cf   : > { %v3915_v21 = vpop.eup %3914  ;;  %3426 = vst.msk [vmem:[%s4275_s20 + $0x4b8] sm:$0xff] %vm3274_vm0, %v3913_v19  ;;  %v3072_v22 = vmul.f32 1.442695, %v2653_v14  ;;  %v3070_v23 = vmul.f32 1.442695, %v2652_v15  ;;  %v2395_v24 = vmul.f32 %v2135_v16, %v2135_v16  ;;  %v639_v14 = vmul.f32 20.0, %v379_v0 }
 0x1d0   : > { %3425 = vst.msk [vmem:[%s4275_s20 + $0x4b0] sm:$0xff] %vm3274_vm0, %v3915_v21  ;;  %v2394_v25 = vmul.f32 %v2134_v20, %v2134_v20  ;;  %v1486_v26 = vpop.permute.xlu1 %1485  ;;  %v1481_v27 = vpop.permute.xlu0 %1480  ;;  %v381_v19 = vld [vmem:[%s4177_s15 + $0x750] sm:$0xff]  ;;  %v388_v0 = vld [vmem:[%s4177_s15 + $0x788] sm:$0xff] }
 0x1d1   : > { %3928 = vpow2.f32 %v3072_v22  ;;  %v2655_v30 = vsub.f32 0.0, %v2395_v24  ;;  %v2137_v31 = vsub.f32 %v1486_v26, %v4826_v13  ;;  %v2136_v32 = vsub.f32 %v1481_v27, %v4826_v13  ;;  %1795 = vperm.xlu1 %3611, %v632_v11   ;;  %1790 = vperm.xlu0 %3610, %v631_v12  }
 0x1d2   : > { %v3917_v35 = vpop.eup %3916  ;;  %3930 = vpow2.f32 %v3070_v23  ;;  %v2654_v36 = vsub.f32 0.0, %v2394_v25  ;;  %v640_v12 = vmul.f32 20.0, %v380_v2 }
 0x1d3   : > { %v3919_v37 = vpop.eup %3918  ;;  %3428 = vst.msk [vmem:[%s4275_s20 + $0x4c8] sm:$0xff] %vm3274_vm0, %v3917_v35  ;;  %v3076_v38 = vmul.f32 1.442695, %v2655_v30  ;;  %v2397_v39 = vmul.f32 %v2137_v31, %v2137_v31  ;;  %v2396_v40 = vmul.f32 %v2136_v32, %v2136_v32  ;;  %v641_v30 = vmul.f32 20.0, %v381_v19  ;;  %v383_v35 = vld [vmem:[%s4177_s15 + $0x760] sm:$0xff]  ;;  %v390_v19 = vld [vmem:[%s4177_s15 + $0x798] sm:$0xff] }
 0x1d4   : > { %3427 = vst.msk [vmem:[%s4275_s20 + $0x4c0] sm:$0xff] %vm3274_vm0, %v3919_v37  ;;  %v3074_v41 = vmul.f32 1.442695, %v2654_v36  ;;  %v1496_v42 = vpop.permute.xlu1 %1495  ;;  %v1491_v43 = vpop.permute.xlu0 %1490 }
 0x1d5   : > { %3932 = vpow2.f32 %v3076_v38  ;;  %v2657_v46 = vsub.f32 0.0, %v2397_v39  ;;  %v2656_v47 = vsub.f32 0.0, %v2396_v40  ;;  %v2139_v48 = vsub.f32 %v1496_v42, %v4826_v13  ;;  %1805 = vperm.xlu1 %3611, %v634_v28   ;;  %1800 = vperm.xlu0 %3610, %v633_v29  }
 0x1d6   : > { %v3921_v51 = vpop.eup %3920  ;;  %3934 = vpow2.f32 %v3074_v41  ;;  %v2138_v52 = vsub.f32 %v1491_v43, %v4826_v13  ;;  %v642_v29 = vmul.f32 20.0, %v382_v18 }
 0x1d7   : > { %v3923_v53 = vpop.eup %3922  ;;  %3430 = vst.msk [vmem:[%s4275_s20 + $0x4d8] sm:$0xff] %vm3274_vm0, %v3921_v51  ;;  %v3080_v54 = vmul.f32 1.442695, %v2657_v46  ;;  %v3078_v55 = vmul.f32 1.442695, %v2656_v47  ;;  %v2399_v56 = vmul.f32 %v2139_v48, %v2139_v48  ;;  %v643_v46 = vmul.f32 20.0, %v383_v35 }
 0x1d8   : > { %3429 = vst.msk [vmem:[%s4275_s20 + $0x4d0] sm:$0xff] %vm3274_vm0, %v3923_v53  ;;  %v2398_v57 = vmul.f32 %v2138_v52, %v2138_v52  ;;  %v1506_v58 = vpop.permute.xlu1 %1505  ;;  %v1501_v59 = vpop.permute.xlu0 %1500  ;;  %v385_v51 = vld [vmem:[%s4177_s15 + $0x770] sm:$0xff]  ;;  %v392_v35 = vld [vmem:[%s4177_s15 + $0x7a8] sm:$0xff] }
 0x1d9   : > { %3936 = vpow2.f32 %v3080_v54  ;;  %v2659_v61 = vsub.f32 0.0, %v2399_v56  ;;  %v2141_v62 = vsub.f32 %v1506_v58, %v4826_v13  ;;  %v2140_v63 = vsub.f32 %v1501_v59, %v4826_v13  ;;  %1815 = vperm.xlu1 %3611, %v636_v44   ;;  %1810 = vperm.xlu0 %3610, %v635_v45  }
 0x1da   : > { %v3925_v3 = vpop.eup %3924  ;;  %3938 = vpow2.f32 %v3078_v55  ;;  %v2658_v4 = vsub.f32 0.0, %v2398_v57  ;;  %v644_v45 = vmul.f32 20.0, %v384_v34 }
 0x1db   : > { %v3927_v5 = vpop.eup %3926  ;;  %3432 = vst.msk [vmem:[%s4275_s20 + $0x4e8] sm:$0xff] %vm3274_vm0, %v3925_v3  ;;  %v3084_v6 = vmul.f32 1.442695, %v2659_v61  ;;  %v2401_v8 = vmul.f32 %v2141_v62, %v2141_v62  ;;  %v2400_v7 = vmul.f32 %v2140_v63, %v2140_v63  ;;  %v645_v61 = vmul.f32 20.0, %v385_v51  ;;  %v387_v3 = vld [vmem:[%s4177_s15 + $0x780] sm:$0xff]  ;;  %v394_v51 = vld [vmem:[%s4177_s15 + $0x7b8] sm:$0xff] }
 0x1dc   : > { %3431 = vst.msk [vmem:[%s4275_s20 + $0x4e0] sm:$0xff] %vm3274_vm0, %v3927_v5  ;;  %v3082_v9 = vmul.f32 1.442695, %v2658_v4  ;;  %v1516_v10 = vpop.permute.xlu1 %1515  ;;  %v1511_v11 = vpop.permute.xlu0 %1510 }
 0x1dd   : > { %3940 = vpow2.f32 %v3084_v6  ;;  %v2661_v15 = vsub.f32 0.0, %v2401_v8  ;;  %v2660_v16 = vsub.f32 0.0, %v2400_v7  ;;  %v2143_v17 = vsub.f32 %v1516_v10, %v4826_v13  ;;  %1825 = vperm.xlu1 %3611, %v638_v1   ;;  %1820 = vperm.xlu0 %3610, %v637_v60  }
 0x1de   : > { %v3929_v20 = vpop.eup %3928  ;;  %3942 = vpow2.f32 %v3082_v9  ;;  %v2142_v21 = vsub.f32 %v1511_v11, %v4826_v13  ;;  %v646_v60 = vmul.f32 20.0, %v386_v50 }
 0x1df   : > { %v3931_v22 = vpop.eup %3930  ;;  %3434 = vst.msk [vmem:[%s4275_s20 + $0x4f8] sm:$0xff] %vm3274_vm0, %v3929_v20  ;;  %v3088_v23 = vmul.f32 1.442695, %v2661_v15  ;;  %v3086_v24 = vmul.f32 1.442695, %v2660_v16  ;;  %v2403_v25 = vmul.f32 %v2143_v17, %v2143_v17  ;;  %v647_v15 = vmul.f32 20.0, %v387_v3 }
 0x1e0   : > { %3433 = vst.msk [vmem:[%s4275_s20 + $0x4f0] sm:$0xff] %vm3274_vm0, %v3931_v22  ;;  %v2402_v26 = vmul.f32 %v2142_v21, %v2142_v21  ;;  %v1526_v27 = vpop.permute.xlu1 %1525  ;;  %v1521_v28 = vpop.permute.xlu0 %1520  ;;  %v389_v20 = vld [vmem:[%s4177_s15 + $0x790] sm:$0xff]  ;;  %v396_v3 = vld [vmem:[%s4177_s15 + $0x7c8] sm:$0xff] }
 0x1e1   : > { %3944 = vpow2.f32 %v3088_v23  ;;  %v2663_v31 = vsub.f32 0.0, %v2403_v25  ;;  %v2145_v32 = vsub.f32 %v1526_v27, %v4826_v13  ;;  %v2144_v33 = vsub.f32 %v1521_v28, %v4826_v13  ;;  %1835 = vperm.xlu1 %3611, %v640_v12   ;;  %1830 = vperm.xlu0 %3610, %v639_v14  }
 0x1e2   : > { %v3933_v36 = vpop.eup %3932  ;;  %3946 = vpow2.f32 %v3086_v24  ;;  %v2662_v37 = vsub.f32 0.0, %v2402_v26  ;;  %v648_v14 = vmul.f32 20.0, %v388_v0 }
 0x1e3   : > { %v3935_v38 = vpop.eup %3934  ;;  %3436 = vst.msk [vmem:[%s4275_s20 + $0x508] sm:$0xff] %vm3274_vm0, %v3933_v36  ;;  %v3092_v39 = vmul.f32 1.442695, %v2663_v31  ;;  %v2405_v40 = vmul.f32 %v2145_v32, %v2145_v32  ;;  %v2404_v41 = vmul.f32 %v2144_v33, %v2144_v33  ;;  %v649_v31 = vmul.f32 20.0, %v389_v20  ;;  %v391_v36 = vld [vmem:[%s4177_s15 + $0x7a0] sm:$0xff]  ;;  %v398_v20 = vld [vmem:[%s4177_s15 + $0x7d8] sm:$0xff] }
 0x1e4   : > { %3435 = vst.msk [vmem:[%s4275_s20 + $0x500] sm:$0xff] %vm3274_vm0, %v3935_v38  ;;  %v3090_v42 = vmul.f32 1.442695, %v2662_v37  ;;  %v1536_v43 = vpop.permute.xlu1 %1535  ;;  %v1531_v44 = vpop.permute.xlu0 %1530 }
 0x1e5   : > { %3948 = vpow2.f32 %v3092_v39  ;;  %v2665_v47 = vsub.f32 0.0, %v2405_v40  ;;  %v2664_v48 = vsub.f32 0.0, %v2404_v41  ;;  %v2147_v49 = vsub.f32 %v1536_v43, %v4826_v13  ;;  %1845 = vperm.xlu1 %3611, %v642_v29   ;;  %1840 = vperm.xlu0 %3610, %v641_v30  }
 0x1e6   : > { %v3937_v52 = vpop.eup %3936  ;;  %3950 = vpow2.f32 %v3090_v42  ;;  %v2146_v53 = vsub.f32 %v1531_v44, %v4826_v13  ;;  %v650_v30 = vmul.f32 20.0, %v390_v19 }
 0x1e7   : > { %v3939_v54 = vpop.eup %3938  ;;  %3438 = vst.msk [vmem:[%s4275_s20 + $0x518] sm:$0xff] %vm3274_vm0, %v3937_v52  ;;  %v3096_v55 = vmul.f32 1.442695, %v2665_v47  ;;  %v3094_v56 = vmul.f32 1.442695, %v2664_v48  ;;  %v2407_v57 = vmul.f32 %v2147_v49, %v2147_v49  ;;  %v651_v47 = vmul.f32 20.0, %v391_v36 }
 0x1e8   : > { %3437 = vst.msk [vmem:[%s4275_s20 + $0x510] sm:$0xff] %vm3274_vm0, %v3939_v54  ;;  %v2406_v58 = vmul.f32 %v2146_v53, %v2146_v53  ;;  %v1546_v59 = vpop.permute.xlu1 %1545  ;;  %v1541_v1 = vpop.permute.xlu0 %1540  ;;  %v393_v52 = vld [vmem:[%s4177_s15 + $0x7b0] sm:$0xff]  ;;  %v400_v36 = vld [vmem:[%s4177_s15 + $0x7e8] sm:$0xff] }
 0x1e9   : > { %3952 = vpow2.f32 %v3096_v55  ;;  %v2667_v62 = vsub.f32 0.0, %v2407_v57  ;;  %v2149_v63 = vsub.f32 %v1546_v59, %v4826_v13  ;;  %v2148_v2 = vsub.f32 %v1541_v1, %v4826_v13  ;;  %1855 = vperm.xlu1 %3611, %v644_v45   ;;  %1850 = vperm.xlu0 %3610, %v643_v46  }
 0x1ea   : > { %v3941_v4 = vpop.eup %3940  ;;  %3954 = vpow2.f32 %v3094_v56  ;;  %v2666_v5 = vsub.f32 0.0, %v2406_v58  ;;  %v652_v46 = vmul.f32 20.0, %v392_v35 }
 0x1eb   : > { %v3943_v6 = vpop.eup %3942  ;;  %3440 = vst.msk [vmem:[%s4275_s20 + $0x528] sm:$0xff] %vm3274_vm0, %v3941_v4  ;;  %v3100_v8 = vmul.f32 1.442695, %v2667_v62  ;;  %v2409_v7 = vmul.f32 %v2149_v63, %v2149_v63  ;;  %v2408_v9 = vmul.f32 %v2148_v2, %v2148_v2  ;;  %v653_v62 = vmul.f32 20.0, %v393_v52  ;;  %v395_v4 = vld [vmem:[%s4177_s15 + $0x7c0] sm:$0xff]  ;;  %v402_v52 = vld [vmem:[%s4177_s15 + $0x7f8] sm:$0xff] }
 0x1ec   : > { %3439 = vst.msk [vmem:[%s4275_s20 + $0x520] sm:$0xff] %vm3274_vm0, %v3943_v6  ;;  %v3098_v10 = vmul.f32 1.442695, %v2666_v5  ;;  %v1556_v11 = vpop.permute.xlu1 %1555  ;;  %v1551_v12 = vpop.permute.xlu0 %1550 }
 0x1ed   : > { %3956 = vpow2.f32 %v3100_v8  ;;  %v2669_v16 = vsub.f32 0.0, %v2409_v7  ;;  %v2668_v17 = vsub.f32 0.0, %v2408_v9  ;;  %v2151_v18 = vsub.f32 %v1556_v11, %v4826_v13  ;;  %1865 = vperm.xlu1 %3611, %v646_v60   ;;  %1860 = vperm.xlu0 %3610, %v645_v61  }
 0x1ee   : > { %v3945_v21 = vpop.eup %3944  ;;  %3958 = vpow2.f32 %v3098_v10  ;;  %v2150_v22 = vsub.f32 %v1551_v12, %v4826_v13  ;;  %v654_v61 = vmul.f32 20.0, %v394_v51 }
 0x1ef   : > { %v3947_v23 = vpop.eup %3946  ;;  %3442 = vst.msk [vmem:[%s4275_s20 + $0x538] sm:$0xff] %vm3274_vm0, %v3945_v21  ;;  %v3104_v24 = vmul.f32 1.442695, %v2669_v16  ;;  %v3102_v25 = vmul.f32 1.442695, %v2668_v17  ;;  %v2411_v26 = vmul.f32 %v2151_v18, %v2151_v18  ;;  %v655_v16 = vmul.f32 20.0, %v395_v4 }
 0x1f0   : > { %3441 = vst.msk [vmem:[%s4275_s20 + $0x530] sm:$0xff] %vm3274_vm0, %v3947_v23  ;;  %v2410_v27 = vmul.f32 %v2150_v22, %v2150_v22  ;;  %v1566_v28 = vpop.permute.xlu1 %1565  ;;  %v1561_v29 = vpop.permute.xlu0 %1560  ;;  %v397_v21 = vld [vmem:[%s4177_s15 + $0x7d0] sm:$0xff]  ;;  %v404_v4 = vld [vmem:[%s4177_s15 + $0x808] sm:$0xff] }
 0x1f1   : > { %3960 = vpow2.f32 %v3104_v24  ;;  %v2671_v32 = vsub.f32 0.0, %v2411_v26  ;;  %v2153_v33 = vsub.f32 %v1566_v28, %v4826_v13  ;;  %v2152_v34 = vsub.f32 %v1561_v29, %v4826_v13  ;;  %1875 = vperm.xlu1 %3611, %v648_v14   ;;  %1870 = vperm.xlu0 %3610, %v647_v15  }
 0x1f2   : > { %v3949_v37 = vpop.eup %3948  ;;  %3962 = vpow2.f32 %v3102_v25  ;;  %v2670_v38 = vsub.f32 0.0, %v2410_v27  ;;  %v656_v15 = vmul.f32 20.0, %v396_v3 }
 0x1f3   : > { %v3951_v39 = vpop.eup %3950  ;;  %3444 = vst.msk [vmem:[%s4275_s20 + $0x548] sm:$0xff] %vm3274_vm0, %v3949_v37  ;;  %v3108_v40 = vmul.f32 1.442695, %v2671_v32  ;;  %v2413_v41 = vmul.f32 %v2153_v33, %v2153_v33  ;;  %v2412_v42 = vmul.f32 %v2152_v34, %v2152_v34  ;;  %v657_v32 = vmul.f32 20.0, %v397_v21  ;;  %v399_v37 = vld [vmem:[%s4177_s15 + $0x7e0] sm:$0xff]  ;;  %v406_v21 = vld [vmem:[%s4177_s15 + $0x818] sm:$0xff] }
 0x1f4   : > { %3443 = vst.msk [vmem:[%s4275_s20 + $0x540] sm:$0xff] %vm3274_vm0, %v3951_v39  ;;  %v3106_v43 = vmul.f32 1.442695, %v2670_v38  ;;  %v1576_v44 = vpop.permute.xlu1 %1575  ;;  %v1571_v45 = vpop.permute.xlu0 %1570 }
 0x1f5   : > { %3964 = vpow2.f32 %v3108_v40  ;;  %v2673_v48 = vsub.f32 0.0, %v2413_v41  ;;  %v2672_v49 = vsub.f32 0.0, %v2412_v42  ;;  %v2155_v50 = vsub.f32 %v1576_v44, %v4826_v13  ;;  %1885 = vperm.xlu1 %3611, %v650_v30   ;;  %1880 = vperm.xlu0 %3610, %v649_v31  }
 0x1f6   : > { %v3953_v53 = vpop.eup %3952  ;;  %3966 = vpow2.f32 %v3106_v43  ;;  %v2154_v54 = vsub.f32 %v1571_v45, %v4826_v13  ;;  %v658_v31 = vmul.f32 20.0, %v398_v20 }
 0x1f7   : > { %v3955_v55 = vpop.eup %3954  ;;  %3446 = vst.msk [vmem:[%s4275_s20 + $0x558] sm:$0xff] %vm3274_vm0, %v3953_v53  ;;  %v3112_v56 = vmul.f32 1.442695, %v2673_v48  ;;  %v3110_v57 = vmul.f32 1.442695, %v2672_v49  ;;  %v2415_v58 = vmul.f32 %v2155_v50, %v2155_v50  ;;  %v659_v48 = vmul.f32 20.0, %v399_v37 }
 0x1f8   : > { %3445 = vst.msk [vmem:[%s4275_s20 + $0x550] sm:$0xff] %vm3274_vm0, %v3955_v55  ;;  %v2414_v59 = vmul.f32 %v2154_v54, %v2154_v54  ;;  %v1586_v1 = vpop.permute.xlu1 %1585  ;;  %v1581_v60 = vpop.permute.xlu0 %1580  ;;  %v401_v53 = vld [vmem:[%s4177_s15 + $0x7f0] sm:$0xff] }
 0x1f9   : > { %3968 = vpow2.f32 %v3112_v56  ;;  %v2675_v63 = vsub.f32 0.0, %v2415_v58  ;;  %v2157_v2 = vsub.f32 %v1586_v1, %v4826_v13  ;;  %v2156_v0 = vsub.f32 %v1581_v60, %v4826_v13  ;;  %1895 = vperm.xlu1 %3611, %v652_v46   ;;  %1890 = vperm.xlu0 %3610, %v651_v47  }
 0x1fa   : > { %v3957_v5 = vpop.eup %3956  ;;  %3970 = vpow2.f32 %v3110_v57  ;;  %v2674_v6 = vsub.f32 0.0, %v2414_v59  ;;  %v660_v47 = vmul.f32 20.0, %v400_v36 }
 0x1fb   : > { %v3959_v8 = vpop.eup %3958  ;;  %3448 = vst.msk [vmem:[%s4275_s20 + $0x568] sm:$0xff] %vm3274_vm0, %v3957_v5  ;;  %v3116_v7 = vmul.f32 1.442695, %v2675_v63  ;;  %v2417_v9 = vmul.f32 %v2157_v2, %v2157_v2  ;;  %v2416_v10 = vmul.f32 %v2156_v0, %v2156_v0  ;;  %v661_v63 = vmul.f32 20.0, %v401_v53  ;;  %v403_v5 = vld [vmem:[%s4177_s15 + $0x800] sm:$0xff] }
 0x1fc   : > { %3447 = vst.msk [vmem:[%s4275_s20 + $0x560] sm:$0xff] %vm3274_vm0, %v3959_v8  ;;  %v3114_v11 = vmul.f32 1.442695, %v2674_v6  ;;  %v1596_v12 = vpop.permute.xlu1 %1595  ;;  %v1591_v14 = vpop.permute.xlu0 %1590 }
 0x1fd   : > { %3972 = vpow2.f32 %v3116_v7  ;;  %v2677_v17 = vsub.f32 0.0, %v2417_v9  ;;  %v2676_v18 = vsub.f32 0.0, %v2416_v10  ;;  %v2159_v19 = vsub.f32 %v1596_v12, %v4826_v13  ;;  %1905 = vperm.xlu1 %3611, %v654_v61   ;;  %1900 = vperm.xlu0 %3610, %v653_v62  }
 0x1fe   : > { %v3961_v22 = vpop.eup %3960  ;;  %3974 = vpow2.f32 %v3114_v11  ;;  %v2158_v23 = vsub.f32 %v1591_v14, %v4826_v13  ;;  %v662_v62 = vmul.f32 20.0, %v402_v52 }
 0x1ff   : > { %v3963_v24 = vpop.eup %3962  ;;  %3450 = vst.msk [vmem:[%s4275_s20 + $0x578] sm:$0xff] %vm3274_vm0, %v3961_v22  ;;  %v3120_v25 = vmul.f32 1.442695, %v2677_v17  ;;  %v3118_v26 = vmul.f32 1.442695, %v2676_v18  ;;  %v2419_v27 = vmul.f32 %v2159_v19, %v2159_v19  ;;  %v405_v22 = vld [vmem:[%s4177_s15 + $0x810] sm:$0xff] }
 0x200   : > { %3449 = vst.msk [vmem:[%s4275_s20 + $0x570] sm:$0xff] %vm3274_vm0, %v3963_v24  ;;  %v2418_v28 = vmul.f32 %v2158_v23, %v2158_v23  ;;  %v1606_v29 = vpop.permute.xlu1 %1605  ;;  %v1601_v30 = vpop.permute.xlu0 %1600  ;;  %v5023_v19 = vld [vmem:[%s5254_s1] ss:$0 sm:$0xff] }
 0x201   : > { %3976 = vpow2.f32 %v3120_v25  ;;  %v2679_v33 = vsub.f32 0.0, %v2419_v27  ;;  %v2161_v34 = vsub.f32 %v1606_v29, %v4826_v13  ;;  %v2160_v35 = vsub.f32 %v1601_v30, %v4826_v13  ;;  %1915 = vperm.xlu1 %3611, %v656_v15   ;;  %1910 = vperm.xlu0 %3610, %v655_v16  }
 0x202   : > { %v3965_v38 = vpop.eup %3964  ;;  %3978 = vpow2.f32 %v3118_v26  ;;  %v2678_v39 = vsub.f32 0.0, %v2418_v28  ;;  %v664_v15 = vmul.f32 20.0, %v404_v4  ;;  %v663_v16 = vmul.f32 20.0, %v403_v5 }
 0x203   : > { %v3967_v40 = vpop.eup %3966  ;;  %3452 = vst.msk [vmem:[%s4275_s20 + $0x588] sm:$0xff] %vm3274_vm0, %v3965_v38  ;;  %v3124_v41 = vmul.f32 1.442695, %v2679_v33  ;;  %v2421_v42 = vmul.f32 %v2161_v34, %v2161_v34  ;;  %v2420_v43 = vmul.f32 %v2160_v35, %v2160_v35  ;;  %v665_v33 = vmul.f32 20.0, %v405_v22 }
 0x204   : > { %3451 = vst.msk [vmem:[%s4275_s20 + $0x580] sm:$0xff] %vm3274_vm0, %v3967_v40  ;;  %v3122_v44 = vmul.f32 1.442695, %v2678_v39  ;;  %v1616_v45 = vpop.permute.xlu1 %1615  ;;  %v1611_v46 = vpop.permute.xlu0 %1610 }
 0x205   : > { %3980 = vpow2.f32 %v3124_v41  ;;  %v2681_v49 = vsub.f32 0.0, %v2421_v42  ;;  %v2680_v50 = vsub.f32 0.0, %v2420_v43  ;;  %v2163_v51 = vsub.f32 %v1616_v45, %v4826_v13  ;;  %1925 = vperm.xlu1 %3611, %v658_v31   ;;  %1920 = vperm.xlu0 %3610, %v657_v32  }
 0x206   : > { %v3969_v54 = vpop.eup %3968  ;;  %3982 = vpow2.f32 %v3122_v44  ;;  %v2162_v55 = vsub.f32 %v1611_v46, %v4826_v13  ;;  %v666_v32 = vmul.f32 20.0, %v406_v21 }
 0x207   : > { %v3971_v56 = vpop.eup %3970  ;;  %3454 = vst.msk [vmem:[%s4275_s20 + $0x598] sm:$0xff] %vm3274_vm0, %v3969_v54  ;;  %v3128_v57 = vmul.f32 1.442695, %v2681_v49  ;;  %v3126_v58 = vmul.f32 1.442695, %v2680_v50  ;;  %v2423_v59 = vmul.f32 %v2163_v51, %v2163_v51 }
 0x208   : > { %3453 = vst.msk [vmem:[%s4275_s20 + $0x590] sm:$0xff] %vm3274_vm0, %v3971_v56  ;;  %v2422_v1 = vmul.f32 %v2162_v55, %v2162_v55  ;;  %v1626_v60 = vpop.permute.xlu1 %1625  ;;  %v1621_v61 = vpop.permute.xlu0 %1620 }
 0x209   : > { %3984 = vpow2.f32 %v3128_v57  ;;  %v2683_v2 = vsub.f32 0.0, %v2423_v59  ;;  %v2165_v0 = vsub.f32 %v1626_v60, %v4826_v13  ;;  %v2164_v3 = vsub.f32 %v1621_v61, %v4826_v13  ;;  %1935 = vperm.xlu1 %3611, %v660_v47   ;;  %1930 = vperm.xlu0 %3610, %v659_v48  }
 0x20a   : > { %v3973_v6 = vpop.eup %3972  ;;  %3986 = vpow2.f32 %v3126_v58  ;;  %v2682_v8 = vsub.f32 0.0, %v2422_v1 }
 0x20b   : > { %v3975_v7 = vpop.eup %3974  ;;  %3456 = vst.msk [vmem:[%s4275_s20 + $0x5a8] sm:$0xff] %vm3274_vm0, %v3973_v6  ;;  %v3132_v9 = vmul.f32 1.442695, %v2683_v2  ;;  %v2425_v10 = vmul.f32 %v2165_v0, %v2165_v0  ;;  %v2424_v11 = vmul.f32 %v2164_v3, %v2164_v3 }
 0x20c   : > { %3455 = vst.msk [vmem:[%s4275_s20 + $0x5a0] sm:$0xff] %vm3274_vm0, %v3975_v7  ;;  %v3130_v12 = vmul.f32 1.442695, %v2682_v8  ;;  %v1636_v14 = vpop.permute.xlu1 %1635  ;;  %v1631_v13 = vpop.permute.xlu0 %1630 }
 0x20d   : > { %3988 = vpow2.f32 %v3132_v9  ;;  %v2685_v17 = vsub.f32 0.0, %v2425_v10  ;;  %v2684_v18 = vsub.f32 0.0, %v2424_v11  ;;  %v2167_v20 = vsub.f32 %v1636_v14, %v5023_v19  ;;  %1945 = vperm.xlu1 %3611, %v662_v62   ;;  %1940 = vperm.xlu0 %3610, %v661_v63  }
 0x20e   : > { %v3977_v23 = vpop.eup %3976  ;;  %3990 = vpow2.f32 %v3130_v12  ;;  %v2166_v24 = vsub.f32 %v1631_v13, %v5023_v19 }
 0x20f   : > { %v3979_v25 = vpop.eup %3978  ;;  %3458 = vst.msk [vmem:[%s4275_s20 + $0x5b8] sm:$0xff] %vm3274_vm0, %v3977_v23  ;;  %v3136_v26 = vmul.f32 1.442695, %v2685_v17  ;;  %v3134_v27 = vmul.f32 1.442695, %v2684_v18  ;;  %v2427_v28 = vmul.f32 %v2167_v20, %v2167_v20 }
 0x210   : > { %3457 = vst.msk [vmem:[%s4275_s20 + $0x5b0] sm:$0xff] %vm3274_vm0, %v3979_v25  ;;  %v2426_v29 = vmul.f32 %v2166_v24, %v2166_v24  ;;  %v1646_v30 = vpop.permute.xlu1 %1645  ;;  %v1641_v31 = vpop.permute.xlu0 %1640 }
 0x211   : > { %3992 = vpow2.f32 %v3136_v26  ;;  %v2687_v34 = vsub.f32 0.0, %v2427_v28  ;;  %v2169_v35 = vsub.f32 %v1646_v30, %v5023_v19  ;;  %v2168_v36 = vsub.f32 %v1641_v31, %v5023_v19  ;;  %1955 = vperm.xlu1 %3611, %v664_v15   ;;  %1950 = vperm.xlu0 %3610, %v663_v16  }
 0x212   : > { %v3981_v37 = vpop.eup %3980  ;;  %3994 = vpow2.f32 %v3134_v27  ;;  %v2686_v38 = vsub.f32 0.0, %v2426_v29 }
 0x213   : > { %v3983_v39 = vpop.eup %3982  ;;  %3460 = vst.msk [vmem:[%s4275_s20 + $0x5c8] sm:$0xff] %vm3274_vm0, %v3981_v37  ;;  %v3140_v40 = vmul.f32 1.442695, %v2687_v34  ;;  %v2429_v41 = vmul.f32 %v2169_v35, %v2169_v35  ;;  %v2428_v42 = vmul.f32 %v2168_v36, %v2168_v36 }
 0x214   : > { %3459 = vst.msk [vmem:[%s4275_s20 + $0x5c0] sm:$0xff] %vm3274_vm0, %v3983_v39  ;;  %v3138_v43 = vmul.f32 1.442695, %v2686_v38  ;;  %v1656_v44 = vpop.permute.xlu1 %1655  ;;  %v1651_v45 = vpop.permute.xlu0 %1650 }
 0x215   : > { %3996 = vpow2.f32 %v3140_v40  ;;  %v2689_v46 = vsub.f32 0.0, %v2429_v41  ;;  %v2688_v47 = vsub.f32 0.0, %v2428_v42  ;;  %v2171_v48 = vsub.f32 %v1656_v44, %v5023_v19  ;;  %1965 = vperm.xlu1 %3611, %v666_v32   ;;  %1960 = vperm.xlu0 %3610, %v665_v33  }
 0x216   : > { %v3985_v49 = vpop.eup %3984  ;;  %3998 = vpow2.f32 %v3138_v43  ;;  %v2170_v50 = vsub.f32 %v1651_v45, %v5023_v19 }
 0x217   : > { %v3987_v51 = vpop.eup %3986  ;;  %3462 = vst.msk [vmem:[%s4275_s20 + $0x5d8] sm:$0xff] %vm3274_vm0, %v3985_v49  ;;  %v3144_v52 = vmul.f32 1.442695, %v2689_v46  ;;  %v3142_v53 = vmul.f32 1.442695, %v2688_v47  ;;  %v2431_v54 = vmul.f32 %v2171_v48, %v2171_v48 }
 0x218   : > { %3461 = vst.msk [vmem:[%s4275_s20 + $0x5d0] sm:$0xff] %vm3274_vm0, %v3987_v51  ;;  %v2430_v55 = vmul.f32 %v2170_v50, %v2170_v50  ;;  %v1666_v56 = vpop.permute.xlu1 %1665  ;;  %v1661_v57 = vpop.permute.xlu0 %1660 }
 0x219   : > { %4000 = vpow2.f32 %v3144_v52  ;;  %v2691_v58 = vsub.f32 0.0, %v2431_v54  ;;  %v2173_v59 = vsub.f32 %v1666_v56, %v5023_v19  ;;  %v2172_v1 = vsub.f32 %v1661_v57, %v5023_v19 }
 0x21a   : > { %v3989_v60 = vpop.eup %3988  ;;  %4002 = vpow2.f32 %v3142_v53  ;;  %v2690_v61 = vsub.f32 0.0, %v2430_v55 }
 0x21b   : > { %v3991_v62 = vpop.eup %3990  ;;  %3464 = vst.msk [vmem:[%s4275_s20 + $0x5e8] sm:$0xff] %vm3274_vm0, %v3989_v60  ;;  %v3148_v63 = vmul.f32 1.442695, %v2691_v58  ;;  %v2433_v2 = vmul.f32 %v2173_v59, %v2173_v59  ;;  %v2432_v0 = vmul.f32 %v2172_v1, %v2172_v1 }
 0x21c   : > { %3463 = vst.msk [vmem:[%s4275_s20 + $0x5e0] sm:$0xff] %vm3274_vm0, %v3991_v62  ;;  %v3146_v3 = vmul.f32 1.442695, %v2690_v61  ;;  %v1676_v4 = vpop.permute.xlu1 %1675  ;;  %v1671_v5 = vpop.permute.xlu0 %1670 }
 0x21d   : > { %4004 = vpow2.f32 %v3148_v63  ;;  %v2693_v6 = vsub.f32 0.0, %v2433_v2  ;;  %v2692_v8 = vsub.f32 0.0, %v2432_v0  ;;  %v2175_v7 = vsub.f32 %v1676_v4, %v5023_v19 }
 0x21e   : > { %v3993_v9 = vpop.eup %3992  ;;  %4006 = vpow2.f32 %v3146_v3  ;;  %v2174_v10 = vsub.f32 %v1671_v5, %v5023_v19 }
 0x21f   : > { %v3995_v11 = vpop.eup %3994  ;;  %3466 = vst.msk [vmem:[%s4275_s20 + $0x5f8] sm:$0xff] %vm3274_vm0, %v3993_v9  ;;  %v3152_v12 = vmul.f32 1.442695, %v2693_v6  ;;  %v3150_v14 = vmul.f32 1.442695, %v2692_v8  ;;  %v2435_v13 = vmul.f32 %v2175_v7, %v2175_v7 }
 0x220   : > { %3465 = vst.msk [vmem:[%s4275_s20 + $0x5f0] sm:$0xff] %vm3274_vm0, %v3995_v11  ;;  %v2434_v15 = vmul.f32 %v2174_v10, %v2174_v10  ;;  %v1686_v16 = vpop.permute.xlu1 %1685  ;;  %v1681_v17 = vpop.permute.xlu0 %1680 }
 0x221   : > { %4008 = vpow2.f32 %v3152_v12  ;;  %v2695_v18 = vsub.f32 0.0, %v2435_v13  ;;  %v2177_v20 = vsub.f32 %v1686_v16, %v5023_v19  ;;  %v2176_v21 = vsub.f32 %v1681_v17, %v5023_v19 }
 0x222   : > { %v3997_v22 = vpop.eup %3996  ;;  %4010 = vpow2.f32 %v3150_v14  ;;  %v2694_v23 = vsub.f32 0.0, %v2434_v15 }
 0x223   : > { %v3999_v24 = vpop.eup %3998  ;;  %3468 = vst.msk [vmem:[%s4275_s20 + $0x608] sm:$0xff] %vm3274_vm0, %v3997_v22  ;;  %v3156_v25 = vmul.f32 1.442695, %v2695_v18  ;;  %v2437_v26 = vmul.f32 %v2177_v20, %v2177_v20  ;;  %v2436_v27 = vmul.f32 %v2176_v21, %v2176_v21 }
 0x224   : > { %3467 = vst.msk [vmem:[%s4275_s20 + $0x600] sm:$0xff] %vm3274_vm0, %v3999_v24  ;;  %v3154_v28 = vmul.f32 1.442695, %v2694_v23  ;;  %v1696_v29 = vpop.permute.xlu1 %1695  ;;  %v1691_v30 = vpop.permute.xlu0 %1690 }
 0x225   : > { %4012 = vpow2.f32 %v3156_v25  ;;  %v2697_v31 = vsub.f32 0.0, %v2437_v26  ;;  %v2696_v32 = vsub.f32 0.0, %v2436_v27  ;;  %v2179_v33 = vsub.f32 %v1696_v29, %v5023_v19 }
 0x226   : > { %v4001_v34 = vpop.eup %4000  ;;  %4014 = vpow2.f32 %v3154_v28  ;;  %v2178_v35 = vsub.f32 %v1691_v30, %v5023_v19 }
 0x227   : > { %v4003_v36 = vpop.eup %4002  ;;  %3470 = vst.msk [vmem:[%s4275_s20 + $0x618] sm:$0xff] %vm3274_vm0, %v4001_v34  ;;  %v3160_v37 = vmul.f32 1.442695, %v2697_v31  ;;  %v3158_v38 = vmul.f32 1.442695, %v2696_v32  ;;  %v2439_v39 = vmul.f32 %v2179_v33, %v2179_v33 }
 0x228   : > { %3469 = vst.msk [vmem:[%s4275_s20 + $0x610] sm:$0xff] %vm3274_vm0, %v4003_v36  ;;  %v2438_v40 = vmul.f32 %v2178_v35, %v2178_v35  ;;  %v1706_v41 = vpop.permute.xlu1 %1705  ;;  %v1701_v42 = vpop.permute.xlu0 %1700 }
 0x229   : > { %4016 = vpow2.f32 %v3160_v37  ;;  %v2699_v43 = vsub.f32 0.0, %v2439_v39  ;;  %v2181_v44 = vsub.f32 %v1706_v41, %v5023_v19  ;;  %v2180_v45 = vsub.f32 %v1701_v42, %v5023_v19 }
 0x22a   : > { %v4005_v46 = vpop.eup %4004  ;;  %4018 = vpow2.f32 %v3158_v38  ;;  %v2698_v47 = vsub.f32 0.0, %v2438_v40 }
 0x22b   : > { %v4007_v48 = vpop.eup %4006  ;;  %3472 = vst.msk [vmem:[%s4275_s20 + $0x628] sm:$0xff] %vm3274_vm0, %v4005_v46  ;;  %v3164_v49 = vmul.f32 1.442695, %v2699_v43  ;;  %v2441_v50 = vmul.f32 %v2181_v44, %v2181_v44  ;;  %v2440_v51 = vmul.f32 %v2180_v45, %v2180_v45 }
 0x22c   : > { %3471 = vst.msk [vmem:[%s4275_s20 + $0x620] sm:$0xff] %vm3274_vm0, %v4007_v48  ;;  %v3162_v52 = vmul.f32 1.442695, %v2698_v47  ;;  %v1716_v53 = vpop.permute.xlu1 %1715  ;;  %v1711_v54 = vpop.permute.xlu0 %1710 }
 0x22d   : > { %4020 = vpow2.f32 %v3164_v49  ;;  %v2701_v55 = vsub.f32 0.0, %v2441_v50  ;;  %v2700_v56 = vsub.f32 0.0, %v2440_v51  ;;  %v2183_v57 = vsub.f32 %v1716_v53, %v5023_v19 }
 0x22e   : > { %v4009_v58 = vpop.eup %4008  ;;  %4022 = vpow2.f32 %v3162_v52  ;;  %v2182_v59 = vsub.f32 %v1711_v54, %v5023_v19 }
 0x22f   : > { %v4011_v1 = vpop.eup %4010  ;;  %3474 = vst.msk [vmem:[%s4275_s20 + $0x638] sm:$0xff] %vm3274_vm0, %v4009_v58  ;;  %v3168_v60 = vmul.f32 1.442695, %v2701_v55  ;;  %v3166_v61 = vmul.f32 1.442695, %v2700_v56  ;;  %v2443_v62 = vmul.f32 %v2183_v57, %v2183_v57 }
 0x230   : > { %3473 = vst.msk [vmem:[%s4275_s20 + $0x630] sm:$0xff] %vm3274_vm0, %v4011_v1  ;;  %v2442_v63 = vmul.f32 %v2182_v59, %v2182_v59  ;;  %v1726_v2 = vpop.permute.xlu1 %1725  ;;  %v1721_v0 = vpop.permute.xlu0 %1720 }
 0x231   : > { %4024 = vpow2.f32 %v3168_v60  ;;  %v2703_v3 = vsub.f32 0.0, %v2443_v62  ;;  %v2185_v4 = vsub.f32 %v1726_v2, %v5023_v19  ;;  %v2184_v5 = vsub.f32 %v1721_v0, %v5023_v19 }
 0x232   : > { %v4013_v6 = vpop.eup %4012  ;;  %4026 = vpow2.f32 %v3166_v61  ;;  %v2702_v8 = vsub.f32 0.0, %v2442_v63 }
 0x233   : > { %v4015_v7 = vpop.eup %4014  ;;  %3476 = vst.msk [vmem:[%s4275_s20 + $0x648] sm:$0xff] %vm3274_vm0, %v4013_v6  ;;  %v3172_v9 = vmul.f32 1.442695, %v2703_v3  ;;  %v2445_v10 = vmul.f32 %v2185_v4, %v2185_v4  ;;  %v2444_v11 = vmul.f32 %v2184_v5, %v2184_v5 }
 0x234   : > { %3475 = vst.msk [vmem:[%s4275_s20 + $0x640] sm:$0xff] %vm3274_vm0, %v4015_v7  ;;  %v3170_v12 = vmul.f32 1.442695, %v2702_v8  ;;  %v1736_v14 = vpop.permute.xlu1 %1735  ;;  %v1731_v13 = vpop.permute.xlu0 %1730 }
 0x235   : > { %4028 = vpow2.f32 %v3172_v9  ;;  %v2705_v15 = vsub.f32 0.0, %v2445_v10  ;;  %v2704_v16 = vsub.f32 0.0, %v2444_v11  ;;  %v2187_v17 = vsub.f32 %v1736_v14, %v5023_v19 }
 0x236   : > { %v4017_v18 = vpop.eup %4016  ;;  %4030 = vpow2.f32 %v3170_v12  ;;  %v2186_v20 = vsub.f32 %v1731_v13, %v5023_v19 }
 0x237   : > { %v4019_v21 = vpop.eup %4018  ;;  %3478 = vst.msk [vmem:[%s4275_s20 + $0x658] sm:$0xff] %vm3274_vm0, %v4017_v18  ;;  %v3176_v22 = vmul.f32 1.442695, %v2705_v15  ;;  %v3174_v23 = vmul.f32 1.442695, %v2704_v16  ;;  %v2447_v24 = vmul.f32 %v2187_v17, %v2187_v17 }
 0x238   : > { %3477 = vst.msk [vmem:[%s4275_s20 + $0x650] sm:$0xff] %vm3274_vm0, %v4019_v21  ;;  %v2446_v25 = vmul.f32 %v2186_v20, %v2186_v20  ;;  %v1746_v26 = vpop.permute.xlu1 %1745  ;;  %v1741_v27 = vpop.permute.xlu0 %1740 }
 0x239   : > { %4032 = vpow2.f32 %v3176_v22  ;;  %v2707_v28 = vsub.f32 0.0, %v2447_v24  ;;  %v2189_v29 = vsub.f32 %v1746_v26, %v5023_v19  ;;  %v2188_v30 = vsub.f32 %v1741_v27, %v5023_v19 }
 0x23a   : > { %v4021_v31 = vpop.eup %4020  ;;  %4034 = vpow2.f32 %v3174_v23  ;;  %v2706_v32 = vsub.f32 0.0, %v2446_v25 }
 0x23b   : > { %v4023_v33 = vpop.eup %4022  ;;  %3480 = vst.msk [vmem:[%s4275_s20 + $0x668] sm:$0xff] %vm3274_vm0, %v4021_v31  ;;  %v3180_v34 = vmul.f32 1.442695, %v2707_v28  ;;  %v2449_v35 = vmul.f32 %v2189_v29, %v2189_v29  ;;  %v2448_v36 = vmul.f32 %v2188_v30, %v2188_v30 }
 0x23c   : > { %3479 = vst.msk [vmem:[%s4275_s20 + $0x660] sm:$0xff] %vm3274_vm0, %v4023_v33  ;;  %v3178_v37 = vmul.f32 1.442695, %v2706_v32  ;;  %v1756_v38 = vpop.permute.xlu1 %1755  ;;  %v1751_v39 = vpop.permute.xlu0 %1750 }
 0x23d   : > { %4036 = vpow2.f32 %v3180_v34  ;;  %v2709_v40 = vsub.f32 0.0, %v2449_v35  ;;  %v2708_v41 = vsub.f32 0.0, %v2448_v36  ;;  %v2191_v42 = vsub.f32 %v1756_v38, %v5023_v19 }
 0x23e   : > { %v4025_v43 = vpop.eup %4024  ;;  %4038 = vpow2.f32 %v3178_v37  ;;  %v2190_v44 = vsub.f32 %v1751_v39, %v5023_v19 }
 0x23f   : > { %v4027_v45 = vpop.eup %4026  ;;  %3482 = vst.msk [vmem:[%s4275_s20 + $0x678] sm:$0xff] %vm3274_vm0, %v4025_v43  ;;  %v3184_v46 = vmul.f32 1.442695, %v2709_v40  ;;  %v3182_v47 = vmul.f32 1.442695, %v2708_v41  ;;  %v2451_v48 = vmul.f32 %v2191_v42, %v2191_v42 }
 0x240   : > { %3481 = vst.msk [vmem:[%s4275_s20 + $0x670] sm:$0xff] %vm3274_vm0, %v4027_v45  ;;  %v2450_v49 = vmul.f32 %v2190_v44, %v2190_v44  ;;  %v1766_v50 = vpop.permute.xlu1 %1765  ;;  %v1761_v51 = vpop.permute.xlu0 %1760 }
 0x241   : > { %4040 = vpow2.f32 %v3184_v46  ;;  %v2711_v52 = vsub.f32 0.0, %v2451_v48  ;;  %v2193_v53 = vsub.f32 %v1766_v50, %v5023_v19  ;;  %v2192_v54 = vsub.f32 %v1761_v51, %v5023_v19 }
 0x242   : > { %v4029_v55 = vpop.eup %4028  ;;  %4042 = vpow2.f32 %v3182_v47  ;;  %v2710_v56 = vsub.f32 0.0, %v2450_v49 }
 0x243   : > { %v4031_v57 = vpop.eup %4030  ;;  %3484 = vst.msk [vmem:[%s4275_s20 + $0x688] sm:$0xff] %vm3274_vm0, %v4029_v55  ;;  %v3188_v58 = vmul.f32 1.442695, %v2711_v52  ;;  %v2453_v59 = vmul.f32 %v2193_v53, %v2193_v53  ;;  %v2452_v1 = vmul.f32 %v2192_v54, %v2192_v54 }
 0x244   : > { %3483 = vst.msk [vmem:[%s4275_s20 + $0x680] sm:$0xff] %vm3274_vm0, %v4031_v57  ;;  %v3186_v60 = vmul.f32 1.442695, %v2710_v56  ;;  %v1776_v61 = vpop.permute.xlu1 %1775  ;;  %v1771_v62 = vpop.permute.xlu0 %1770 }
 0x245   : > { %4044 = vpow2.f32 %v3188_v58  ;;  %v2713_v63 = vsub.f32 0.0, %v2453_v59  ;;  %v2712_v2 = vsub.f32 0.0, %v2452_v1  ;;  %v2195_v0 = vsub.f32 %v1776_v61, %v5023_v19 }
 0x246   : > { %v4033_v3 = vpop.eup %4032  ;;  %4046 = vpow2.f32 %v3186_v60  ;;  %v2194_v4 = vsub.f32 %v1771_v62, %v5023_v19 }
 0x247   : > { %v4035_v5 = vpop.eup %4034  ;;  %3486 = vst.msk [vmem:[%s4275_s20 + $0x698] sm:$0xff] %vm3274_vm0, %v4033_v3  ;;  %v3192_v6 = vmul.f32 1.442695, %v2713_v63  ;;  %v3190_v8 = vmul.f32 1.442695, %v2712_v2  ;;  %v2455_v7 = vmul.f32 %v2195_v0, %v2195_v0 }
 0x248   : > { %3485 = vst.msk [vmem:[%s4275_s20 + $0x690] sm:$0xff] %vm3274_vm0, %v4035_v5  ;;  %v2454_v9 = vmul.f32 %v2194_v4, %v2194_v4  ;;  %v1786_v10 = vpop.permute.xlu1 %1785  ;;  %v1781_v11 = vpop.permute.xlu0 %1780 }
 0x249   : > { %4048 = vpow2.f32 %v3192_v6  ;;  %v2715_v12 = vsub.f32 0.0, %v2455_v7  ;;  %v2197_v14 = vsub.f32 %v1786_v10, %v5023_v19  ;;  %v2196_v13 = vsub.f32 %v1781_v11, %v5023_v19 }
 0x24a   : > { %v4037_v15 = vpop.eup %4036  ;;  %4050 = vpow2.f32 %v3190_v8  ;;  %v2714_v16 = vsub.f32 0.0, %v2454_v9 }
 0x24b   : > { %v4039_v17 = vpop.eup %4038  ;;  %3488 = vst.msk [vmem:[%s4275_s20 + $0x6a8] sm:$0xff] %vm3274_vm0, %v4037_v15  ;;  %v3196_v18 = vmul.f32 1.442695, %v2715_v12  ;;  %v2457_v20 = vmul.f32 %v2197_v14, %v2197_v14  ;;  %v2456_v21 = vmul.f32 %v2196_v13, %v2196_v13 }
 0x24c   : > { %3487 = vst.msk [vmem:[%s4275_s20 + $0x6a0] sm:$0xff] %vm3274_vm0, %v4039_v17  ;;  %v3194_v22 = vmul.f32 1.442695, %v2714_v16  ;;  %v1796_v23 = vpop.permute.xlu1 %1795  ;;  %v1791_v24 = vpop.permute.xlu0 %1790 }
 0x24d   : > { %4052 = vpow2.f32 %v3196_v18  ;;  %v2717_v25 = vsub.f32 0.0, %v2457_v20  ;;  %v2716_v26 = vsub.f32 0.0, %v2456_v21  ;;  %v2199_v27 = vsub.f32 %v1796_v23, %v5023_v19 }
 0x24e   : > { %v4041_v28 = vpop.eup %4040  ;;  %4054 = vpow2.f32 %v3194_v22  ;;  %v2198_v29 = vsub.f32 %v1791_v24, %v5023_v19 }
 0x24f   : > { %v4043_v30 = vpop.eup %4042  ;;  %3490 = vst.msk [vmem:[%s4275_s20 + $0x6b8] sm:$0xff] %vm3274_vm0, %v4041_v28  ;;  %v3200_v31 = vmul.f32 1.442695, %v2717_v25  ;;  %v3198_v32 = vmul.f32 1.442695, %v2716_v26  ;;  %v2459_v33 = vmul.f32 %v2199_v27, %v2199_v27 }
 0x250   : > { %3489 = vst.msk [vmem:[%s4275_s20 + $0x6b0] sm:$0xff] %vm3274_vm0, %v4043_v30  ;;  %v2458_v34 = vmul.f32 %v2198_v29, %v2198_v29  ;;  %v1806_v35 = vpop.permute.xlu1 %1805  ;;  %v1801_v36 = vpop.permute.xlu0 %1800 }
 0x251   : > { %4056 = vpow2.f32 %v3200_v31  ;;  %v2719_v37 = vsub.f32 0.0, %v2459_v33  ;;  %v2201_v38 = vsub.f32 %v1806_v35, %v5023_v19  ;;  %v2200_v39 = vsub.f32 %v1801_v36, %v5023_v19 }
 0x252   : > { %v4045_v40 = vpop.eup %4044  ;;  %4058 = vpow2.f32 %v3198_v32  ;;  %v2718_v41 = vsub.f32 0.0, %v2458_v34 }
 0x253   : > { %v4047_v42 = vpop.eup %4046  ;;  %3492 = vst.msk [vmem:[%s4275_s20 + $0x6c8] sm:$0xff] %vm3274_vm0, %v4045_v40  ;;  %v3204_v43 = vmul.f32 1.442695, %v2719_v37  ;;  %v2461_v44 = vmul.f32 %v2201_v38, %v2201_v38  ;;  %v2460_v45 = vmul.f32 %v2200_v39, %v2200_v39 }
 0x254   : > { %3491 = vst.msk [vmem:[%s4275_s20 + $0x6c0] sm:$0xff] %vm3274_vm0, %v4047_v42  ;;  %v3202_v46 = vmul.f32 1.442695, %v2718_v41  ;;  %v1816_v47 = vpop.permute.xlu1 %1815  ;;  %v1811_v48 = vpop.permute.xlu0 %1810 }
 0x255   : > { %4060 = vpow2.f32 %v3204_v43  ;;  %v2721_v49 = vsub.f32 0.0, %v2461_v44  ;;  %v2720_v50 = vsub.f32 0.0, %v2460_v45  ;;  %v2203_v51 = vsub.f32 %v1816_v47, %v5023_v19 }
 0x256   : > { %v4049_v52 = vpop.eup %4048  ;;  %4062 = vpow2.f32 %v3202_v46  ;;  %v2202_v53 = vsub.f32 %v1811_v48, %v5023_v19 }
 0x257   : > { %v4051_v54 = vpop.eup %4050  ;;  %3494 = vst.msk [vmem:[%s4275_s20 + $0x6d8] sm:$0xff] %vm3274_vm0, %v4049_v52  ;;  %v3208_v55 = vmul.f32 1.442695, %v2721_v49  ;;  %v3206_v56 = vmul.f32 1.442695, %v2720_v50  ;;  %v2463_v57 = vmul.f32 %v2203_v51, %v2203_v51 }
 0x258   : > { %3493 = vst.msk [vmem:[%s4275_s20 + $0x6d0] sm:$0xff] %vm3274_vm0, %v4051_v54  ;;  %v2462_v58 = vmul.f32 %v2202_v53, %v2202_v53  ;;  %v1826_v59 = vpop.permute.xlu1 %1825  ;;  %v1821_v1 = vpop.permute.xlu0 %1820 }
 0x259   : > { %4064 = vpow2.f32 %v3208_v55  ;;  %v2723_v60 = vsub.f32 0.0, %v2463_v57  ;;  %v2205_v61 = vsub.f32 %v1826_v59, %v5023_v19  ;;  %v2204_v62 = vsub.f32 %v1821_v1, %v5023_v19 }
 0x25a   : > { %v4053_v63 = vpop.eup %4052  ;;  %4066 = vpow2.f32 %v3206_v56  ;;  %v2722_v2 = vsub.f32 0.0, %v2462_v58 }
 0x25b   : > { %v4055_v0 = vpop.eup %4054  ;;  %3496 = vst.msk [vmem:[%s4275_s20 + $0x6e8] sm:$0xff] %vm3274_vm0, %v4053_v63  ;;  %v3212_v3 = vmul.f32 1.442695, %v2723_v60  ;;  %v2465_v4 = vmul.f32 %v2205_v61, %v2205_v61  ;;  %v2464_v5 = vmul.f32 %v2204_v62, %v2204_v62 }
 0x25c   : > { %3495 = vst.msk [vmem:[%s4275_s20 + $0x6e0] sm:$0xff] %vm3274_vm0, %v4055_v0  ;;  %v3210_v6 = vmul.f32 1.442695, %v2722_v2  ;;  %v1836_v8 = vpop.permute.xlu1 %1835  ;;  %v1831_v7 = vpop.permute.xlu0 %1830 }
 0x25d   : > { %4068 = vpow2.f32 %v3212_v3  ;;  %v2725_v9 = vsub.f32 0.0, %v2465_v4  ;;  %v2724_v10 = vsub.f32 0.0, %v2464_v5  ;;  %v2207_v11 = vsub.f32 %v1836_v8, %v5023_v19 }
 0x25e   : > { %v4057_v12 = vpop.eup %4056  ;;  %4070 = vpow2.f32 %v3210_v6  ;;  %v2206_v14 = vsub.f32 %v1831_v7, %v5023_v19 }
 0x25f   : > { %v4059_v13 = vpop.eup %4058  ;;  %3498 = vst.msk [vmem:[%s4275_s20 + $0x6f8] sm:$0xff] %vm3274_vm0, %v4057_v12  ;;  %v3216_v15 = vmul.f32 1.442695, %v2725_v9  ;;  %v3214_v16 = vmul.f32 1.442695, %v2724_v10  ;;  %v2467_v17 = vmul.f32 %v2207_v11, %v2207_v11 }
 0x260   : > { %3497 = vst.msk [vmem:[%s4275_s20 + $0x6f0] sm:$0xff] %vm3274_vm0, %v4059_v13  ;;  %v2466_v18 = vmul.f32 %v2206_v14, %v2206_v14  ;;  %v1846_v20 = vpop.permute.xlu1 %1845  ;;  %v1841_v21 = vpop.permute.xlu0 %1840 }
 0x261   : > { %4072 = vpow2.f32 %v3216_v15  ;;  %v2727_v22 = vsub.f32 0.0, %v2467_v17  ;;  %v2209_v23 = vsub.f32 %v1846_v20, %v5023_v19  ;;  %v2208_v24 = vsub.f32 %v1841_v21, %v5023_v19 }
 0x262   : > { %v4061_v25 = vpop.eup %4060  ;;  %4074 = vpow2.f32 %v3214_v16  ;;  %v2726_v26 = vsub.f32 0.0, %v2466_v18 }
 0x263   : > { %v4063_v27 = vpop.eup %4062  ;;  %3500 = vst.msk [vmem:[%s4275_s20 + $0x708] sm:$0xff] %vm3274_vm0, %v4061_v25  ;;  %v3220_v28 = vmul.f32 1.442695, %v2727_v22  ;;  %v2469_v29 = vmul.f32 %v2209_v23, %v2209_v23  ;;  %v2468_v30 = vmul.f32 %v2208_v24, %v2208_v24 }
 0x264   : > { %3499 = vst.msk [vmem:[%s4275_s20 + $0x700] sm:$0xff] %vm3274_vm0, %v4063_v27  ;;  %v3218_v31 = vmul.f32 1.442695, %v2726_v26  ;;  %v1856_v32 = vpop.permute.xlu1 %1855  ;;  %v1851_v33 = vpop.permute.xlu0 %1850 }
 0x265   : > { %4076 = vpow2.f32 %v3220_v28  ;;  %v2729_v34 = vsub.f32 0.0, %v2469_v29  ;;  %v2728_v35 = vsub.f32 0.0, %v2468_v30  ;;  %v2211_v36 = vsub.f32 %v1856_v32, %v5023_v19 }
 0x266   : > { %v4065_v37 = vpop.eup %4064  ;;  %4078 = vpow2.f32 %v3218_v31  ;;  %v2210_v38 = vsub.f32 %v1851_v33, %v5023_v19 }
 0x267   : > { %v4067_v39 = vpop.eup %4066  ;;  %3502 = vst.msk [vmem:[%s4275_s20 + $0x718] sm:$0xff] %vm3274_vm0, %v4065_v37  ;;  %v3224_v40 = vmul.f32 1.442695, %v2729_v34  ;;  %v3222_v41 = vmul.f32 1.442695, %v2728_v35  ;;  %v2471_v42 = vmul.f32 %v2211_v36, %v2211_v36 }
 0x268   : > { %3501 = vst.msk [vmem:[%s4275_s20 + $0x710] sm:$0xff] %vm3274_vm0, %v4067_v39  ;;  %v2470_v43 = vmul.f32 %v2210_v38, %v2210_v38  ;;  %v1866_v44 = vpop.permute.xlu1 %1865  ;;  %v1861_v45 = vpop.permute.xlu0 %1860 }
 0x269   : > { %4080 = vpow2.f32 %v3224_v40  ;;  %v2731_v46 = vsub.f32 0.0, %v2471_v42  ;;  %v2213_v47 = vsub.f32 %v1866_v44, %v5023_v19  ;;  %v2212_v48 = vsub.f32 %v1861_v45, %v5023_v19 }
 0x26a   : > { %v4069_v49 = vpop.eup %4068  ;;  %4082 = vpow2.f32 %v3222_v41  ;;  %v2730_v50 = vsub.f32 0.0, %v2470_v43 }
 0x26b   : > { %v4071_v51 = vpop.eup %4070  ;;  %3504 = vst.msk [vmem:[%s4275_s20 + $0x728] sm:$0xff] %vm3274_vm0, %v4069_v49  ;;  %v3228_v52 = vmul.f32 1.442695, %v2731_v46  ;;  %v2473_v53 = vmul.f32 %v2213_v47, %v2213_v47  ;;  %v2472_v54 = vmul.f32 %v2212_v48, %v2212_v48 }
 0x26c   : > { %3503 = vst.msk [vmem:[%s4275_s20 + $0x720] sm:$0xff] %vm3274_vm0, %v4071_v51  ;;  %v3226_v55 = vmul.f32 1.442695, %v2730_v50  ;;  %v1876_v56 = vpop.permute.xlu1 %1875  ;;  %v1871_v57 = vpop.permute.xlu0 %1870 }
 0x26d   : > { %4084 = vpow2.f32 %v3228_v52  ;;  %v2733_v58 = vsub.f32 0.0, %v2473_v53  ;;  %v2732_v59 = vsub.f32 0.0, %v2472_v54  ;;  %v2215_v1 = vsub.f32 %v1876_v56, %v5023_v19 }
 0x26e   : > { %v4073_v60 = vpop.eup %4072  ;;  %4086 = vpow2.f32 %v3226_v55  ;;  %v2214_v61 = vsub.f32 %v1871_v57, %v5023_v19 }
 0x26f   : > { %v4075_v62 = vpop.eup %4074  ;;  %3506 = vst.msk [vmem:[%s4275_s20 + $0x738] sm:$0xff] %vm3274_vm0, %v4073_v60  ;;  %v3232_v63 = vmul.f32 1.442695, %v2733_v58  ;;  %v3230_v2 = vmul.f32 1.442695, %v2732_v59  ;;  %v2475_v0 = vmul.f32 %v2215_v1, %v2215_v1 }
 0x270   : > { %3505 = vst.msk [vmem:[%s4275_s20 + $0x730] sm:$0xff] %vm3274_vm0, %v4075_v62  ;;  %v2474_v3 = vmul.f32 %v2214_v61, %v2214_v61  ;;  %v1886_v4 = vpop.permute.xlu1 %1885  ;;  %v1881_v5 = vpop.permute.xlu0 %1880 }
 0x271   : > { %4088 = vpow2.f32 %v3232_v63  ;;  %v2735_v6 = vsub.f32 0.0, %v2475_v0  ;;  %v2217_v8 = vsub.f32 %v1886_v4, %v5023_v19  ;;  %v2216_v7 = vsub.f32 %v1881_v5, %v5023_v19 }
 0x272   : > { %v4077_v9 = vpop.eup %4076  ;;  %4090 = vpow2.f32 %v3230_v2  ;;  %v2734_v10 = vsub.f32 0.0, %v2474_v3 }
 0x273   : > { %v4079_v11 = vpop.eup %4078  ;;  %3508 = vst.msk [vmem:[%s4275_s20 + $0x748] sm:$0xff] %vm3274_vm0, %v4077_v9  ;;  %v3236_v12 = vmul.f32 1.442695, %v2735_v6  ;;  %v2477_v14 = vmul.f32 %v2217_v8, %v2217_v8  ;;  %v2476_v13 = vmul.f32 %v2216_v7, %v2216_v7 }
 0x274   : > { %3507 = vst.msk [vmem:[%s4275_s20 + $0x740] sm:$0xff] %vm3274_vm0, %v4079_v11  ;;  %v3234_v15 = vmul.f32 1.442695, %v2734_v10  ;;  %v1896_v16 = vpop.permute.xlu1 %1895  ;;  %v1891_v17 = vpop.permute.xlu0 %1890 }
 0x275   : > { %4092 = vpow2.f32 %v3236_v12  ;;  %v2737_v18 = vsub.f32 0.0, %v2477_v14  ;;  %v2736_v20 = vsub.f32 0.0, %v2476_v13  ;;  %v2219_v21 = vsub.f32 %v1896_v16, %v5023_v19 }
 0x276   : > { %v4081_v22 = vpop.eup %4080  ;;  %4094 = vpow2.f32 %v3234_v15  ;;  %v2218_v23 = vsub.f32 %v1891_v17, %v5023_v19 }
 0x277   : > { %v4083_v24 = vpop.eup %4082  ;;  %3510 = vst.msk [vmem:[%s4275_s20 + $0x758] sm:$0xff] %vm3274_vm0, %v4081_v22  ;;  %v3240_v25 = vmul.f32 1.442695, %v2737_v18  ;;  %v3238_v26 = vmul.f32 1.442695, %v2736_v20  ;;  %v2479_v27 = vmul.f32 %v2219_v21, %v2219_v21 }
 0x278   : > { %3509 = vst.msk [vmem:[%s4275_s20 + $0x750] sm:$0xff] %vm3274_vm0, %v4083_v24  ;;  %v2478_v28 = vmul.f32 %v2218_v23, %v2218_v23  ;;  %v1906_v29 = vpop.permute.xlu1 %1905  ;;  %v1901_v30 = vpop.permute.xlu0 %1900 }
 0x279   : > { %4096 = vpow2.f32 %v3240_v25  ;;  %v2739_v31 = vsub.f32 0.0, %v2479_v27  ;;  %v2221_v32 = vsub.f32 %v1906_v29, %v5023_v19  ;;  %v2220_v33 = vsub.f32 %v1901_v30, %v5023_v19 }
 0x27a   : > { %v4085_v34 = vpop.eup %4084  ;;  %4098 = vpow2.f32 %v3238_v26  ;;  %v2738_v35 = vsub.f32 0.0, %v2478_v28 }
 0x27b   : > { %v4087_v36 = vpop.eup %4086  ;;  %3512 = vst.msk [vmem:[%s4275_s20 + $0x768] sm:$0xff] %vm3274_vm0, %v4085_v34  ;;  %v3244_v37 = vmul.f32 1.442695, %v2739_v31  ;;  %v2481_v38 = vmul.f32 %v2221_v32, %v2221_v32  ;;  %v2480_v39 = vmul.f32 %v2220_v33, %v2220_v33 }
 0x27c   : > { %3511 = vst.msk [vmem:[%s4275_s20 + $0x760] sm:$0xff] %vm3274_vm0, %v4087_v36  ;;  %v3242_v40 = vmul.f32 1.442695, %v2738_v35  ;;  %v1916_v41 = vpop.permute.xlu1 %1915  ;;  %v1911_v42 = vpop.permute.xlu0 %1910 }
 0x27d   : > { %4100 = vpow2.f32 %v3244_v37  ;;  %v2741_v43 = vsub.f32 0.0, %v2481_v38  ;;  %v2740_v44 = vsub.f32 0.0, %v2480_v39  ;;  %v2223_v45 = vsub.f32 %v1916_v41, %v5023_v19 }
 0x27e   : > { %v4089_v46 = vpop.eup %4088  ;;  %4102 = vpow2.f32 %v3242_v40  ;;  %v2222_v47 = vsub.f32 %v1911_v42, %v5023_v19 }
 0x27f   : > { %v4091_v48 = vpop.eup %4090  ;;  %3514 = vst.msk [vmem:[%s4275_s20 + $0x778] sm:$0xff] %vm3274_vm0, %v4089_v46  ;;  %v3248_v49 = vmul.f32 1.442695, %v2741_v43  ;;  %v3246_v50 = vmul.f32 1.442695, %v2740_v44  ;;  %v2483_v51 = vmul.f32 %v2223_v45, %v2223_v45 }
 0x280   : > { %3513 = vst.msk [vmem:[%s4275_s20 + $0x770] sm:$0xff] %vm3274_vm0, %v4091_v48  ;;  %v2482_v52 = vmul.f32 %v2222_v47, %v2222_v47  ;;  %v1926_v53 = vpop.permute.xlu1 %1925  ;;  %v1921_v54 = vpop.permute.xlu0 %1920 }
 0x281   : > { %4104 = vpow2.f32 %v3248_v49  ;;  %v2743_v55 = vsub.f32 0.0, %v2483_v51  ;;  %v2225_v56 = vsub.f32 %v1926_v53, %v5023_v19  ;;  %v2224_v57 = vsub.f32 %v1921_v54, %v5023_v19 }
 0x282   : > { %v4093_v58 = vpop.eup %4092  ;;  %4106 = vpow2.f32 %v3246_v50  ;;  %v2742_v59 = vsub.f32 0.0, %v2482_v52 }
 0x283   : > { %v4095_v1 = vpop.eup %4094  ;;  %3516 = vst.msk [vmem:[%s4275_s20 + $0x788] sm:$0xff] %vm3274_vm0, %v4093_v58  ;;  %v3252_v60 = vmul.f32 1.442695, %v2743_v55  ;;  %v2485_v61 = vmul.f32 %v2225_v56, %v2225_v56  ;;  %v2484_v62 = vmul.f32 %v2224_v57, %v2224_v57 }
 0x284   : > { %3515 = vst.msk [vmem:[%s4275_s20 + $0x780] sm:$0xff] %vm3274_vm0, %v4095_v1  ;;  %v3250_v63 = vmul.f32 1.442695, %v2742_v59  ;;  %v1936_v2 = vpop.permute.xlu1 %1935  ;;  %v1931_v0 = vpop.permute.xlu0 %1930 }
 0x285   : > { %4108 = vpow2.f32 %v3252_v60  ;;  %v2745_v3 = vsub.f32 0.0, %v2485_v61  ;;  %v2744_v4 = vsub.f32 0.0, %v2484_v62  ;;  %v2227_v5 = vsub.f32 %v1936_v2, %v5023_v19 }
 0x286   : > { %v4097_v6 = vpop.eup %4096  ;;  %4110 = vpow2.f32 %v3250_v63  ;;  %v2226_v8 = vsub.f32 %v1931_v0, %v5023_v19 }
 0x287   : > { %v4099_v7 = vpop.eup %4098  ;;  %3518 = vst.msk [vmem:[%s4275_s20 + $0x798] sm:$0xff] %vm3274_vm0, %v4097_v6  ;;  %v3256_v9 = vmul.f32 1.442695, %v2745_v3  ;;  %v3254_v10 = vmul.f32 1.442695, %v2744_v4  ;;  %v2487_v11 = vmul.f32 %v2227_v5, %v2227_v5 }
 0x288   : > { %3517 = vst.msk [vmem:[%s4275_s20 + $0x790] sm:$0xff] %vm3274_vm0, %v4099_v7  ;;  %v2486_v12 = vmul.f32 %v2226_v8, %v2226_v8  ;;  %v1946_v14 = vpop.permute.xlu1 %1945  ;;  %v1941_v13 = vpop.permute.xlu0 %1940 }
 0x289   : > { %4112 = vpow2.f32 %v3256_v9  ;;  %v2747_v15 = vsub.f32 0.0, %v2487_v11  ;;  %v2229_v16 = vsub.f32 %v1946_v14, %v5023_v19  ;;  %v2228_v17 = vsub.f32 %v1941_v13, %v5023_v19  ;;  %v4136_v19 = vld [vmem:[%s5254_s1] ss:$0 sm:$0xff] }
 0x28a   : > { %v4101_v18 = vpop.eup %4100  ;;  %4114 = vpow2.f32 %v3254_v10  ;;  %v2746_v20 = vsub.f32 0.0, %v2486_v12 }
 0x28b   : > { %v4103_v21 = vpop.eup %4102  ;;  %3520 = vst.msk [vmem:[%s4275_s20 + $0x7a8] sm:$0xff] %vm3274_vm0, %v4101_v18  ;;  %v3260_v22 = vmul.f32 1.442695, %v2747_v15  ;;  %v2489_v23 = vmul.f32 %v2229_v16, %v2229_v16  ;;  %v2488_v24 = vmul.f32 %v2228_v17, %v2228_v17 }
 0x28c   : > { %3519 = vst.msk [vmem:[%s4275_s20 + $0x7a0] sm:$0xff] %vm3274_vm0, %v4103_v21  ;;  %v3258_v25 = vmul.f32 1.442695, %v2746_v20  ;;  %v1956_v26 = vpop.permute.xlu1 %1955  ;;  %v1951_v27 = vpop.permute.xlu0 %1950 }
 0x28d   : > { %4116 = vpow2.f32 %v3260_v22  ;;  %v2749_v28 = vsub.f32 0.0, %v2489_v23  ;;  %v2748_v29 = vsub.f32 0.0, %v2488_v24  ;;  %v2231_v30 = vsub.f32 %v1956_v26, %v4136_v19 }
 0x28e   : > { %v4105_v31 = vpop.eup %4104  ;;  %4118 = vpow2.f32 %v3258_v25  ;;  %v2230_v32 = vsub.f32 %v1951_v27, %v4136_v19 }
 0x28f   : > { %v4107_v33 = vpop.eup %4106  ;;  %3522 = vst.msk [vmem:[%s4275_s20 + $0x7b8] sm:$0xff] %vm3274_vm0, %v4105_v31  ;;  %v3264_v34 = vmul.f32 1.442695, %v2749_v28  ;;  %v3262_v35 = vmul.f32 1.442695, %v2748_v29  ;;  %v2491_v36 = vmul.f32 %v2231_v30, %v2231_v30 }
 0x290   : > { %3521 = vst.msk [vmem:[%s4275_s20 + $0x7b0] sm:$0xff] %vm3274_vm0, %v4107_v33  ;;  %v2490_v37 = vmul.f32 %v2230_v32, %v2230_v32  ;;  %v1966_v38 = vpop.permute.xlu1 %1965  ;;  %v1961_v39 = vpop.permute.xlu0 %1960 }
 0x291   : > { %4120 = vpow2.f32 %v3264_v34  ;;  %v2751_v40 = vsub.f32 0.0, %v2491_v36  ;;  %v2233_v41 = vsub.f32 %v1966_v38, %v4136_v19  ;;  %v2232_v42 = vsub.f32 %v1961_v39, %v4136_v19 }
 0x292   : > { %v4109_v43 = vpop.eup %4108  ;;  %4122 = vpow2.f32 %v3262_v35  ;;  %v2750_v44 = vsub.f32 0.0, %v2490_v37 }
 0x293   : > { %v4111_v45 = vpop.eup %4110  ;;  %3524 = vst.msk [vmem:[%s4275_s20 + $0x7c8] sm:$0xff] %vm3274_vm0, %v4109_v43  ;;  %v3268_v46 = vmul.f32 1.442695, %v2751_v40  ;;  %v2493_v47 = vmul.f32 %v2233_v41, %v2233_v41  ;;  %v2492_v48 = vmul.f32 %v2232_v42, %v2232_v42 }
 0x294   : > { %3523 = vst.msk [vmem:[%s4275_s20 + $0x7c0] sm:$0xff] %vm3274_vm0, %v4111_v45  ;;  %v3266_v49 = vmul.f32 1.442695, %v2750_v44 }
 0x295   : > { %4124 = vpow2.f32 %v3268_v46  ;;  %v2753_v50 = vsub.f32 0.0, %v2493_v47  ;;  %v2752_v51 = vsub.f32 0.0, %v2492_v48 }
 0x296   : > { %v4113_v52 = vpop.eup %4112  ;;  %4126 = vpow2.f32 %v3266_v49 }
 0x297   : > { %v4115_v53 = vpop.eup %4114  ;;  %3526 = vst.msk [vmem:[%s4275_s20 + $0x7d8] sm:$0xff] %vm3274_vm0, %v4113_v52  ;;  %v3272_v54 = vmul.f32 1.442695, %v2753_v50  ;;  %v3270_v55 = vmul.f32 1.442695, %v2752_v51 }
 0x298   : > { %3525 = vst.msk [vmem:[%s4275_s20 + $0x7d0] sm:$0xff] %vm3274_vm0, %v4115_v53 }
 0x299   : > { %4128 = vpow2.f32 %v3272_v54 }
 0x29a   : > { %v4117_v56 = vpop.eup %4116  ;;  %4130 = vpow2.f32 %v3270_v55 }
 0x29b   : > { %v4119_v57 = vpop.eup %4118  ;;  %3528 = vst.msk [vmem:[%s4275_s20 + $0x7e8] sm:$0xff] %vm3274_vm0, %v4117_v56 }
 0x29c   : > { %3527 = vst.msk [vmem:[%s4275_s20 + $0x7e0] sm:$0xff] %vm3274_vm0, %v4119_v57 }
 0x29e   : > { %v4121_v58 = vpop.eup %4120 }
 0x29f   : > { %v4123_v59 = vpop.eup %4122  ;;  %3530 = vst.msk [vmem:[%s4275_s20 + $0x7f8] sm:$0xff] %vm3274_vm0, %v4121_v58 }
 0x2a0   : > { %3529 = vst.msk [vmem:[%s4275_s20 + $0x7f0] sm:$0xff] %vm3274_vm0, %v4123_v59 }
 0x2a2   : > { %v4125_v1 = vpop.eup %4124 }
 0x2a3   : > { %v4127_v60 = vpop.eup %4126  ;;  %3532 = vst.msk [vmem:[%s4275_s20 + $0x808] sm:$0xff] %vm3274_vm0, %v4125_v1 }
 0x2a4   : > { %3531 = vst.msk [vmem:[%s4275_s20 + $0x800] sm:$0xff] %vm3274_vm0, %v4127_v60 }
 0x2a6   : > { %v4129_v61 = vpop.eup %4128 }
 0x2a7   : > { %v4131_v62 = vpop.eup %4130  ;;  %3534 = vst.msk [vmem:[%s4275_s20 + $0x818] sm:$0xff] %vm3274_vm0, %v4129_v61 }
 0x2a8   : > { %3533 = vst.msk [vmem:[%s4275_s20 + $0x810] sm:$0xff] %vm3274_vm0, %v4131_v62 }
 0x2a9 PF: > { %s12_s9 = sadd.s32 1, %s4143_s9  }
 0x2aa   : > { %p9_p4 = scmp.ge.s32.totalorder %s12_s9, 4  }
 0x2ac   :  { %11 = sbr.rel (!%p9_p4) target bundleno = 1 (0x1), region = 58 }

</bundles_post_ra>
